<compile_context>
chip_gen: v7x
topology: tpu7x:2x2x1
jax: 0.10.0
libtpu: 0.0.40
codegen_flags: <defaults>
</compile_context>

<pallas_src>
import jax
import jax.numpy as jnp
from jax.experimental import pallas as pl
from jax.experimental.pallas import tpu as pltpu

D_IN = 2
HIDDEN = 50
D_OUT = 2
PAD = 128          # lane-padded feature dimension
N_LAYERS = 6
NUM_CORES = 2      # grid width over the collocation axis ("parallel" -> both v7x TCs)

N = 128            # number of collocation points (small stand-in for 500)
P = 8              # number of parameter rows (small stand-in for 5000)


def _round_up(x, m):
    return (x + m - 1) // m * m


def _make_kernel(n_half, n_actual, matmul_dtype):
    """Kernel for one grid step (= one TensorCore's half of the points)."""
    n = n_half

    def pinn_loss_kernel(x_ref, w01_ref, ws_ref, bs_ref, para_ref, out_ref,
                         s_ref, z_ref):
        core = pl.program_id(0)

        # ---------------- layer 0: Linear(2,50) + tanh -----------------------
        # Only 2 input features -> two rank-1 VPU products, no MXU, exact f32.
        # Incoming tangents are e_x / e_t and incoming d2/dt2 is 0, so
        # z_x = W0 row "x", z_t = W0 row "t" for every point.
        r0 = w01_ref[0:1, :]                     # (1, PAD)  W0 row 0 (d/dx)
        r1 = w01_ref[1:2, :]                     # (1, PAD)  W0 row 1 (d/dt)
        xc = x_ref[:, 0:1]                       # (n, 1)
        tc = x_ref[:, 1:2]                       # (n, 1)
        z = xc * r0 + tc * r1 + bs_ref[0]        # (n, PAD)
        a = jnp.tanh(z)
        s = 1.0 - a * a                          # tanh'
        # stacked state layout: [h ; h_x ; h_tt ; h_t]
        s_ref[0 * n:1 * n, :] = a
        s_ref[1 * n:2 * n, :] = s * r0                               # h_x
        s_ref[2 * n:3 * n, :] = (-2.0 * a) * (s * (r1 * r1))         # h_tt (z_tt==0)
        s_ref[3 * n:4 * n, :] = s * r1                               # h_t

        # -------- layers 1..4: one fused (4n,PAD)x(PAD,PAD) matmul each ------
        for i in range(1, N_LAYERS - 1):
            # bf16 operands (f32 accumulation); dot drains into the ping-pong
            # scratch, elementwise chain rule writes back into the state stack.
            z_ref[...] = jnp.dot(s_ref[...].astype(matmul_dtype), ws_ref[i - 1],
                                 preferred_element_type=jnp.float32)
            zv = z_ref[0 * n:1 * n, :] + bs_ref[i]
            zx = z_ref[1 * n:2 * n, :]
            ztt = z_ref[2 * n:3 * n, :]
            zt = z_ref[3 * n:4 * n, :]
            a = jnp.tanh(zv)
            s = 1.0 - a * a
            s_ref[0 * n:1 * n, :] = a
            s_ref[1 * n:2 * n, :] = s * zx
            # (tanh)'' chain rule: h_tt = s*z_tt - 2*a*s*(z_t)^2
            s_ref[2 * n:3 * n, :] = s * ztt - (2.0 * a) * (s * (zt * zt))
            s_ref[3 * n:4 * n, :] = s * zt

        # -------- last layer: Linear(50,2), no tanh; d/dt channel not needed -
        z_ref[0:3 * n, :] = jnp.dot(s_ref[0:3 * n, :].astype(matmul_dtype),
                                    ws_ref[N_LAYERS - 2],
                                    preferred_element_type=jnp.float32)
        uv = z_ref[0 * n:1 * n, 0:2] + bs_ref[N_LAYERS - 1][:, 0:2]  # (n,2) = (u, v)
        dxy = z_ref[1 * n:2 * n, 0:2]                                # (n,2) = (u_x, v_x)
        btt = z_ref[2 * n:3 * n, 0:2]                                # (n,2) = (u_tt, v_tt)

        # -------- residual moments (Gram form), per-core partial sums --------
        # f = A + b*B + a*C per channel with A=(-v_x, u_x), B=(u_tt, v_tt),
        # C=(Q*u, Q*v); mean(f1^2)+mean(f2^2) is a quadratic in (1, b, a) whose
        # coefficients are 6 second moments.
        q = uv[:, 0:1] * uv[:, 0:1] + uv[:, 1:2] * uv[:, 1:2]        # (n,1) |q|^2
        cq = q * uv                                                  # (n,2)

        # row weights built in-kernel: 1/N_actual on valid (global) rows, 0 on pad
        row = jax.lax.broadcasted_iota(jnp.int32, (n, 1), 0) + core * n
        w = jnp.where(row < n_actual, 1.0 / n_actual, 0.0)           # (n,1)

        def wsum2(m):                       # weighted sum over rows + 2 channels
            t = jnp.sum(w * m, axis=0, keepdims=True)                # (1,2)
            return t[:, 0:1] + t[:, 1:2]                             # (1,1)

        S_AA = wsum2(dxy * dxy)             # sum w*(u_x^2 + v_x^2)
        S_BB = wsum2(btt * btt)
        S_CC = wsum2(cq * cq)
        S_BC = wsum2(btt * cq)
        # cross terms carry the (-v_x, u_x) swap/sign explicitly
        S_AB = jnp.sum(w * (dxy[:, 0:1] * btt[:, 1:2]
                            - dxy[:, 1:2] * btt[:, 0:1]),
                       axis=0, keepdims=True)
        S_AC = jnp.sum(w * (dxy[:, 0:1] * cq[:, 1:2]
                            - dxy[:, 1:2] * cq[:, 0:1]),
                       axis=0, keepdims=True)

        # -------- per-core partial loss over the lane-dense para axis --------
        a_row = para_ref[0:1, :]                                     # (1, P_pad)
        b_row = para_ref[1:2, :]                                     # (1, P_pad)
        # c = para_ref[2,:] is unused in the original forward pass.
        out_ref[0] = (S_AA
                      + b_row * b_row * S_BB
                      + a_row * a_row * S_CC
                      + 2.0 * b_row * S_AB
                      + 2.0 * a_row * S_AC
                      + 2.0 * a_row * b_row * S_BC)

    return pinn_loss_kernel


def make_params(key):
    """Deterministic Linear-layer init (uniform +-1/sqrt(fan_in)), zero-padded to PAD."""
    dims = [D_IN] + [HIDDEN] * (N_LAYERS - 1) + [D_OUT]
    ws, bs = [], []
    for i in range(N_LAYERS):
        key, kw, kb = jax.random.split(key, 3)
        bound = 1.0 / jnp.sqrt(float(dims[i]))
        W = jax.random.uniform(kw, (dims[i], dims[i + 1]), jnp.float32, -bound, bound)
        b = jax.random.uniform(kb, (dims[i + 1],), jnp.float32, -bound, bound)
        Wp = jnp.zeros((PAD, PAD), jnp.float32).at[: dims[i], : dims[i + 1]].set(W)
        bp = jnp.zeros((1, PAD), jnp.float32).at[0, : dims[i + 1]].set(b)
        ws.append(Wp)
        bs.append(bp)
    return jnp.stack(ws), jnp.stack(bs)                  # (6,PAD,PAD), (6,1,PAD)


def cnn_pinn_losses(x, ws, bs, para, matmul_dtype=jnp.bfloat16):
    """x: (N, 2) f32, para: (P, 3) f32 -> (P,) losses (one per para row)."""
    n_actual = x.shape[0]
    p_actual = para.shape[0]
    # split the collocation axis across NUM_CORES grid steps (each half a
    # multiple of 8 sublanes); pad P to a lane-dense multiple of 128.
    n_half = _round_up(max(n_actual, 8 * NUM_CORES), 8 * NUM_CORES) // NUM_CORES
    n_pad = NUM_CORES * n_half
    p_pad = _round_up(max(p_actual, PAD), PAD)

    x_pad = jnp.zeros((n_pad, D_IN), jnp.float32).at[:n_actual, :].set(
        x.astype(jnp.float32))
    w01 = ws[0][:D_IN, :].astype(jnp.float32)             # (2, PAD)  layer-0 rows, f32
    ws_rest = ws[1:].astype(matmul_dtype)                 # (5, PAD, PAD)  bf16 MXU operands
    bs_f32 = bs.astype(jnp.float32)                       # (6, 1, PAD)
    para_pad = jnp.zeros((3, p_pad), jnp.float32).at[:, :p_actual].set(
        para.astype(jnp.float32).T)

    kernel = _make_kernel(n_half, n_actual, matmul_dtype)
    partial = pl.pallas_call(
        kernel,
        out_shape=jax.ShapeDtypeStruct((NUM_CORES, 1, p_pad), jnp.float32),
        grid=(NUM_CORES,),
        in_specs=[
            pl.BlockSpec((n_half, D_IN), lambda i: (i, 0)),           # x (split over cores)
            pl.BlockSpec((D_IN, PAD), lambda i: (0, 0)),              # W0 rows (f32)
            pl.BlockSpec((N_LAYERS - 1, PAD, PAD), lambda i: (0, 0, 0)),  # W1..W5
            pl.BlockSpec((N_LAYERS, 1, PAD), lambda i: (0, 0, 0)),    # biases
            pl.BlockSpec((3, p_pad), lambda i: (0, 0)),               # para (a,b,c) lanes
        ],
        out_specs=pl.BlockSpec((1, 1, p_pad), lambda i: (i, 0, 0)),
        scratch_shapes=[pltpu.VMEM((4 * n_half, PAD), jnp.float32),   # state [h;hx;htt;ht]
                        pltpu.VMEM((4 * n_half, PAD), jnp.float32)],  # ping-pong dot output
        compiler_params=pltpu.CompilerParams(
            dimension_semantics=("parallel",)),                       # megacore on v7x
    )(x_pad, w01, ws_rest, bs_f32, para_pad)

    # per-core partial losses are linear in the per-core moments -> just add,
    # then drop the padded para lanes.  Total VMEM footprint stays ~1-2 MiB at
    # production sizes, safe under v7x's 64 MiB / 32 MiB scoped default.
    return jnp.sum(partial[:, 0, :], axis=0)[:p_actual]


def ref_losses(x, ws, bs, para):
    """Pure-JAX reference using jacfwd (mirrors torch.autograd.grad semantics)."""
    dims = [D_IN] + [HIDDEN] * (N_LAYERS - 1) + [D_OUT]
    Ws = [ws[i][: dims[i], : dims[i + 1]] for i in range(N_LAYERS)]
    Bs = [bs[i][0, : dims[i + 1]] for i in range(N_LAYERS)]

    def net(pt):
        h = pt
        for i in range(N_LAYERS):
            h = h @ Ws[i] + Bs[i]
            if i < N_LAYERS - 1:
                h = jnp.tanh(h)
        return h

    out = jax.vmap(net)(x)                                       # (N, 2)
    jac = jax.vmap(jax.jacfwd(net))(x)                           # (N, 2, 2)
    hess = jax.vmap(jax.jacfwd(jax.jacfwd(net)))(x)              # (N, 2, 2, 2)
    u, v = out[:, 0], out[:, 1]
    u_x, v_x = jac[:, 0, 0], jac[:, 1, 0]
    u_tt, v_tt = hess[:, 0, 1, 1], hess[:, 1, 1, 1]
    Q = u * u + v * v
    losses = []
    for i in range(para.shape[0]):
        a, b = para[i, 0], para[i, 1]
        f1 = -v_x + b * u_tt + a * Q * u
        f2 = u_x + b * v_tt + a * Q * v
        losses.append(jnp.mean(f1 ** 2) + jnp.mean(f2 ** 2))
    return jnp.stack(losses)


if __name__ == "__main__":
    key = jax.random.PRNGKey(0)
    k_x, k_p, k_w = jax.random.split(key, 3)

    # collocation points x = (x, t) in [0, 5] x [0, 5]  (like np.linspace(0, 5, 500))
    x = jax.random.uniform(k_x, (N, D_IN), jnp.float32, 0.0, 5.0)

    # para rows [a, b, c]: a, b ~ trunc-normal around 0.5, c ~ trunc-normal(0.005) (c unused)
    k_a, k_b, k_c = jax.random.split(k_p, 3)
    a_col = 0.5 + 1.0 * jax.random.truncated_normal(k_a, -0.5, 1.5, (P, 1), jnp.float32)
    b_col = 0.5 + 1.0 * jax.random.truncated_normal(k_b, -0.5, 1.5, (P, 1), jnp.float32)
    c_col = 0.005 + 0.0005 * jax.random.truncated_normal(k_c, -1.0, 1.0, (P, 1), jnp.float32)
    para = jnp.concatenate([a_col, b_col, c_col], axis=1)        # (P, 3)

    ws, bs = make_params(k_w)

    ref = jax.block_until_ready(ref_losses(x, ws, bs, para))

    # 1) algorithmic check: same kernel with f32 MXU operands must match the
    #    jacfwd reference tightly.
    losses_f32 = jax.block_until_ready(
        cnn_pinn_losses(x, ws, bs, para, matmul_dtype=jnp.float32))
    assert losses_f32.shape == (P,)
    assert bool(jnp.allclose(losses_f32, ref, rtol=2e-3, atol=1e-6)), (losses_f32, ref)

    # 2) fast path: bf16 MXU operands / f32 accumulation; only numeric drift in
    #    the second-derivative channel differs from the f32 path.
    losses = jax.block_until_ready(cnn_pinn_losses(x, ws, bs, para))
    assert losses.shape == (P,)
    assert bool(jnp.isfinite(losses).all())
    assert bool(jnp.allclose(losses, ref, rtol=1.5e-1, atol=1e-6)), (losses, ref)

    print("KERNEL_OK")
</pallas_src>

<mosaic_0001>
module attributes {stable_mosaic.version = 11 : i64} {
  func.func @pinn_loss_kernel(%arg0: i32, %arg1: memref<64x2xf32, #tpu.memory_space<vmem>>, %arg2: memref<2x128xf32, #tpu.memory_space<vmem>>, %arg3: memref<5x128x128xf32, #tpu.memory_space<vmem>>, %arg4: memref<6x1x128xf32, #tpu.memory_space<vmem>>, %arg5: memref<3x128xf32, #tpu.memory_space<vmem>>, %arg6: memref<1x1x128xf32, #tpu.memory_space<vmem>>, %arg7: memref<256x128xf32, #tpu.memory_space<vmem>>, %arg8: memref<256x128xf32, #tpu.memory_space<vmem>>) attributes {dimension_semantics = [#tpu.dimension_semantics<parallel>], iteration_bounds = array<i64: 2>, scalar_prefetch = 0 : i64, scratch_operands = 2 : i64, tpu.core_type = #tpu.core_type<tc>, window_params = [{transform_indices = @transform_0, window_bounds = array<i64: 64, 2>}, {pipeline_mode = #tpu.pipeline_mode<synchronous>, transform_indices = @transform_1, window_bounds = array<i64: 2, 128>}, {pipeline_mode = #tpu.pipeline_mode<synchronous>, transform_indices = @transform_2, window_bounds = array<i64: 5, 128, 128>}, {pipeline_mode = #tpu.pipeline_mode<synchronous>, transform_indices = @transform_3, window_bounds = array<i64: 6, 1, 128>}, {pipeline_mode = #tpu.pipeline_mode<synchronous>, transform_indices = @transform_4, window_bounds = array<i64: 3, 128>}, {transform_indices = @transform_5, window_bounds = array<i64: 1, 1, 128>}]} {
    %c0 = arith.constant 0 : index
    %c0_0 = arith.constant 0 : index
    %0 = vector.load %arg2[%c0, %c0_0] : memref<2x128xf32, #tpu.memory_space<vmem>>, vector<1x128xf32>
    %c1 = arith.constant 1 : index
    %c0_1 = arith.constant 0 : index
    %1 = vector.load %arg2[%c1, %c0_1] : memref<2x128xf32, #tpu.memory_space<vmem>>, vector<1x128xf32>
    %c0_2 = arith.constant 0 : index
    %c0_3 = arith.constant 0 : index
    %2 = vector.load %arg1[%c0_2, %c0_3] : memref<64x2xf32, #tpu.memory_space<vmem>>, vector<64x1xf32>
    %c0_4 = arith.constant 0 : index
    %c1_5 = arith.constant 1 : index
    %3 = vector.load %arg1[%c0_4, %c1_5] : memref<64x2xf32, #tpu.memory_space<vmem>>, vector<64x1xf32>
    %4 = vector.broadcast %2 : vector<64x1xf32> to vector<64x128xf32>
    %5 = vector.broadcast %0 : vector<1x128xf32> to vector<64x128xf32>
    %6 = arith.mulf %4, %5 : vector<64x128xf32>
    %7 = vector.broadcast %3 : vector<64x1xf32> to vector<64x128xf32>
    %8 = vector.broadcast %1 : vector<1x128xf32> to vector<64x128xf32>
    %9 = arith.mulf %7, %8 : vector<64x128xf32>
    %10 = arith.addf %6, %9 : vector<64x128xf32>
    %c0_6 = arith.constant 0 : index
    %c0_7 = arith.constant 0 : index
    %c0_8 = arith.constant 0 : index
    %11 = vector.load %arg4[%c0_6, %c0_7, %c0_8] : memref<6x1x128xf32, #tpu.memory_space<vmem>>, vector<1x1x128xf32>
    %12 = vector.shape_cast %11 : vector<1x1x128xf32> to vector<1x128xf32>
    %13 = vector.broadcast %12 : vector<1x128xf32> to vector<64x128xf32>
    %14 = arith.addf %10, %13 : vector<64x128xf32>
    %15 = math.tanh %14 : vector<64x128xf32>
    %16 = arith.mulf %15, %15 : vector<64x128xf32>
    %cst = arith.constant 1.000000e+00 : f32
    %17 = vector.broadcast %cst : f32 to vector<64x128xf32>
    %18 = arith.subf %17, %16 : vector<64x128xf32>
    %c0_9 = arith.constant 0 : index
    %c0_10 = arith.constant 0 : index
    %19 = vector.load %arg7[%c0_9, %c0_10] : memref<256x128xf32, #tpu.memory_space<vmem>>, vector<64x128xf32>
    tpu.vector_store %arg7[%c0_9, %c0_10], %15 {strides = array<i32>} : memref<256x128xf32, #tpu.memory_space<vmem>>, vector<64x128xf32>,
    %20 = vector.broadcast %0 : vector<1x128xf32> to vector<64x128xf32>
    %21 = arith.mulf %18, %20 : vector<64x128xf32>
    %c64 = arith.constant 64 : index
    %c0_11 = arith.constant 0 : index
    %22 = vector.load %arg7[%c64, %c0_11] : memref<256x128xf32, #tpu.memory_space<vmem>>, vector<64x128xf32>
    tpu.vector_store %arg7[%c64, %c0_11], %21 {strides = array<i32>} : memref<256x128xf32, #tpu.memory_space<vmem>>, vector<64x128xf32>,
    %cst_12 = arith.constant -2.000000e+00 : f32
    %23 = vector.broadcast %cst_12 : f32 to vector<64x128xf32>
    %24 = arith.mulf %23, %15 : vector<64x128xf32>
    %25 = arith.mulf %1, %1 : vector<1x128xf32>
    %26 = vector.broadcast %25 : vector<1x128xf32> to vector<64x128xf32>
    %27 = arith.mulf %18, %26 : vector<64x128xf32>
    %28 = arith.mulf %24, %27 : vector<64x128xf32>
    %c128 = arith.constant 128 : index
    %c0_13 = arith.constant 0 : index
    %29 = vector.load %arg7[%c128, %c0_13] : memref<256x128xf32, #tpu.memory_space<vmem>>, vector<64x128xf32>
    tpu.vector_store %arg7[%c128, %c0_13], %28 {strides = array<i32>} : memref<256x128xf32, #tpu.memory_space<vmem>>, vector<64x128xf32>,
    %30 = vector.broadcast %1 : vector<1x128xf32> to vector<64x128xf32>
    %31 = arith.mulf %18, %30 : vector<64x128xf32>
    %c192 = arith.constant 192 : index
    %c0_14 = arith.constant 0 : index
    %32 = vector.load %arg7[%c192, %c0_14] : memref<256x128xf32, #tpu.memory_space<vmem>>, vector<64x128xf32>
    tpu.vector_store %arg7[%c192, %c0_14], %31 {strides = array<i32>} : memref<256x128xf32, #tpu.memory_space<vmem>>, vector<64x128xf32>,
    %c0_15 = arith.constant 0 : index
    %c0_16 = arith.constant 0 : index
    %33 = vector.load %arg7[%c0_15, %c0_16] : memref<256x128xf32, #tpu.memory_space<vmem>>, vector<256x128xf32>
    %c0_17 = arith.constant 0 : index
    %c0_18 = arith.constant 0 : index
    %c0_19 = arith.constant 0 : index
    %34 = vector.load %arg3[%c0_17, %c0_18, %c0_19] : memref<5x128x128xf32, #tpu.memory_space<vmem>>, vector<1x128x128xf32>
    %35 = vector.shape_cast %34 : vector<1x128x128xf32> to vector<128x128xf32>
    %cst_20 = arith.constant dense<0.000000e+00> : vector<256x128xf32>
    %36 = tpu.matmul %33, %35, %cst_20 {dimension_numbers = #tpu.dot_dimension_numbers<[1], [0], [0], [1], [0, 0, 1, 1], [], []>} : vector<256x128xf32>, vector<128x128xf32>, vector<256x128xf32> -> vector<256x128xf32>
    %c0_21 = arith.constant 0 : index
    %c0_22 = arith.constant 0 : index
    %37 = vector.load %arg8[%c0_21, %c0_22] : memref<256x128xf32, #tpu.memory_space<vmem>>, vector<256x128xf32>
    tpu.vector_store %arg8[%c0_21, %c0_22], %36 {strides = array<i32>} : memref<256x128xf32, #tpu.memory_space<vmem>>, vector<256x128xf32>,
    %c0_23 = arith.constant 0 : index
    %c0_24 = arith.constant 0 : index
    %38 = vector.load %arg8[%c0_23, %c0_24] : memref<256x128xf32, #tpu.memory_space<vmem>>, vector<64x128xf32>
    %c1_25 = arith.constant 1 : index
    %c0_26 = arith.constant 0 : index
    %c0_27 = arith.constant 0 : index
    %39 = vector.load %arg4[%c1_25, %c0_26, %c0_27] : memref<6x1x128xf32, #tpu.memory_space<vmem>>, vector<1x1x128xf32>
    %40 = vector.shape_cast %39 : vector<1x1x128xf32> to vector<1x128xf32>
    %41 = vector.broadcast %40 : vector<1x128xf32> to vector<64x128xf32>
    %42 = arith.addf %38, %41 : vector<64x128xf32>
    %c64_28 = arith.constant 64 : index
    %c0_29 = arith.constant 0 : index
    %43 = vector.load %arg8[%c64_28, %c0_29] : memref<256x128xf32, #tpu.memory_space<vmem>>, vector<64x128xf32>
    %c128_30 = arith.constant 128 : index
    %c0_31 = arith.constant 0 : index
    %44 = vector.load %arg8[%c128_30, %c0_31] : memref<256x128xf32, #tpu.memory_space<vmem>>, vector<64x128xf32>
    %c192_32 = arith.constant 192 : index
    %c0_33 = arith.constant 0 : index
    %45 = vector.load %arg8[%c192_32, %c0_33] : memref<256x128xf32, #tpu.memory_space<vmem>>, vector<64x128xf32>
    %46 = math.tanh %42 : vector<64x128xf32>
    %47 = arith.mulf %46, %46 : vector<64x128xf32>
    %cst_34 = arith.constant 1.000000e+00 : f32
    %48 = vector.broadcast %cst_34 : f32 to vector<64x128xf32>
    %49 = arith.subf %48, %47 : vector<64x128xf32>
    %c0_35 = arith.constant 0 : index
    %c0_36 = arith.constant 0 : index
    %50 = vector.load %arg7[%c0_35, %c0_36] : memref<256x128xf32, #tpu.memory_space<vmem>>, vector<64x128xf32>
    tpu.vector_store %arg7[%c0_35, %c0_36], %46 {strides = array<i32>} : memref<256x128xf32, #tpu.memory_space<vmem>>, vector<64x128xf32>,
    %51 = arith.mulf %49, %43 : vector<64x128xf32>
    %c64_37 = arith.constant 64 : index
    %c0_38 = arith.constant 0 : index
    %52 = vector.load %arg7[%c64_37, %c0_38] : memref<256x128xf32, #tpu.memory_space<vmem>>, vector<64x128xf32>
    tpu.vector_store %arg7[%c64_37, %c0_38], %51 {strides = array<i32>} : memref<256x128xf32, #tpu.memory_space<vmem>>, vector<64x128xf32>,
    %53 = arith.mulf %49, %44 : vector<64x128xf32>
    %cst_39 = arith.constant 2.000000e+00 : f32
    %54 = vector.broadcast %cst_39 : f32 to vector<64x128xf32>
    %55 = arith.mulf %54, %46 : vector<64x128xf32>
    %56 = arith.mulf %45, %45 : vector<64x128xf32>
    %57 = arith.mulf %49, %56 : vector<64x128xf32>
    %58 = arith.mulf %55, %57 : vector<64x128xf32>
    %59 = arith.subf %53, %58 : vector<64x128xf32>
    %c128_40 = arith.constant 128 : index
    %c0_41 = arith.constant 0 : index
    %60 = vector.load %arg7[%c128_40, %c0_41] : memref<256x128xf32, #tpu.memory_space<vmem>>, vector<64x128xf32>
    tpu.vector_store %arg7[%c128_40, %c0_41], %59 {strides = array<i32>} : memref<256x128xf32, #tpu.memory_space<vmem>>, vector<64x128xf32>,
    %61 = arith.mulf %49, %45 : vector<64x128xf32>
    %c192_42 = arith.constant 192 : index
    %c0_43 = arith.constant 0 : index
    %62 = vector.load %arg7[%c192_42, %c0_43] : memref<256x128xf32, #tpu.memory_space<vmem>>, vector<64x128xf32>
    tpu.vector_store %arg7[%c192_42, %c0_43], %61 {strides = array<i32>} : memref<256x128xf32, #tpu.memory_space<vmem>>, vector<64x128xf32>,
    %c0_44 = arith.constant 0 : index
    %c0_45 = arith.constant 0 : index
    %63 = vector.load %arg7[%c0_44, %c0_45] : memref<256x128xf32, #tpu.memory_space<vmem>>, vector<256x128xf32>
    %c1_46 = arith.constant 1 : index
    %c0_47 = arith.constant 0 : index
    %c0_48 = arith.constant 0 : index
    %64 = vector.load %arg3[%c1_46, %c0_47, %c0_48] : memref<5x128x128xf32, #tpu.memory_space<vmem>>, vector<1x128x128xf32>
    %65 = vector.shape_cast %64 : vector<1x128x128xf32> to vector<128x128xf32>
    %cst_49 = arith.constant dense<0.000000e+00> : vector<256x128xf32>
    %66 = tpu.matmul %63, %65, %cst_49 {dimension_numbers = #tpu.dot_dimension_numbers<[1], [0], [0], [1], [0, 0, 1, 1], [], []>} : vector<256x128xf32>, vector<128x128xf32>, vector<256x128xf32> -> vector<256x128xf32>
    %c0_50 = arith.constant 0 : index
    %c0_51 = arith.constant 0 : index
    %67 = vector.load %arg8[%c0_50, %c0_51] : memref<256x128xf32, #tpu.memory_space<vmem>>, vector<256x128xf32>
    tpu.vector_store %arg8[%c0_50, %c0_51], %66 {strides = array<i32>} : memref<256x128xf32, #tpu.memory_space<vmem>>, vector<256x128xf32>,
    %c0_52 = arith.constant 0 : index
    %c0_53 = arith.constant 0 : index
    %68 = vector.load %arg8[%c0_52, %c0_53] : memref<256x128xf32, #tpu.memory_space<vmem>>, vector<64x128xf32>
    %c2 = arith.constant 2 : index
    %c0_54 = arith.constant 0 : index
    %c0_55 = arith.constant 0 : index
    %69 = vector.load %arg4[%c2, %c0_54, %c0_55] : memref<6x1x128xf32, #tpu.memory_space<vmem>>, vector<1x1x128xf32>
    %70 = vector.shape_cast %69 : vector<1x1x128xf32> to vector<1x128xf32>
    %71 = vector.broadcast %70 : vector<1x128xf32> to vector<64x128xf32>
    %72 = arith.addf %68, %71 : vector<64x128xf32>
    %c64_56 = arith.constant 64 : index
    %c0_57 = arith.constant 0 : index
    %73 = vector.load %arg8[%c64_56, %c0_57] : memref<256x128xf32, #tpu.memory_space<vmem>>, vector<64x128xf32>
    %c128_58 = arith.constant 128 : index
    %c0_59 = arith.constant 0 : index
    %74 = vector.load %arg8[%c128_58, %c0_59] : memref<256x128xf32, #tpu.memory_space<vmem>>, vector<64x128xf32>
    %c192_60 = arith.constant 192 : index
    %c0_61 = arith.constant 0 : index
    %75 = vector.load %arg8[%c192_60, %c0_61] : memref<256x128xf32, #tpu.memory_space<vmem>>, vector<64x128xf32>
    %76 = math.tanh %72 : vector<64x128xf32>
    %77 = arith.mulf %76, %76 : vector<64x128xf32>
    %cst_62 = arith.constant 1.000000e+00 : f32
    %78 = vector.broadcast %cst_62 : f32 to vector<64x128xf32>
    %79 = arith.subf %78, %77 : vector<64x128xf32>
    %c0_63 = arith.constant 0 : index
    %c0_64 = arith.constant 0 : index
    %80 = vector.load %arg7[%c0_63, %c0_64] : memref<256x128xf32, #tpu.memory_space<vmem>>, vector<64x128xf32>
    tpu.vector_store %arg7[%c0_63, %c0_64], %76 {strides = array<i32>} : memref<256x128xf32, #tpu.memory_space<vmem>>, vector<64x128xf32>,
    %81 = arith.mulf %79, %73 : vector<64x128xf32>
    %c64_65 = arith.constant 64 : index
    %c0_66 = arith.constant 0 : index
    %82 = vector.load %arg7[%c64_65, %c0_66] : memref<256x128xf32, #tpu.memory_space<vmem>>, vector<64x128xf32>
    tpu.vector_store %arg7[%c64_65, %c0_66], %81 {strides = array<i32>} : memref<256x128xf32, #tpu.memory_space<vmem>>, vector<64x128xf32>,
    %83 = arith.mulf %79, %74 : vector<64x128xf32>
    %cst_67 = arith.constant 2.000000e+00 : f32
    %84 = vector.broadcast %cst_67 : f32 to vector<64x128xf32>
    %85 = arith.mulf %84, %76 : vector<64x128xf32>
    %86 = arith.mulf %75, %75 : vector<64x128xf32>
    %87 = arith.mulf %79, %86 : vector<64x128xf32>
    %88 = arith.mulf %85, %87 : vector<64x128xf32>
    %89 = arith.subf %83, %88 : vector<64x128xf32>
    %c128_68 = arith.constant 128 : index
    %c0_69 = arith.constant 0 : index
    %90 = vector.load %arg7[%c128_68, %c0_69] : memref<256x128xf32, #tpu.memory_space<vmem>>, vector<64x128xf32>
    tpu.vector_store %arg7[%c128_68, %c0_69], %89 {strides = array<i32>} : memref<256x128xf32, #tpu.memory_space<vmem>>, vector<64x128xf32>,
    %91 = arith.mulf %79, %75 : vector<64x128xf32>
    %c192_70 = arith.constant 192 : index
    %c0_71 = arith.constant 0 : index
    %92 = vector.load %arg7[%c192_70, %c0_71] : memref<256x128xf32, #tpu.memory_space<vmem>>, vector<64x128xf32>
    tpu.vector_store %arg7[%c192_70, %c0_71], %91 {strides = array<i32>} : memref<256x128xf32, #tpu.memory_space<vmem>>, vector<64x128xf32>,
    %c0_72 = arith.constant 0 : index
    %c0_73 = arith.constant 0 : index
    %93 = vector.load %arg7[%c0_72, %c0_73] : memref<256x128xf32, #tpu.memory_space<vmem>>, vector<256x128xf32>
    %c2_74 = arith.constant 2 : index
    %c0_75 = arith.constant 0 : index
    %c0_76 = arith.constant 0 : index
    %94 = vector.load %arg3[%c2_74, %c0_75, %c0_76] : memref<5x128x128xf32, #tpu.memory_space<vmem>>, vector<1x128x128xf32>
    %95 = vector.shape_cast %94 : vector<1x128x128xf32> to vector<128x128xf32>
    %cst_77 = arith.constant dense<0.000000e+00> : vector<256x128xf32>
    %96 = tpu.matmul %93, %95, %cst_77 {dimension_numbers = #tpu.dot_dimension_numbers<[1], [0], [0], [1], [0, 0, 1, 1], [], []>} : vector<256x128xf32>, vector<128x128xf32>, vector<256x128xf32> -> vector<256x128xf32>
    %c0_78 = arith.constant 0 : index
    %c0_79 = arith.constant 0 : index
    %97 = vector.load %arg8[%c0_78, %c0_79] : memref<256x128xf32, #tpu.memory_space<vmem>>, vector<256x128xf32>
    tpu.vector_store %arg8[%c0_78, %c0_79], %96 {strides = array<i32>} : memref<256x128xf32, #tpu.memory_space<vmem>>, vector<256x128xf32>,
    %c0_80 = arith.constant 0 : index
    %c0_81 = arith.constant 0 : index
    %98 = vector.load %arg8[%c0_80, %c0_81] : memref<256x128xf32, #tpu.memory_space<vmem>>, vector<64x128xf32>
    %c3 = arith.constant 3 : index
    %c0_82 = arith.constant 0 : index
    %c0_83 = arith.constant 0 : index
    %99 = vector.load %arg4[%c3, %c0_82, %c0_83] : memref<6x1x128xf32, #tpu.memory_space<vmem>>, vector<1x1x128xf32>
    %100 = vector.shape_cast %99 : vector<1x1x128xf32> to vector<1x128xf32>
    %101 = vector.broadcast %100 : vector<1x128xf32> to vector<64x128xf32>
    %102 = arith.addf %98, %101 : vector<64x128xf32>
    %c64_84 = arith.constant 64 : index
    %c0_85 = arith.constant 0 : index
    %103 = vector.load %arg8[%c64_84, %c0_85] : memref<256x128xf32, #tpu.memory_space<vmem>>, vector<64x128xf32>
    %c128_86 = arith.constant 128 : index
    %c0_87 = arith.constant 0 : index
    %104 = vector.load %arg8[%c128_86, %c0_87] : memref<256x128xf32, #tpu.memory_space<vmem>>, vector<64x128xf32>
    %c192_88 = arith.constant 192 : index
    %c0_89 = arith.constant 0 : index
    %105 = vector.load %arg8[%c192_88, %c0_89] : memref<256x128xf32, #tpu.memory_space<vmem>>, vector<64x128xf32>
    %106 = math.tanh %102 : vector<64x128xf32>
    %107 = arith.mulf %106, %106 : vector<64x128xf32>
    %cst_90 = arith.constant 1.000000e+00 : f32
    %108 = vector.broadcast %cst_90 : f32 to vector<64x128xf32>
    %109 = arith.subf %108, %107 : vector<64x128xf32>
    %c0_91 = arith.constant 0 : index
    %c0_92 = arith.constant 0 : index
    %110 = vector.load %arg7[%c0_91, %c0_92] : memref<256x128xf32, #tpu.memory_space<vmem>>, vector<64x128xf32>
    tpu.vector_store %arg7[%c0_91, %c0_92], %106 {strides = array<i32>} : memref<256x128xf32, #tpu.memory_space<vmem>>, vector<64x128xf32>,
    %111 = arith.mulf %109, %103 : vector<64x128xf32>
    %c64_93 = arith.constant 64 : index
    %c0_94 = arith.constant 0 : index
    %112 = vector.load %arg7[%c64_93, %c0_94] : memref<256x128xf32, #tpu.memory_space<vmem>>, vector<64x128xf32>
    tpu.vector_store %arg7[%c64_93, %c0_94], %111 {strides = array<i32>} : memref<256x128xf32, #tpu.memory_space<vmem>>, vector<64x128xf32>,
    %113 = arith.mulf %109, %104 : vector<64x128xf32>
    %cst_95 = arith.constant 2.000000e+00 : f32
    %114 = vector.broadcast %cst_95 : f32 to vector<64x128xf32>
    %115 = arith.mulf %114, %106 : vector<64x128xf32>
    %116 = arith.mulf %105, %105 : vector<64x128xf32>
    %117 = arith.mulf %109, %116 : vector<64x128xf32>
    %118 = arith.mulf %115, %117 : vector<64x128xf32>
    %119 = arith.subf %113, %118 : vector<64x128xf32>
    %c128_96 = arith.constant 128 : index
    %c0_97 = arith.constant 0 : index
    %120 = vector.load %arg7[%c128_96, %c0_97] : memref<256x128xf32, #tpu.memory_space<vmem>>, vector<64x128xf32>
    tpu.vector_store %arg7[%c128_96, %c0_97], %119 {strides = array<i32>} : memref<256x128xf32, #tpu.memory_space<vmem>>, vector<64x128xf32>,
    %121 = arith.mulf %109, %105 : vector<64x128xf32>
    %c192_98 = arith.constant 192 : index
    %c0_99 = arith.constant 0 : index
    %122 = vector.load %arg7[%c192_98, %c0_99] : memref<256x128xf32, #tpu.memory_space<vmem>>, vector<64x128xf32>
    tpu.vector_store %arg7[%c192_98, %c0_99], %121 {strides = array<i32>} : memref<256x128xf32, #tpu.memory_space<vmem>>, vector<64x128xf32>,
    %c0_100 = arith.constant 0 : index
    %c0_101 = arith.constant 0 : index
    %123 = vector.load %arg7[%c0_100, %c0_101] : memref<256x128xf32, #tpu.memory_space<vmem>>, vector<256x128xf32>
    %c3_102 = arith.constant 3 : index
    %c0_103 = arith.constant 0 : index
    %c0_104 = arith.constant 0 : index
    %124 = vector.load %arg3[%c3_102, %c0_103, %c0_104] : memref<5x128x128xf32, #tpu.memory_space<vmem>>, vector<1x128x128xf32>
    %125 = vector.shape_cast %124 : vector<1x128x128xf32> to vector<128x128xf32>
    %cst_105 = arith.constant dense<0.000000e+00> : vector<256x128xf32>
    %126 = tpu.matmul %123, %125, %cst_105 {dimension_numbers = #tpu.dot_dimension_numbers<[1], [0], [0], [1], [0, 0, 1, 1], [], []>} : vector<256x128xf32>, vector<128x128xf32>, vector<256x128xf32> -> vector<256x128xf32>
    %c0_106 = arith.constant 0 : index
    %c0_107 = arith.constant 0 : index
    %127 = vector.load %arg8[%c0_106, %c0_107] : memref<256x128xf32, #tpu.memory_space<vmem>>, vector<256x128xf32>
    tpu.vector_store %arg8[%c0_106, %c0_107], %126 {strides = array<i32>} : memref<256x128xf32, #tpu.memory_space<vmem>>, vector<256x128xf32>,
    %c0_108 = arith.constant 0 : index
    %c0_109 = arith.constant 0 : index
    %128 = vector.load %arg8[%c0_108, %c0_109] : memref<256x128xf32, #tpu.memory_space<vmem>>, vector<64x128xf32>
    %c4 = arith.constant 4 : index
    %c0_110 = arith.constant 0 : index
    %c0_111 = arith.constant 0 : index
    %129 = vector.load %arg4[%c4, %c0_110, %c0_111] : memref<6x1x128xf32, #tpu.memory_space<vmem>>, vector<1x1x128xf32>
    %130 = vector.shape_cast %129 : vector<1x1x128xf32> to vector<1x128xf32>
    %131 = vector.broadcast %130 : vector<1x128xf32> to vector<64x128xf32>
    %132 = arith.addf %128, %131 : vector<64x128xf32>
    %c64_112 = arith.constant 64 : index
    %c0_113 = arith.constant 0 : index
    %133 = vector.load %arg8[%c64_112, %c0_113] : memref<256x128xf32, #tpu.memory_space<vmem>>, vector<64x128xf32>
    %c128_114 = arith.constant 128 : index
    %c0_115 = arith.constant 0 : index
    %134 = vector.load %arg8[%c128_114, %c0_115] : memref<256x128xf32, #tpu.memory_space<vmem>>, vector<64x128xf32>
    %c192_116 = arith.constant 192 : index
    %c0_117 = arith.constant 0 : index
    %135 = vector.load %arg8[%c192_116, %c0_117] : memref<256x128xf32, #tpu.memory_space<vmem>>, vector<64x128xf32>
    %136 = math.tanh %132 : vector<64x128xf32>
    %137 = arith.mulf %136, %136 : vector<64x128xf32>
    %cst_118 = arith.constant 1.000000e+00 : f32
    %138 = vector.broadcast %cst_118 : f32 to vector<64x128xf32>
    %139 = arith.subf %138, %137 : vector<64x128xf32>
    %c0_119 = arith.constant 0 : index
    %c0_120 = arith.constant 0 : index
    %140 = vector.load %arg7[%c0_119, %c0_120] : memref<256x128xf32, #tpu.memory_space<vmem>>, vector<64x128xf32>
    tpu.vector_store %arg7[%c0_119, %c0_120], %136 {strides = array<i32>} : memref<256x128xf32, #tpu.memory_space<vmem>>, vector<64x128xf32>,
    %141 = arith.mulf %139, %133 : vector<64x128xf32>
    %c64_121 = arith.constant 64 : index
    %c0_122 = arith.constant 0 : index
    %142 = vector.load %arg7[%c64_121, %c0_122] : memref<256x128xf32, #tpu.memory_space<vmem>>, vector<64x128xf32>
    tpu.vector_store %arg7[%c64_121, %c0_122], %141 {strides = array<i32>} : memref<256x128xf32, #tpu.memory_space<vmem>>, vector<64x128xf32>,
    %143 = arith.mulf %139, %134 : vector<64x128xf32>
    %cst_123 = arith.constant 2.000000e+00 : f32
    %144 = vector.broadcast %cst_123 : f32 to vector<64x128xf32>
    %145 = arith.mulf %144, %136 : vector<64x128xf32>
    %146 = arith.mulf %135, %135 : vector<64x128xf32>
    %147 = arith.mulf %139, %146 : vector<64x128xf32>
    %148 = arith.mulf %145, %147 : vector<64x128xf32>
    %149 = arith.subf %143, %148 : vector<64x128xf32>
    %c128_124 = arith.constant 128 : index
    %c0_125 = arith.constant 0 : index
    %150 = vector.load %arg7[%c128_124, %c0_125] : memref<256x128xf32, #tpu.memory_space<vmem>>, vector<64x128xf32>
    tpu.vector_store %arg7[%c128_124, %c0_125], %149 {strides = array<i32>} : memref<256x128xf32, #tpu.memory_space<vmem>>, vector<64x128xf32>,
    %151 = arith.mulf %139, %135 : vector<64x128xf32>
    %c192_126 = arith.constant 192 : index
    %c0_127 = arith.constant 0 : index
    %152 = vector.load %arg7[%c192_126, %c0_127] : memref<256x128xf32, #tpu.memory_space<vmem>>, vector<64x128xf32>
    tpu.vector_store %arg7[%c192_126, %c0_127], %151 {strides = array<i32>} : memref<256x128xf32, #tpu.memory_space<vmem>>, vector<64x128xf32>,
    %c0_128 = arith.constant 0 : index
    %c0_129 = arith.constant 0 : index
    %153 = vector.load %arg7[%c0_128, %c0_129] : memref<256x128xf32, #tpu.memory_space<vmem>>, vector<192x128xf32>
    %c4_130 = arith.constant 4 : index
    %c0_131 = arith.constant 0 : index
    %c0_132 = arith.constant 0 : index
    %154 = vector.load %arg3[%c4_130, %c0_131, %c0_132] : memref<5x128x128xf32, #tpu.memory_space<vmem>>, vector<1x128x128xf32>
    %155 = vector.shape_cast %154 : vector<1x128x128xf32> to vector<128x128xf32>
    %cst_133 = arith.constant dense<0.000000e+00> : vector<192x128xf32>
    %156 = tpu.matmul %153, %155, %cst_133 {dimension_numbers = #tpu.dot_dimension_numbers<[1], [0], [0], [1], [0, 0, 1, 1], [], []>} : vector<192x128xf32>, vector<128x128xf32>, vector<192x128xf32> -> vector<192x128xf32>
    %c0_134 = arith.constant 0 : index
    %c0_135 = arith.constant 0 : index
    %157 = vector.load %arg8[%c0_134, %c0_135] : memref<256x128xf32, #tpu.memory_space<vmem>>, vector<192x128xf32>
    tpu.vector_store %arg8[%c0_134, %c0_135], %156 {strides = array<i32>} : memref<256x128xf32, #tpu.memory_space<vmem>>, vector<192x128xf32>,
    %c0_136 = arith.constant 0 : index
    %c0_137 = arith.constant 0 : index
    %158 = vector.load %arg8[%c0_136, %c0_137] : memref<256x128xf32, #tpu.memory_space<vmem>>, vector<64x2xf32>
    %c5 = arith.constant 5 : index
    %c0_138 = arith.constant 0 : index
    %c0_139 = arith.constant 0 : index
    %159 = vector.load %arg4[%c5, %c0_138, %c0_139] : memref<6x1x128xf32, #tpu.memory_space<vmem>>, vector<1x1x128xf32>
    %160 = vector.shape_cast %159 : vector<1x1x128xf32> to vector<1x128xf32>
    %161 = vector.extract_strided_slice %160 {offsets = [0, 0], sizes = [1, 2], strides = [1, 1]} : vector<1x128xf32> to vector<1x2xf32>
    %162 = vector.broadcast %161 : vector<1x2xf32> to vector<64x2xf32>
    %163 = arith.addf %158, %162 : vector<64x2xf32>
    %c64_140 = arith.constant 64 : index
    %c0_141 = arith.constant 0 : index
    %164 = vector.load %arg8[%c64_140, %c0_141] : memref<256x128xf32, #tpu.memory_space<vmem>>, vector<64x2xf32>
    %c128_142 = arith.constant 128 : index
    %c0_143 = arith.constant 0 : index
    %165 = vector.load %arg8[%c128_142, %c0_143] : memref<256x128xf32, #tpu.memory_space<vmem>>, vector<64x2xf32>
    %166 = vector.extract_strided_slice %163 {offsets = [0, 0], sizes = [64, 1], strides = [1, 1]} : vector<64x2xf32> to vector<64x1xf32>
    %167 = vector.extract_strided_slice %163 {offsets = [0, 0], sizes = [64, 1], strides = [1, 1]} : vector<64x2xf32> to vector<64x1xf32>
    %168 = arith.mulf %166, %167 : vector<64x1xf32>
    %169 = vector.extract_strided_slice %163 {offsets = [0, 1], sizes = [64, 1], strides = [1, 1]} : vector<64x2xf32> to vector<64x1xf32>
    %170 = vector.extract_strided_slice %163 {offsets = [0, 1], sizes = [64, 1], strides = [1, 1]} : vector<64x2xf32> to vector<64x1xf32>
    %171 = arith.mulf %169, %170 : vector<64x1xf32>
    %172 = arith.addf %168, %171 : vector<64x1xf32>
    %173 = vector.broadcast %172 : vector<64x1xf32> to vector<64x2xf32>
    %174 = arith.mulf %173, %163 : vector<64x2xf32>
    %175 = tpu.iota {dimensions = array<i32: 0>} : vector<64x1xi32>
    %c64_i32 = arith.constant 64 : i32
    %176 = arith.muli %arg0, %c64_i32 : i32
    %177 = vector.broadcast %176 : i32 to vector<64x1xi32>
    %178 = arith.addi %175, %177 : vector<64x1xi32>
    %c128_i32 = arith.constant 128 : i32
    %179 = vector.broadcast %c128_i32 : i32 to vector<64x1xi32>
    %180 = arith.cmpi slt, %178, %179 : vector<64x1xi32>
    %cst_144 = arith.constant 7.812500e-03 : f32
    %cst_145 = arith.constant 0.000000e+00 : f32
    %181 = vector.broadcast %cst_144 : f32 to vector<64x1xf32>
    %182 = vector.broadcast %cst_145 : f32 to vector<64x1xf32>
    %183 = arith.select %180, %181, %182 : vector<64x1xi1>, vector<64x1xf32>
    %184 = arith.mulf %164, %164 : vector<64x2xf32>
    %185 = vector.broadcast %183 : vector<64x1xf32> to vector<64x2xf32>
    %186 = arith.mulf %185, %184 : vector<64x2xf32>
    %cst_146 = arith.constant dense<0.000000e+00> : vector<2xf32>
    %187 = vector.multi_reduction <add>, %186, %cst_146 [0] : vector<64x2xf32> to vector<2xf32>
    %188 = vector.shape_cast %187 : vector<2xf32> to vector<1x2xf32>
    %189 = vector.extract_strided_slice %188 {offsets = [0, 0], sizes = [1, 1], strides = [1, 1]} : vector<1x2xf32> to vector<1x1xf32>
    %190 = vector.extract_strided_slice %188 {offsets = [0, 1], sizes = [1, 1], strides = [1, 1]} : vector<1x2xf32> to vector<1x1xf32>
    %191 = arith.addf %189, %190 : vector<1x1xf32>
    %192 = arith.mulf %165, %165 : vector<64x2xf32>
    %193 = vector.broadcast %183 : vector<64x1xf32> to vector<64x2xf32>
    %194 = arith.mulf %193, %192 : vector<64x2xf32>
    %cst_147 = arith.constant dense<0.000000e+00> : vector<2xf32>
    %195 = vector.multi_reduction <add>, %194, %cst_147 [0] : vector<64x2xf32> to vector<2xf32>
    %196 = vector.shape_cast %195 : vector<2xf32> to vector<1x2xf32>
    %197 = vector.extract_strided_slice %196 {offsets = [0, 0], sizes = [1, 1], strides = [1, 1]} : vector<1x2xf32> to vector<1x1xf32>
    %198 = vector.extract_strided_slice %196 {offsets = [0, 1], sizes = [1, 1], strides = [1, 1]} : vector<1x2xf32> to vector<1x1xf32>
    %199 = arith.addf %197, %198 : vector<1x1xf32>
    %200 = arith.mulf %174, %174 : vector<64x2xf32>
    %201 = vector.broadcast %183 : vector<64x1xf32> to vector<64x2xf32>
    %202 = arith.mulf %201, %200 : vector<64x2xf32>
    %cst_148 = arith.constant dense<0.000000e+00> : vector<2xf32>
    %203 = vector.multi_reduction <add>, %202, %cst_148 [0] : vector<64x2xf32> to vector<2xf32>
    %204 = vector.shape_cast %203 : vector<2xf32> to vector<1x2xf32>
    %205 = vector.extract_strided_slice %204 {offsets = [0, 0], sizes = [1, 1], strides = [1, 1]} : vector<1x2xf32> to vector<1x1xf32>
    %206 = vector.extract_strided_slice %204 {offsets = [0, 1], sizes = [1, 1], strides = [1, 1]} : vector<1x2xf32> to vector<1x1xf32>
    %207 = arith.addf %205, %206 : vector<1x1xf32>
    %208 = arith.mulf %165, %174 : vector<64x2xf32>
    %209 = vector.broadcast %183 : vector<64x1xf32> to vector<64x2xf32>
    %210 = arith.mulf %209, %208 : vector<64x2xf32>
    %cst_149 = arith.constant dense<0.000000e+00> : vector<2xf32>
    %211 = vector.multi_reduction <add>, %210, %cst_149 [0] : vector<64x2xf32> to vector<2xf32>
    %212 = vector.shape_cast %211 : vector<2xf32> to vector<1x2xf32>
    %213 = vector.extract_strided_slice %212 {offsets = [0, 0], sizes = [1, 1], strides = [1, 1]} : vector<1x2xf32> to vector<1x1xf32>
    %214 = vector.extract_strided_slice %212 {offsets = [0, 1], sizes = [1, 1], strides = [1, 1]} : vector<1x2xf32> to vector<1x1xf32>
    %215 = arith.addf %213, %214 : vector<1x1xf32>
    %216 = vector.extract_strided_slice %164 {offsets = [0, 0], sizes = [64, 1], strides = [1, 1]} : vector<64x2xf32> to vector<64x1xf32>
    %217 = vector.extract_strided_slice %165 {offsets = [0, 1], sizes = [64, 1], strides = [1, 1]} : vector<64x2xf32> to vector<64x1xf32>
    %218 = arith.mulf %216, %217 : vector<64x1xf32>
    %219 = vector.extract_strided_slice %164 {offsets = [0, 1], sizes = [64, 1], strides = [1, 1]} : vector<64x2xf32> to vector<64x1xf32>
    %220 = vector.extract_strided_slice %165 {offsets = [0, 0], sizes = [64, 1], strides = [1, 1]} : vector<64x2xf32> to vector<64x1xf32>
    %221 = arith.mulf %219, %220 : vector<64x1xf32>
    %222 = arith.subf %218, %221 : vector<64x1xf32>
    %223 = arith.mulf %183, %222 : vector<64x1xf32>
    %cst_150 = arith.constant dense<0.000000e+00> : vector<1xf32>
    %224 = vector.multi_reduction <add>, %223, %cst_150 [0] : vector<64x1xf32> to vector<1xf32>
    %225 = vector.shape_cast %224 : vector<1xf32> to vector<1x1xf32>
    %226 = vector.extract_strided_slice %164 {offsets = [0, 0], sizes = [64, 1], strides = [1, 1]} : vector<64x2xf32> to vector<64x1xf32>
    %227 = vector.extract_strided_slice %174 {offsets = [0, 1], sizes = [64, 1], strides = [1, 1]} : vector<64x2xf32> to vector<64x1xf32>
    %228 = arith.mulf %226, %227 : vector<64x1xf32>
    %229 = vector.extract_strided_slice %164 {offsets = [0, 1], sizes = [64, 1], strides = [1, 1]} : vector<64x2xf32> to vector<64x1xf32>
    %230 = vector.extract_strided_slice %174 {offsets = [0, 0], sizes = [64, 1], strides = [1, 1]} : vector<64x2xf32> to vector<64x1xf32>
    %231 = arith.mulf %229, %230 : vector<64x1xf32>
    %232 = arith.subf %228, %231 : vector<64x1xf32>
    %233 = arith.mulf %183, %232 : vector<64x1xf32>
    %cst_151 = arith.constant dense<0.000000e+00> : vector<1xf32>
    %234 = vector.multi_reduction <add>, %233, %cst_151 [0] : vector<64x1xf32> to vector<1xf32>
    %235 = vector.shape_cast %234 : vector<1xf32> to vector<1x1xf32>
    %c0_152 = arith.constant 0 : index
    %c0_153 = arith.constant 0 : index
    %236 = vector.load %arg5[%c0_152, %c0_153] : memref<3x128xf32, #tpu.memory_space<vmem>>, vector<1x128xf32>
    %c1_154 = arith.constant 1 : index
    %c0_155 = arith.constant 0 : index
    %237 = vector.load %arg5[%c1_154, %c0_155] : memref<3x128xf32, #tpu.memory_space<vmem>>, vector<1x128xf32>
    %238 = arith.mulf %237, %237 : vector<1x128xf32>
    %239 = vector.broadcast %199 : vector<1x1xf32> to vector<1x128xf32>
    %240 = arith.mulf %238, %239 : vector<1x128xf32>
    %241 = vector.broadcast %191 : vector<1x1xf32> to vector<1x128xf32>
    %242 = arith.addf %241, %240 : vector<1x128xf32>
    %243 = arith.mulf %236, %236 : vector<1x128xf32>
    %244 = vector.broadcast %207 : vector<1x1xf32> to vector<1x128xf32>
    %245 = arith.mulf %243, %244 : vector<1x128xf32>
    %246 = arith.addf %242, %245 : vector<1x128xf32>
    %cst_156 = arith.constant 2.000000e+00 : f32
    %247 = vector.broadcast %cst_156 : f32 to vector<1x128xf32>
    %248 = arith.mulf %247, %237 : vector<1x128xf32>
    %249 = vector.broadcast %225 : vector<1x1xf32> to vector<1x128xf32>
    %250 = arith.mulf %248, %249 : vector<1x128xf32>
    %251 = arith.addf %246, %250 : vector<1x128xf32>
    %cst_157 = arith.constant 2.000000e+00 : f32
    %252 = vector.broadcast %cst_157 : f32 to vector<1x128xf32>
    %253 = arith.mulf %252, %236 : vector<1x128xf32>
    %254 = vector.broadcast %235 : vector<1x1xf32> to vector<1x128xf32>
    %255 = arith.mulf %253, %254 : vector<1x128xf32>
    %256 = arith.addf %251, %255 : vector<1x128xf32>
    %cst_158 = arith.constant 2.000000e+00 : f32
    %257 = vector.broadcast %cst_158 : f32 to vector<1x128xf32>
    %258 = arith.mulf %257, %236 : vector<1x128xf32>
    %259 = arith.mulf %258, %237 : vector<1x128xf32>
    %260 = vector.broadcast %215 : vector<1x1xf32> to vector<1x128xf32>
    %261 = arith.mulf %259, %260 : vector<1x128xf32>
    %262 = arith.addf %256, %261 : vector<1x128xf32>
    %c0_159 = arith.constant 0 : index
    %c0_160 = arith.constant 0 : index
    %c0_161 = arith.constant 0 : index
    %263 = vector.load %arg6[%c0_159, %c0_160, %c0_161] : memref<1x1x128xf32, #tpu.memory_space<vmem>>, vector<1x1x128xf32>
    %264 = vector.shape_cast %263 : vector<1x1x128xf32> to vector<1x128xf32>
    %265 = vector.shape_cast %262 : vector<1x128xf32> to vector<1x1x128xf32>
    tpu.vector_store %arg6[%c0_159, %c0_160, %c0_161], %265 {strides = array<i32>} : memref<1x1x128xf32, #tpu.memory_space<vmem>>, vector<1x1x128xf32>,
    return
  }
  func.func @transform_0(%arg0: i32) -> (i32, i32) {
    %c0_i32 = arith.constant 0 : i32
    %c0_i32_0 = arith.constant 0 : i32
    return %arg0, %c0_i32 : i32, i32
  }
  func.func @transform_1(%arg0: i32) -> (i32, i32) {
    %c0_i32 = arith.constant 0 : i32
    %c0_i32_0 = arith.constant 0 : i32
    %c0_i32_1 = arith.constant 0 : i32
    return %c0_i32, %c0_i32_0 : i32, i32
  }
  func.func @transform_2(%arg0: i32) -> (i32, i32, i32) {
    %c0_i32 = arith.constant 0 : i32
    %c0_i32_0 = arith.constant 0 : i32
    %c0_i32_1 = arith.constant 0 : i32
    %c0_i32_2 = arith.constant 0 : i32
    return %c0_i32, %c0_i32_0, %c0_i32_1 : i32, i32, i32
  }
  func.func @transform_3(%arg0: i32) -> (i32, i32, i32) {
    %c0_i32 = arith.constant 0 : i32
    %c0_i32_0 = arith.constant 0 : i32
    %c0_i32_1 = arith.constant 0 : i32
    %c0_i32_2 = arith.constant 0 : i32
    return %c0_i32, %c0_i32_0, %c0_i32_1 : i32, i32, i32
  }
  func.func @transform_4(%arg0: i32) -> (i32, i32) {
    %c0_i32 = arith.constant 0 : i32
    %c0_i32_0 = arith.constant 0 : i32
    %c0_i32_1 = arith.constant 0 : i32
    return %c0_i32, %c0_i32_0 : i32, i32
  }
  func.func @transform_5(%arg0: i32) -> (i32, i32, i32) {
    %c0_i32 = arith.constant 0 : i32
    %c0_i32_0 = arith.constant 0 : i32
    %c0_i32_1 = arith.constant 0 : i32
    return %arg0, %c0_i32, %c0_i32_0 : i32, i32, i32
  }
}

</mosaic_0001>

<bundles_post_ra>
// kernel: tpu_custom_call.1
= control target key start
LH: loop header
LB: loop body
LE: loop exit
PB: predicated region body
PF: predicated region fallthrough
CT: control target
= control target key end

     0   :  { %10 = vsyncpa [#allocation5], 0  ;;  %s5597_s0 = inlined_call_operand.vmem [shape: f32[128,2], index: 0, kind: input, shape index: {}]   ;;  %s5598_s1 = inlined_call_operand.vmem [shape: f32[2,128], index: 1, kind: input, shape index: {}]   ;;  %s5599_s2 = inlined_call_operand.hbm [shape: f32[5,128,128], index: 2, kind: input, shape index: {}]   ;;  %s5600_s3 = inlined_call_operand.vmem [shape: f32[6,1,128], index: 3, kind: input, shape index: {}]   ;;  %s5601_s4 = inlined_call_operand.vmem [shape: f32[3,128], index: 4, kind: input, shape index: {}]   ;;  %s5602_s5 = inlined_call_operand.hbm [shape: f32[2,1,128], index: 5, kind: output, shape index: {}]  }
   0x1   :  { %11 = vsyncpa [#allocation6], 0 }
   0x2   :  { %13 = vsyncpa [#allocation6 + $0x1], 0  ;;  %s4463_s18 = smov 0   ;;  %s4465_s19 = smov 0  }
   0x3   :  { %s4467_s20 = smov 0   ;;  %s4469_s21 = smov 0  }
   0x4 LB: > { %s4484_s22 = sadd.s32 4294967295, %s4422_s21   ;;  %s3365_s23 = sadd.s32 4294967294, %s4422_s21   ;;  %s4422_s21 = sphi %s4469_s21, %s5618_s21   ;;  %s4418_s20 = sphi %s4467_s20, %s5617_s20   ;;  %s4414_s19 = sphi %s4465_s19, %s5616_s19   ;;  %s4410_s18 = sphi %s4463_s18, %s5615_s18  }
   0x5   : > { %s4488_s24 = sadd.s32 1, %s4422_s21   ;;  %s136_s25 = sadd.s32 1, %s4418_s20 }
   0x6   : > { %s133_s26 = ssub.s32 %s4422_s21, %s4488_s24  ;;  %p146_p0 = scmp.ne.s32.totalorder %s4418_s20, %s4414_s19 }
   0x7   : > { %p134_p1 = scmp.eq.s32.totalorder %s133_s26, 0  ;;  %p147_p2 = scmp.eq.s32.totalorder %s4484_s22, 1 }
   0x8   : > { %p152_p3 = scmp.ne.s32.totalorder %s4414_s19, %s4410_s18  ;;  %p153_p4 = scmp.eq.s32.totalorder %s3365_s23, 1 }
   0x9   : > { %s4499_s27 = scalar_select %p134_p1, %s4418_s20, %s136_s25  }
   0xa   : > { %p4501_p5 = por %p147_p2, %p146_p0  ;;  %p4505_p6 = por %p153_p4, %p152_p3 }
   0xb   : > { %p3366_p7 = scmp.ge.s32.totalorder %s4422_s21, 1  ;;  %p160_p8 = scmp.lt.s32.totalorder %s4422_s21, 3 }
   0xc   : > { %s5606_s28 = scalar_select %p4501_p5, 1, 0 }
   0xd   : > { %s5607_s29 = scalar_select %p4505_p6, 1, 0 }
   0xe   : > { %p5603_p9 = scmp.eq.s32.totalorder %s4484_s22, 0  ;;  %p4512_p10 = pnand %p3366_p7, %p160_p8 }
   0xf   : > { %s4424_s6 = smov [#allocation4]   ;;  %s4328_s11 = scalar_lea.hbm %s5599_s2, 10240 }
  0x10   : > { %s5608_s30 = scalar_select %p4512_p10, 1, 0 }
  0x11   : > { %s175_s7 = sshll.u32 %s4424_s6, 4  ;;  %p4191_p11 = pneg %p4512_p10  ;;  %s176_s7 = int_to_ptr.vmem [resolvable:$true] %s175_s7 }
  0x12   : > { %p4329_p13 = scmp.ne.s32.totalorder %s5599_s2, %s4328_s11  ;;  %p4335_p3 = scmp.lt.u32.totalorder %s4328_s11, %s5599_s2 }
  0x13   : > { %p4520_p12 = pnand %p5603_p9, %p4191_p11 }
  0x15   : > { %p4330_p0 = pneg %p4520_p12 }
  0x17   : > { %p4331_p1 = pnand %p4330_p0, %p4329_p13 }
  0x19   : > { %p4332_p2 = pneg %p4331_p1 }
  0x1b   : > { %p4337_p4 = pnand %p4335_p3, %p4332_p2 }
  0x1d   : > { %4340 = shalt.err (!%p4337_p4)
}
  0x1e   : > { %s4341_s16 = scalar_lea.vmem %s176_s7, 10240  ;;  %p4349_p9 = scmp.lt.s32.totalorder %s176_s7, %s176_s7 }
  0x1f   : > { %p4342_p7 = scmp.ne.s32.totalorder %s176_s7, %s4341_s16  ;;  %p4350_p6 = scmp.lt.s32.totalorder %s4341_s16, %s4341_s16 }
  0x21   : > { %p4344_p8 = pnand %p4342_p7, %p4330_p0  ;;  %p4351_p5 = por %p4350_p6, %p4349_p9 }
  0x23   : > { %p4345_p11 = pneg %p4344_p8 }
  0x25   : > { %p4352_p10 = pnand %p4351_p5, %p4345_p11 }
  0x27   : > { %4355 = shalt.err (!%p4352_p10)
}
  0x28   : > { %s4425_s17 = smov 128   ;;  %s4426_s23 = smov 8  }
  0x29   : > { %4194 = dma.hbm_to_vmem [thread:$0]  (!%p4520_p12), %s5599_s2, 10240, %s176_s7, [#allocation5], %s4425_s17, %s4425_s17, %s4426_s23  }
  0x2a   : > { %p5610_p13 = scmp.ne.s32.totalorder %s5608_s30, 0 }
  0x2b   : > { %p5611_p1 = scmp.eq.s32.totalorder (!%p5610_p13), %s4484_s22, 0 }
  0x2c   : > { %206 = sbr.rel (%p5610_p13) target bundleno = 2013 (0x7dd), region = 40 }
  0x33   : > { %4401 = dma.done.wait (%p5611_p1), [#allocation5], 10240   ;;  %p5612_p0 = pmov %p5611_p1 }
  0x34   : > { %s3371_s6 = sshll.u32 %s4484_s22, 3  ;;  %v4427_v0 = vmov 0   ;;  %v501_v3 = vld [vmem:[#allocation4] sm:$0xff]  ;;  %v502_v4 = vld [vmem:[#allocation4 + $0x8] sm:$0xff]  ;;  %v503_v5 = vld [vmem:[#allocation4 + $0x10] sm:$0xff]  ;;  %v4428_v8 = vmov 1   ;;  %v333_v46 = vlaneseq }
  0x35   : > { %4403 = vsyncadd (%p5612_p0), [#allocation5], 4294957056  ;;  %4244 = vset.pattern.permute.xlu1 %v4427_v0  ;;  %4242 = vset.pattern.permute.xlu0 %v4427_v0  ;;  %p234_p5 = scmp.lt.s32.totalorder %s3371_s6, 15  ;;  %v504_v6 = vld [vmem:[#allocation4 + $0x18] sm:$0xff]  ;;  %v4009_v7 = vpack.c.bf16 %v502_v4, %v501_v3  ;;  %v505_v10 = vld [vmem:[#allocation4 + $0x20] sm:$0xff]  ;;  %s4429_s10 = smov 127  }
  0x36   : > { %v4013_v9 = vpack.c.bf16 %v504_v6, %v503_v5  ;;  %v506_v11 = vld [vmem:[#allocation4 + $0x28] sm:$0xff]  ;;  %v507_v14 = vld [vmem:[#allocation4 + $0x30] sm:$0xff]  ;;  %v508_v15 = vld [vmem:[#allocation4 + $0x38] sm:$0xff]  ;;  %v4564_v47 = vshrl.u32 %v333_v46, 7  ;;  %s3385_s11 = sshll.u32 %s4484_s22, 6  ;;  %vm2801_vm4 = vcmask 15360  }
  0x37   : > { %s5620_s6 = smov (!%p234_p5, %s3371_s6), 15  ;;  %4010 = vmatprep.subr.bf16.mxu0 %v4009_v7  ;;  %v4017_v13 = vpack.c.bf16 %v506_v11, %v505_v10  ;;  %v4021_v17 = vpack.c.bf16 %v508_v15, %v507_v14  ;;  %v509_v18 = vld [vmem:[#allocation4 + $0x40] sm:$0xff]  ;;  %v510_v19 = vld [vmem:[#allocation4 + $0x48] sm:$0xff]  ;;  %v511_v22 = vld [vmem:[#allocation4 + $0x50] sm:$0xff]  ;;  %s4431_s12 = smov 1   ;;  %vm3074_vm9 = vcmask 7168  }
  0x38   : > { %s3372_s8 = sshll.u32 %s5620_s6, 3  ;;  %4012 = vmatpush3.bf16.msra.mxu0 %v4009_v7  ;;  %v4025_v21 = vpack.c.bf16 %v510_v19, %v509_v18  ;;  %v512_v23 = vld [vmem:[#allocation4 + $0x58] sm:$0xff]  ;;  %v513_v26 = vld [vmem:[#allocation4 + $0x60] sm:$0xff]  ;;  %v514_v27 = vld [vmem:[#allocation4 + $0x68] sm:$0xff]  ;;  %v335_v48 = vsub.s32 0, %v4564_v47  ;;  %s231_s17 = sand.u32 1, %s4414_s19  }
  0x39   : > { %s4552_s30 = scalar_lea.vmem %s5597_s0, %s3372_s8  ;;  %4014 = vmatprep.subr.bf16.mxu0 %v4013_v9  ;;  %v4029_v25 = vpack.c.bf16 %v512_v23, %v511_v22  ;;  %v4033_v29 = vpack.c.bf16 %v514_v27, %v513_v26  ;;  %v515_v30 = vld [vmem:[#allocation4 + $0x70] sm:$0xff]  ;;  %v516_v31 = vld [vmem:[#allocation4 + $0x78] sm:$0xff]  ;;  %v975_v34 = vld [vmem:[#allocation4 + $0x80] sm:$0xff]  ;;  %s3386_s23 = sshll.u32 %s4484_s22, 4 }
  0x3a   : > { %v242_v1 = vld [vmem:[%s4552_s30 + $0x8] sm:$0xff]  ;;  %v241_v2 = vld [vmem:[%s4552_s30] sm:$0xff]  ;;  %v243_v12 = vld [vmem:[%s4552_s30 + $0x10] sm:$0xff]  ;;  %v4037_v33 = vpack.c.bf16 %v516_v31, %v515_v30  ;;  %s232_s25 = scalar_lea.vmem [#allocation7], %s231_s17  ;;  %s5555_s7 = scalar_lea.hbm %s5602_s5, %s3386_s23 }
  0x3b   : > { %256 = vperm.xlu1 %4244, %v242_v1   ;;  %251 = vperm.xlu0 %4242, %v241_v2   ;;  %v244_v16 = vld [vmem:[%s4552_s30 + $0x18] sm:$0xff]  ;;  %v245_v20 = vld [vmem:[%s4552_s30 + $0x20] sm:$0xff]  ;;  %v246_v24 = vld [vmem:[%s4552_s30 + $0x28] sm:$0xff]  ;;  %s3298_s26 = sshll.u32 %s232_s25, 4  ;;  %s3286_s9 = scalar_lea.sflag [#allocation6], %s231_s17  ;;  %s5557_s26 = int_to_ptr.vmem [resolvable:$true] %s3298_s26 }
  0x3c   : > { %4016 = vmatpush3.bf16.msra.mxu0 %v4013_v9  ;;  %v247_v28 = vld [vmem:[%s4552_s30 + $0x30] sm:$0xff]  ;;  %v248_v32 = vld [vmem:[%s4552_s30 + $0x38] sm:$0xff]  ;;  %v976_v35 = vld [vmem:[#allocation4 + $0x88] sm:$0xff]  ;;  %s4356_s30 = scalar_lea.vmem %s5557_s26, 16  ;;  %p5613_p9 = scmp.ne.s32.totalorder %s5606_s28, 0 }
  0x3d   : > { %4018 = vmatprep.subr.bf16.mxu0 %v4017_v13  ;;  %v977_v36 = vld [vmem:[#allocation4 + $0x90] sm:$0xff]  ;;  %v4041_v37 = vpack.c.bf16 %v976_v35, %v975_v34  ;;  %v978_v38 = vld [vmem:[#allocation4 + $0x98] sm:$0xff]  ;;  %v979_v40 = vld [vmem:[#allocation4 + $0xa0] sm:$0xff]  ;;  %p4357_p6 = scmp.ne.s32.totalorder %s5557_s26, %s4356_s30  ;;  %s4432_s22 = smov [#allocation7]  }
  0x3e   : > { %v4045_v39 = vpack.c.bf16 %v978_v38, %v977_v36  ;;  %v980_v41 = vld [vmem:[#allocation4 + $0xa8] sm:$0xff]  ;;  %v981_v43 = vld [vmem:[#allocation4 + $0xb0] sm:$0xff]  ;;  %v982_v44 = vld [vmem:[#allocation4 + $0xb8] sm:$0xff] }
  0x3f   : > { %4245 = vset.pattern.permute.xlu1 %v4428_v8  ;;  %4243 = vset.pattern.permute.xlu0 %v4428_v8  ;;  %v4049_v42 = vpack.c.bf16 %v980_v41, %v979_v40  ;;  %v4053_v45 = vpack.c.bf16 %v982_v44, %v981_v43  ;;  %v4570_v49 = vld [vmem:[%s5598_s1 + $0x1] sm:$0x1]  ;;  %v4580_v53 = vld [vmem:[%s5598_s1] ss:$0 sm:$0xff]  ;;  %p4358_p10 = pnand %p4357_p6, %p5613_p9 }
  0x40   : > { %306 = vperm.xlu1 %4245, %v242_v1   ;;  %302 = vperm.xlu0 %4243, %v241_v2   ;;  %v4575_v52 = vrot.slane %v4570_v49, %v335_v48  ;;  %v3374_v60 = vld [vmem:[%s5600_s3] ss:$0 sm:$0xff] }
  0x41   : > { %4020 = vmatpush3.bf16.msra.mxu0 %v4017_v13  ;;  %4042 = vmatprep.subr.bf16.mxu1 %v4041_v37  ;;  %p4359_p12 = pneg %p4358_p10 }
  0x42   : > { %4022 = vmatprep.subr.bf16.mxu0 %v4021_v17  ;;  %4044 = vmatpush3.bf16.msra.mxu1 %v4041_v37 }
  0x43   : > { %4046 = vmatprep.subr.bf16.mxu1 %v4045_v39 }
  0x44   : > { %4246 = vset.pattern.permute.xlu1 %v4427_v0  ;;  %310 = vperm.xlu0 %4243, %v243_v12  }
  0x45   : > { %261 = vperm.xlu1 %4246, %v243_v12   ;;  %4024 = vmatpush3.bf16.msra.mxu0 %v4021_v17 }
  0x46   : > { %4026 = vmatprep.subr.bf16.mxu0 %v4025_v21  ;;  %4048 = vmatpush3.bf16.msra.mxu1 %v4045_v39 }
  0x47   : > { %4050 = vmatprep.subr.bf16.mxu1 %v4049_v42 }
  0x48   : > { %314 = vperm.xlu0 %4243, %v244_v16  }
  0x49   : > { %266 = vperm.xlu1 %4246, %v244_v16   ;;  %4028 = vmatpush3.bf16.msra.mxu0 %v4025_v21 }
  0x4a   : > { %4030 = vmatprep.subr.bf16.mxu0 %v4029_v25  ;;  %4052 = vmatpush3.bf16.msra.mxu1 %v4049_v42 }
  0x4b   : > { %4054 = vmatprep.subr.bf16.mxu1 %v4053_v45 }
  0x4c   : > { %318 = vperm.xlu0 %4243, %v245_v20  }
  0x4d   : > { %271 = vperm.xlu1 %4246, %v245_v20   ;;  %4032 = vmatpush3.bf16.msra.mxu0 %v4029_v25 }
  0x4e   : > { %4034 = vmatprep.subr.bf16.mxu0 %v4033_v29  ;;  %4056 = vmatpush3.bf16.msra.mxu1 %v4053_v45 }
  0x50   : > { %322 = vperm.xlu0 %4243, %v246_v24  }
  0x51   : > { %276 = vperm.xlu1 %4246, %v246_v24   ;;  %4036 = vmatpush3.bf16.msra.mxu0 %v4033_v29 }
  0x52   : > { %4038 = vmatprep.subr.bf16.mxu0 %v4037_v33 }
  0x54   : > { %326 = vperm.xlu0 %4243, %v247_v28  }
  0x55   : > { %281 = vperm.xlu1 %4246, %v247_v28   ;;  %4040 = vmatpush3.bf16.msra.mxu0 %v4037_v33 }
  0x58   : > { %330 = vperm.xlu0 %4243, %v248_v32  }
  0x59   : > { %286 = vperm.xlu1 %4246, %v248_v32  }
  0x5c   : > { %4247 = vset.pattern.permute.xlu0 %v4427_v0 }
  0xba   : > { %v257_v50 = vpop.permute.xlu1 %256  ;;  %v252_v51 = vpop.permute.xlu0 %251 }
  0xbb   : > { %v294_v56 = vmul.f32 %v4580_v53, %v257_v50  ;;  %v293_v57 = vmul.f32 %v4580_v53, %v252_v51 }
  0xbf   : > { %v307_v54 = vpop.permute.xlu1 %306  ;;  %v303_v55 = vpop.permute.xlu0 %302 }
  0xc0   : > { %v338_v58 = vmul.f32 %v4575_v52, %v307_v54  ;;  %v337_v59 = vmul.f32 %v4575_v52, %v303_v55 }
  0xc2   : > { %v346_v61 = vadd.f32 %v338_v58, %v294_v56  ;;  %v345_v62 = vadd.f32 %v337_v59, %v293_v57 }
  0xc3   : > { %v311_v63 = vpop.permute.xlu0 %310 }
  0xc4   : > { %v361_v0 = vadd.f32 %v3374_v60, %v346_v61  ;;  %v360_v1 = vadd.f32 %v3374_v60, %v345_v62  ;;  %v339_v2 = vmul.f32 %v4575_v52, %v311_v63  ;;  %v262_v3 = vpop.permute.xlu1 %261 }
  0xc5   : > { %v295_v4 = vmul.f32 %v4580_v53, %v262_v3 }
  0xc6   : > { %4248 = vtanh.f32 %v361_v0 }
  0xc7   : > { %4250 = vtanh.f32 %v360_v1  ;;  %v347_v5 = vadd.f32 %v339_v2, %v295_v4  ;;  %v315_v6 = vpop.permute.xlu0 %314  ;;  %v424_v1 = vmul.f32 %v4570_v49, %v4570_v49 }
  0xc8   : > { %v340_v7 = vmul.f32 %v4575_v52, %v315_v6  ;;  %v267_v8 = vpop.permute.xlu1 %266 }
  0xc9   : > { %v362_v9 = vadd.f32 %v3374_v60, %v347_v5  ;;  %v296_v10 = vmul.f32 %v4580_v53, %v267_v8 }
  0xcb   : > { %4252 = vtanh.f32 %v362_v9  ;;  %v348_v11 = vadd.f32 %v340_v7, %v296_v10  ;;  %v319_v12 = vpop.permute.xlu0 %318  ;;  %v428_v7 = vrot.slane %v424_v1, %v335_v48 }
  0xcc   : > { %v341_v13 = vmul.f32 %v4575_v52, %v319_v12  ;;  %v272_v14 = vpop.permute.xlu1 %271 }
  0xcd   : > { %v363_v15 = vadd.f32 %v3374_v60, %v348_v11  ;;  %v297_v16 = vmul.f32 %v4580_v53, %v272_v14 }
  0xcf   : > { %4254 = vtanh.f32 %v363_v15  ;;  %v349_v17 = vadd.f32 %v341_v13, %v297_v16  ;;  %v323_v18 = vpop.permute.xlu0 %322 }
  0xd0   : > { %v4595_v19 = vpop.eup %4248  ;;  %v342_v20 = vmul.f32 %v4575_v52, %v323_v18  ;;  %v277_v21 = vpop.permute.xlu1 %276 }
  0xd1   : > { %v4598_v22 = vpop.eup %4250  ;;  %v364_v23 = vadd.f32 %v3374_v60, %v349_v17  ;;  %v298_v24 = vmul.f32 %v4580_v53, %v277_v21  ;;  %v377_v44 = vmul.f32 %v4595_v19, %v4595_v19  ;;  %v417_v15 = vmul.f32 -2.0, %v4595_v19 }
  0xd2   : > { %3653 = vmatprep.mubr.f32.mxu0 %v4598_v22  ;;  %v376_v43 = vmul.f32 %v4598_v22, %v4598_v22  ;;  %v416_v11 = vmul.f32 -2.0, %v4598_v22 }
  0xd3   : > { %4256 = vtanh.f32 %v364_v23  ;;  %v350_v25 = vadd.f32 %v342_v20, %v298_v24  ;;  %3654 = vmatmul.mubr.f32.vlgmr.msra.gmra.mrb[0].mxu0 %v4595_v19  ;;  %v327_v26 = vpop.permute.xlu0 %326  ;;  %v4618_v51 = vsub.f32 1.0, %v377_v44  ;;  %v985_v44 = vld [vmem:[#allocation4 + $0xd0] sm:$0xff] }
  0xd4   : > { %v343_v27 = vmul.f32 %v4575_v52, %v327_v26  ;;  %v282_v28 = vpop.permute.xlu1 %281  ;;  %v4614_v46 = vsub.f32 1.0, %v376_v43 }
  0xd5   : > { %v4604_v29 = vpop.eup %4252  ;;  %v365_v30 = vadd.f32 %v3374_v60, %v350_v25  ;;  %v299_v31 = vmul.f32 %v4580_v53, %v282_v28  ;;  %v401_v59 = vmul.f32 %v4580_v53, %v4618_v51  ;;  %v430_v13 = vmul.f32 %v428_v7, %v4618_v51 }
  0xd6   : > { %3656 = vmatprep.mubr.f32.mxu0 %v4604_v29  ;;  %v378_v50 = vmul.f32 %v4604_v29, %v4604_v29  ;;  %v400_v56 = vmul.f32 %v4580_v53, %v4614_v46  ;;  %v429_v49 = vmul.f32 %v428_v7, %v4614_v46  ;;  %v418_v16 = vmul.f32 -2.0, %v4604_v29 }
  0xd7   : > { %4258 = vtanh.f32 %v365_v30  ;;  %v351_v32 = vadd.f32 %v343_v27, %v299_v31  ;;  %v331_v33 = vpop.permute.xlu0 %330  ;;  %v438_v17 = vmul.f32 %v430_v13, %v417_v15 }
  0xd8   : > { %v344_v34 = vmul.f32 %v4575_v52, %v331_v33  ;;  %v287_v35 = vpop.permute.xlu1 %286  ;;  %v4622_v57 = vsub.f32 1.0, %v378_v50  ;;  %v437_v14 = vmul.f32 %v429_v49, %v416_v11  ;;  %v453_v33 = vmul.f32 %v4614_v46, %v4575_v52  ;;  %v987_v50 = vld [vmem:[#allocation4 + $0xe0] sm:$0xff] }
  0xd9   : > { %v4255_v36 = vpop.eup %4254  ;;  %v366_v37 = vadd.f32 %v3374_v60, %v351_v32  ;;  %v300_v38 = vmul.f32 %v4580_v53, %v287_v35  ;;  %v3376_v49 = vld [vmem:[%s5600_s3 + $0x1] ss:$0 sm:$0xff] }
  0xda   : > { %3657 = vmatmul.mubr.f32.gmra.mrb[2].mxu0 %v4255_v36  ;;  %v379_v54 = vmul.f32 %v4255_v36, %v4255_v36  ;;  %v402_v62 = vmul.f32 %v4580_v53, %v4622_v57  ;;  %v431_v48 = vmul.f32 %v428_v7, %v4622_v57  ;;  %v419_v23 = vmul.f32 -2.0, %v4255_v36 }
  0xdb   : > { %4260 = vtanh.f32 %v366_v37  ;;  %v352_v39 = vadd.f32 %v344_v34, %v300_v38  ;;  %v454_v34 = vmul.f32 %v4618_v51, %v4575_v52  ;;  %v455_v35 = vmul.f32 %v4622_v57, %v4575_v52  ;;  %v988_v51 = vld [vmem:[#allocation4 + $0xe8] sm:$0xff] }
  0xdc   : > { %v439_v20 = vmul.f32 %v431_v48, %v418_v16 }
  0xdd   : > { %v4257_v40 = vpop.eup %4256  ;;  %v367_v41 = vadd.f32 %v3374_v60, %v352_v39  ;;  %v387_v60 = vsub.f32 1.0, %v379_v54  ;;  %v4065_v54 = vpack.c.bf16 %v988_v51, %v987_v50 }
  0xde   : > { %3659 = vmatprep.mubr.f32.mxu0 %v4257_v40  ;;  %v380_v58 = vmul.f32 %v4257_v40, %v4257_v40  ;;  %v420_v22 = vmul.f32 -2.0, %v4257_v40 }
  0xdf   : > { %4262 = vtanh.f32 %v367_v41  ;;  %v403_v2 = vmul.f32 %v4580_v53, %v387_v60  ;;  %v432_v18 = vmul.f32 %v428_v7, %v387_v60  ;;  %v456_v36 = vmul.f32 %v387_v60, %v4575_v52  ;;  %v983_v41 = vld [vmem:[#allocation4 + $0xc0] sm:$0xff] }
  0xe0   : > { %v388_v63 = vsub.f32 1.0, %v380_v58  ;;  %v1450_v58 = vld [vmem:[#allocation4 + $0x108] sm:$0xff] }
  0xe1   : > { %v4259_v42 = vpop.eup %4258 }
  0xe2   : > { %3660 = vmatmul.mubr.f32.gmra.mrb[4].mxu0 %v4259_v42  ;;  %v381_v61 = vmul.f32 %v4259_v42, %v4259_v42  ;;  %v404_v5 = vmul.f32 %v4580_v53, %v388_v63  ;;  %v433_v21 = vmul.f32 %v428_v7, %v388_v63  ;;  %v421_v27 = vmul.f32 -2.0, %v4259_v42  ;;  %v984_v42 = vld [vmem:[#allocation4 + $0xc8] sm:$0xff] }
  0xe3   : > { %v457_v37 = vmul.f32 %v388_v63, %v4575_v52  ;;  %v4057_v43 = vpack.c.bf16 %v984_v42, %v983_v41  ;;  %v1453_v63 = vld [vmem:[#allocation4 + $0x120] sm:$0xff] }
  0xe4   : > { %v389_v3 = vsub.f32 1.0, %v381_v61  ;;  %v441_v25 = vmul.f32 %v433_v21, %v420_v22  ;;  %v1452_v61 = vld [vmem:[#allocation4 + $0x118] sm:$0xff] }
  0xe5   : > { %v4261_v45 = vpop.eup %4260  ;;  %4058 = vmatprep.subr.bf16.mxu1 %v4057_v43 }
  0xe6   : > { %3662 = vmatprep.mubr.f32.mxu0 %v4261_v45  ;;  %v382_v0 = vmul.f32 %v4261_v45, %v4261_v45  ;;  %v405_v8 = vmul.f32 %v4580_v53, %v389_v3  ;;  %v434_v24 = vmul.f32 %v428_v7, %v389_v3  ;;  %v422_v28 = vmul.f32 -2.0, %v4261_v45  ;;  %4060 = vmatpush3.bf16.msra.mxu1 %v4057_v43  ;;  %v986_v45 = vld [vmem:[#allocation4 + $0xd8] sm:$0xff] }
  0xe7   : > { %v458_v38 = vmul.f32 %v389_v3, %v4575_v52  ;;  %v4061_v46 = vpack.c.bf16 %v986_v45, %v985_v44  ;;  %v1456_v3 = vld [vmem:[#allocation4 + $0x138] sm:$0xff] }
  0xe8   : > { %v390_v6 = vsub.f32 1.0, %v382_v0  ;;  %v442_v19 = vmul.f32 %v434_v24, %v421_v27  ;;  %v1454_v0 = vld [vmem:[#allocation4 + $0x128] sm:$0xff] }
  0xe9   : > { %v4263_v55 = vpop.eup %4262  ;;  %4062 = vmatprep.subr.bf16.mxu1 %v4061_v46  ;;  %v4081_v1 = vpack.c.bf16 %v1454_v0, %v1453_v63 }
  0xea   : > { %3663 = vmatmul.mubr.f32.gmra.mrb[6].mxu0 %v4263_v55  ;;  %v383_v4 = vmul.f32 %v4263_v55, %v4263_v55  ;;  %v406_v10 = vmul.f32 %v4580_v53, %v390_v6  ;;  %v435_v26 = vmul.f32 %v428_v7, %v390_v6  ;;  %v423_v29 = vmul.f32 -2.0, %v4263_v55  ;;  %4064 = vmatpush3.bf16.msra.mxu1 %v4061_v46  ;;  %v989_v55 = vld [vmem:[#allocation4 + $0xf0] sm:$0xff] }
  0xeb   : > { %3665 = vmatprep.mubr.f32.mxu0 %v400_v56  ;;  %v459_v39 = vmul.f32 %v390_v6, %v4575_v52  ;;  %4066 = vmatprep.subr.bf16.mxu1 %v4065_v54  ;;  %v990_v56 = vld [vmem:[#allocation4 + $0xf8] sm:$0xff]  ;;  %v1458_v6 = vld [vmem:[#allocation4 + $0x148] sm:$0xff] }
  0xec   : > { %v391_v9 = vsub.f32 1.0, %v383_v4  ;;  %v443_v31 = vmul.f32 %v435_v26, %v422_v28  ;;  %v4069_v57 = vpack.c.bf16 %v990_v56, %v989_v55 }
  0xee   : > { %3666 = vmatmul.mubr.f32.gmra.mrb[8].mxu0 %v401_v59  ;;  %v407_v12 = vmul.f32 %v4580_v53, %v391_v9  ;;  %v440_v53 = vmul.f32 %v432_v18, %v419_v23  ;;  %v436_v30 = vmul.f32 %v428_v7, %v391_v9  ;;  %v460_v40 = vmul.f32 %v391_v9, %v4575_v52  ;;  %v1449_v52 = vld [vmem:[#allocation4 + $0x100] sm:$0xff]  ;;  %v1451_v59 = vld [vmem:[#allocation4 + $0x110] sm:$0xff]  ;;  %v1460_v9 = vld [vmem:[#allocation4 + $0x158] sm:$0xff] }
  0xef   : > { %3668 = vmatprep.mubr.f32.mxu0 %v402_v62  ;;  %4068 = vmatpush3.bf16.msra.mxu1 %v4065_v54  ;;  %v4073_v60 = vpack.c.bf16 %v1450_v58, %v1449_v52  ;;  %v4077_v62 = vpack.c.bf16 %v1452_v61, %v1451_v59 }
  0xf0   : > { %v444_v32 = vmul.f32 %v436_v30, %v423_v29  ;;  %4070 = vmatprep.subr.bf16.mxu1 %v4069_v57 }
  0xf1   : > { %4074 = vmatprep.subr.bf16.mxu0 %v4073_v60 }
  0xf2   : > { %3669 = vmatmul.mubr.f32.gmra.mrb[10].mxu0 %v403_v2  ;;  %v1455_v2 = vld [vmem:[#allocation4 + $0x130] sm:$0xff] }
  0xf3   : > { %3671 = vmatprep.mubr.f32.mxu0 %v404_v5  ;;  %4072 = vmatpush3.bf16.msra.mxu1 %v4069_v57  ;;  %v4085_v4 = vpack.c.bf16 %v1456_v3, %v1455_v2  ;;  %v1457_v5 = vld [vmem:[#allocation4 + $0x140] sm:$0xff] }
  0xf4   : > { %4076 = vmatpush3.bf16.msra.mxu0 %v4073_v60  ;;  %v4089_v7 = vpack.c.bf16 %v1458_v6, %v1457_v5 }
  0xf5   : > { %4078 = vmatprep.subr.bf16.mxu0 %v4077_v62 }
  0xf6   : > { %3672 = vmatmul.mubr.f32.gmra.mrb[12].mxu0 %v405_v8  ;;  %v1459_v8 = vld [vmem:[#allocation4 + $0x150] sm:$0xff] }
  0xf7   : > { %3674 = vmatprep.mubr.f32.mxu0 %v406_v10  ;;  %v4093_v10 = vpack.c.bf16 %v1460_v9, %v1459_v8 }
  0xf8   : > { %4080 = vmatpush3.bf16.msra.mxu0 %v4077_v62 }
  0xf9   : > { %4082 = vmatprep.subr.bf16.mxu0 %v4081_v1 }
  0xfa   : > { %3675 = vmatmul.mubr.f32.gmra.mrb[14].mxu0 %v407_v12 }
  0xfb   : > { %3677 = vmatprep.mubr.f32.mxu0 %v437_v14 }
  0xfc   : > { %4084 = vmatpush3.bf16.msra.mxu0 %v4081_v1 }
  0xfd   : > { %4086 = vmatprep.subr.bf16.mxu0 %v4085_v4 }
  0xfe   : > { %3678 = vmatmul.mubr.f32.gmra.mrb[16].mxu0 %v438_v17 }
  0xff   : > { %3680 = vmatprep.mubr.f32.mxu0 %v439_v20 }
 0x100   : > { %4088 = vmatpush3.bf16.msra.mxu0 %v4085_v4 }
 0x101   : > { %4090 = vmatprep.subr.bf16.mxu0 %v4089_v7 }
 0x102   : > { %3681 = vmatmul.mubr.f32.gmra.mrb[18].mxu0 %v440_v53 }
 0x103   : > { %3683 = vmatprep.mubr.f32.mxu0 %v441_v25 }
 0x104   : > { %4092 = vmatpush3.bf16.msra.mxu0 %v4089_v7 }
 0x105   : > { %4094 = vmatprep.subr.bf16.mxu0 %v4093_v10 }
 0x106   : > { %3684 = vmatmul.mubr.f32.gmra.mrb[20].mxu0 %v442_v19 }
 0x107   : > { %3686 = vmatprep.mubr.f32.mxu0 %v443_v31 }
 0x108   : > { %4096 = vmatpush3.bf16.msra.mxu0 %v4093_v10 }
 0x10a   : > { %3687 = vmatmul.mubr.f32.gmra.mrb[22].mxu0 %v444_v32 }
 0x10b   : > { %3689 = vmatprep.mubr.f32.mxu0 %v453_v33 }
 0x10e   : > { %3690 = vmatmul.mubr.f32.gmra.mrb[24].mxu0 %v454_v34 }
 0x10f   : > { %3692 = vmatprep.mubr.f32.mxu0 %v455_v35 }
 0x112   : > { %3693 = vmatmul.mubr.f32.gmra.mrb[26].mxu0 %v456_v36 }
 0x113   : > { %3695 = vmatprep.mubr.f32.mxu0 %v457_v37 }
 0x116   : > { %3696 = vmatmul.mubr.f32.gmra.mrb[28].mxu0 %v458_v38 }
 0x117   : > { %3698 = vmatprep.mubr.f32.mxu0 %v459_v39 }
 0x11a   : > { %3699 = vmatmul.mubr.f32.gmra.mrb[30].mxu0 %v460_v40 }
 0x1a6   : > { %v3655_v11 = vpop.f32.mrb[0].mxu0 }
 0x1a7   : > { %v791_v12 = vadd.f32 %v3655_v11, %v3376_v49  ;;  %v583_v13 = vpop.f32.mrb[1].mxu0 }
 0x1a8   : > { %v790_v14 = vadd.f32 %v3376_v49, %v583_v13 }
 0x1aa   : > { %4264 = vtanh.f32 %v790_v14 }
 0x1ab   : > { %4266 = vtanh.f32 %v791_v12 }
 0x1ad   : > { %v3658_v48 = vpop.f32.mrb[2].mxu0 }
 0x1ae   : > { %v793_v15 = vadd.f32 %v3658_v48, %v3376_v49  ;;  %v593_v16 = vpop.f32.mrb[3].mxu0 }
 0x1af   : > { %v792_v17 = vadd.f32 %v3376_v49, %v593_v16 }
 0x1b1   : > { %4268 = vtanh.f32 %v792_v17 }
 0x1b2   : > { %4270 = vtanh.f32 %v793_v15 }
 0x1b4   : > { %v4657_v18 = vpop.eup %4264 }
 0x1b5   : > { %v4659_v20 = vpop.eup %4266  ;;  %3733 = vmatprep.mubr.f32.mxu1 %v4657_v18  ;;  %v3661_v21 = vpop.f32.mrb[4].mxu0  ;;  %v830_v28 = vmul.f32 %v4657_v18, %v4657_v18 }
 0x1b6   : > { %v795_v23 = vadd.f32 %v3661_v21, %v3376_v49  ;;  %3734 = vmatmul.mubr.f32.vlgmr.msra.gmra.mrb[0].mxu1 %v4659_v20  ;;  %v603_v22 = vpop.f32.mrb[5].mxu0  ;;  %v831_v26 = vmul.f32 %v4659_v20, %v4659_v20 }
 0x1b7   : > { %v794_v53 = vadd.f32 %v3376_v49, %v603_v22  ;;  %v4677_v34 = vsub.f32 1.0, %v830_v28 }
 0x1b8   : > { %4272 = vtanh.f32 %v795_v23  ;;  %v4673_v29 = vsub.f32 1.0, %v831_v26 }
 0x1b9   : > { %4274 = vtanh.f32 %v794_v53 }
 0x1bb   : > { %v4663_v24 = vpop.eup %4268 }
 0x1bc   : > { %v4665_v25 = vpop.eup %4270  ;;  %3736 = vmatprep.mubr.f32.mxu1 %v4663_v24  ;;  %v832_v35 = vmul.f32 %v4663_v24, %v4663_v24 }
 0x1bd   : > { %v3664_v27 = vpop.f32.mrb[6].mxu0  ;;  %3737 = vmatmul.mubr.f32.gmra.mrb[2].mxu1 %v4665_v25  ;;  %v833_v32 = vmul.f32 %v4665_v25, %v4665_v25 }
 0x1be   : > { %v797_v19 = vadd.f32 %v3664_v27, %v3376_v49  ;;  %v613_v30 = vpop.f32.mrb[7].mxu0  ;;  %v4693_v44 = vsub.f32 1.0, %v832_v35 }
 0x1bf   : > { %v796_v31 = vadd.f32 %v3376_v49, %v613_v30  ;;  %v4688_v41 = vsub.f32 1.0, %v833_v32 }
 0x1c0   : > { %4276 = vtanh.f32 %v797_v19  ;;  %v879_v19 = vmul.f32 2.0, %v4659_v20 }
 0x1c1   : > { %4278 = vtanh.f32 %v796_v31  ;;  %v3667_v33 = vpop.f32.mrb[8].mxu0  ;;  %v878_v31 = vmul.f32 2.0, %v4657_v18 }
 0x1c2   : > { %v4681_v36 = vpop.eup %4272  ;;  %v855_v37 = vmul.f32 %v3667_v33, %v4673_v29  ;;  %v623_v38 = vpop.f32.mrb[9].mxu0 }
 0x1c3   : > { %v4684_v39 = vpop.eup %4274  ;;  %v854_v40 = vmul.f32 %v4677_v34, %v623_v38  ;;  %v835_v42 = vmul.f32 %v4681_v36, %v4681_v36 }
 0x1c4   : > { %3739 = vmatprep.mubr.f32.mxu1 %v4684_v39  ;;  %v834_v45 = vmul.f32 %v4684_v39, %v4684_v39 }
 0x1c5   : > { %v3670_v43 = vpop.f32.mrb[10].mxu0  ;;  %3740 = vmatmul.mubr.f32.gmra.mrb[4].mxu1 %v4681_v36  ;;  %v4699_v54 = vsub.f32 1.0, %v835_v42 }
 0x1c6   : > { %v857_v46 = vmul.f32 %v3670_v43, %v4688_v41  ;;  %v633_v50 = vpop.f32.mrb[11].mxu0  ;;  %v4701_v56 = vsub.f32 1.0, %v834_v45 }
 0x1c7   : > { %v856_v51 = vmul.f32 %v4693_v44, %v633_v50 }
 0x1c9   : > { %v3673_v55 = vpop.f32.mrb[12].mxu0 }
 0x1ca   : > { %v4703_v57 = vpop.eup %4276  ;;  %v859_v52 = vmul.f32 %v3673_v55, %v4699_v54  ;;  %v643_v58 = vpop.f32.mrb[13].mxu0 }
 0x1cb   : > { %v4706_v59 = vpop.eup %4278  ;;  %v858_v60 = vmul.f32 %v4701_v56, %v643_v58  ;;  %v837_v61 = vmul.f32 %v4703_v57, %v4703_v57 }
 0x1cc   : > { %3742 = vmatprep.mubr.f32.mxu1 %v4706_v59  ;;  %v836_v62 = vmul.f32 %v4706_v59, %v4706_v59 }
 0x1cd   : > { %v3676_v63 = vpop.f32.mrb[14].mxu0  ;;  %v4714_v0 = vsub.f32 1.0, %v837_v61  ;;  %3743 = vmatmul.mubr.f32.gmra.mrb[6].mxu1 %v4703_v57 }
 0x1ce   : > { %v653_v1 = vpop.f32.mrb[15].mxu0  ;;  %v4717_v2 = vsub.f32 1.0, %v836_v62  ;;  %3745 = vmatprep.mubr.f32.mxu1 %v854_v40 }
 0x1cf   : > { %v861_v3 = vmul.f32 %v3676_v63, %v4714_v0 }
 0x1d0   : > { %v860_v4 = vmul.f32 %v4717_v2, %v653_v1 }
 0x1d1   : > { %v3679_v5 = vpop.f32.mrb[16].mxu0  ;;  %3746 = vmatmul.mubr.f32.gmra.mrb[8].mxu1 %v855_v37 }
 0x1d2   : > { %v871_v6 = vmul.f32 %v3679_v5, %v4673_v29  ;;  %v663_v7 = vpop.f32.mrb[17].mxu0  ;;  %3748 = vmatprep.mubr.f32.mxu1 %v856_v51 }
 0x1d3   : > { %v870_v8 = vmul.f32 %v4677_v34, %v663_v7 }
 0x1d5   : > { %v3682_v9 = vpop.f32.mrb[18].mxu0  ;;  %3749 = vmatmul.mubr.f32.gmra.mrb[10].mxu1 %v857_v46  ;;  %v881_v46 = vmul.f32 2.0, %v4665_v25  ;;  %v883_v25 = vmul.f32 2.0, %v4681_v36 }
 0x1d6   : > { %v4724_v10 = vmul.f32 %v3682_v9, %v4688_v41  ;;  %v673_v49 = vpop.f32.mrb[19].mxu0  ;;  %3751 = vmatprep.mubr.f32.mxu1 %v858_v60 }
 0x1d7   : > { %v872_v11 = vmul.f32 %v4693_v44, %v673_v49 }
 0x1d9   : > { %v3685_v12 = vpop.f32.mrb[20].mxu0  ;;  %3752 = vmatmul.mubr.f32.gmra.mrb[12].mxu1 %v859_v52 }
 0x1da   : > { %v4728_v13 = vmul.f32 %v3685_v12, %v4699_v54  ;;  %v683_v14 = vpop.f32.mrb[21].mxu0  ;;  %3754 = vmatprep.mubr.f32.mxu1 %v860_v4 }
 0x1db   : > { %v4731_v48 = vmul.f32 %v4701_v56, %v683_v14 }
 0x1dd   : > { %v3688_v15 = vpop.f32.mrb[22].mxu0  ;;  %3755 = vmatmul.mubr.f32.gmra.mrb[14].mxu1 %v861_v3 }
 0x1de   : > { %v4734_v16 = vmul.f32 %v3688_v15, %v4714_v0  ;;  %v693_v17 = vpop.f32.mrb[23].mxu0 }
 0x1df   : > { %v4737_v21 = vmul.f32 %v4717_v2, %v693_v17 }
 0x1e1   : > { %v3691_v23 = vpop.f32.mrb[24].mxu0 }
 0x1e2   : > { %v887_v22 = vmul.f32 %v3691_v23, %v3691_v23  ;;  %v927_v53 = vmul.f32 %v3691_v23, %v4673_v29  ;;  %v703_v26 = vpop.f32.mrb[25].mxu0 }
 0x1e3   : > { %v886_v27 = vmul.f32 %v703_v26, %v703_v26  ;;  %v926_v28 = vmul.f32 %v4677_v34, %v703_v26  ;;  %v1926_v26 = vld [vmem:[#allocation4 + $0x198] sm:$0xff] }
 0x1e4   : > { %v895_v30 = vmul.f32 %v887_v22, %v4673_v29  ;;  %v880_v29 = vmul.f32 2.0, %v4663_v24  ;;  %v1925_v22 = vld [vmem:[#allocation4 + $0x190] sm:$0xff] }
 0x1e5   : > { %v894_v32 = vmul.f32 %v886_v27, %v4677_v34  ;;  %v3694_v33 = vpop.f32.mrb[26].mxu0  ;;  %v4109_v27 = vpack.c.bf16 %v1926_v26, %v1925_v22 }
 0x1e6   : > { %v903_v35 = vmul.f32 %v895_v30, %v879_v19  ;;  %v889_v37 = vmul.f32 %v3694_v33, %v3694_v33  ;;  %v929_v38 = vmul.f32 %v3694_v33, %v4688_v41  ;;  %v713_v40 = vpop.f32.mrb[27].mxu0  ;;  %v1928_v19 = vld [vmem:[#allocation4 + $0x1a8] sm:$0xff] }
 0x1e7   : > { %v902_v42 = vmul.f32 %v894_v32, %v878_v31  ;;  %v888_v43 = vmul.f32 %v713_v40, %v713_v40  ;;  %v928_v45 = vmul.f32 %v4693_v44, %v713_v40  ;;  %v1929_v31 = vld [vmem:[#allocation4 + $0x1b0] sm:$0xff]  ;;  %v1930_v32 = vld [vmem:[#allocation4 + $0x1b8] sm:$0xff] }
 0x1e8   : > { %v897_v20 = vmul.f32 %v889_v37, %v4688_v41  ;;  %v911_v50 = vsub.f32 %v871_v6, %v903_v35  ;;  %v4117_v33 = vpack.c.bf16 %v1930_v32, %v1929_v31  ;;  %v1931_v35 = vld [vmem:[#allocation4 + $0x1c0] sm:$0xff]  ;;  %v1932_v37 = vld [vmem:[#allocation4 + $0x1c8] sm:$0xff]  ;;  %v1933_v40 = vld [vmem:[#allocation4 + $0x1d0] sm:$0xff] }
 0x1e9   : > { %v896_v18 = vmul.f32 %v888_v43, %v4693_v44  ;;  %v3697_v34 = vpop.f32.mrb[28].mxu0  ;;  %v910_v51 = vsub.f32 %v870_v8, %v902_v42  ;;  %v882_v44 = vmul.f32 2.0, %v4684_v39  ;;  %v1934_v42 = vld [vmem:[#allocation4 + $0x1d8] sm:$0xff]  ;;  %v3378_v43 = vld [vmem:[%s5600_s3 + $0x2] ss:$0 sm:$0xff] }
 0x1ea   : > { %v905_v55 = vmul.f32 %v897_v20, %v881_v46  ;;  %v891_v52 = vmul.f32 %v3697_v34, %v3697_v34  ;;  %v931_v58 = vmul.f32 %v3697_v34, %v4699_v54  ;;  %v723_v60 = vpop.f32.mrb[29].mxu0 }
 0x1eb   : > { %v904_v61 = vmul.f32 %v896_v18, %v880_v29  ;;  %v890_v62 = vmul.f32 %v723_v60, %v723_v60  ;;  %v930_v63 = vmul.f32 %v4701_v56, %v723_v60  ;;  %3757 = vmatprep.mubr.f32.mxu1 %v910_v51 }
 0x1ec   : > { %v899_v41 = vmul.f32 %v891_v52, %v4699_v54  ;;  %3758 = vmatmul.mubr.f32.gmra.mrb[16].mxu1 %v911_v50  ;;  %v913_v24 = vsub.f32 %v4724_v10, %v905_v55  ;;  %v885_v54 = vmul.f32 2.0, %v4703_v57  ;;  %v1461_v57 = vld [vmem:[#allocation4 + $0x160] sm:$0xff] }
 0x1ed   : > { %v898_v1 = vmul.f32 %v890_v62, %v4701_v56  ;;  %v3700_v3 = vpop.f32.mrb[30].mxu0  ;;  %v912_v4 = vsub.f32 %v872_v11, %v904_v61  ;;  %v884_v56 = vmul.f32 2.0, %v4706_v59  ;;  %v1462_v59 = vld [vmem:[#allocation4 + $0x168] sm:$0xff] }
 0x1ee   : > { %v907_v5 = vmul.f32 %v899_v41, %v883_v25  ;;  %v893_v6 = vmul.f32 %v3700_v3, %v3700_v3  ;;  %v933_v7 = vmul.f32 %v3700_v3, %v4714_v0  ;;  %v733_v8 = vpop.f32.mrb[31].mxu0 }
 0x1ef   : > { %v906_v9 = vmul.f32 %v898_v1, %v882_v44  ;;  %v892_v49 = vmul.f32 %v733_v8, %v733_v8  ;;  %v932_v36 = vmul.f32 %v4717_v2, %v733_v8  ;;  %3760 = vmatprep.mubr.f32.mxu1 %v912_v4 }
 0x1f0   : > { %v901_v10 = vmul.f32 %v893_v6, %v4714_v0  ;;  %3761 = vmatmul.mubr.f32.gmra.mrb[18].mxu1 %v913_v24  ;;  %v915_v39 = vsub.f32 %v4728_v13, %v907_v5  ;;  %v4097_v0 = vpack.c.bf16 %v1462_v59, %v1461_v57  ;;  %v1464_v13 = vld [vmem:[#allocation4 + $0x178] sm:$0xff] }
 0x1f1   : > { %v900_v11 = vmul.f32 %v892_v49, %v4717_v2  ;;  %v914_v12 = vsub.f32 %v4731_v48, %v906_v9  ;;  %v1463_v2 = vld [vmem:[#allocation4 + $0x170] sm:$0xff] }
 0x1f2   : > { %v909_v14 = vmul.f32 %v901_v10, %v885_v54  ;;  %4098 = vmatprep.subr.bf16.mxu0 %v4097_v0  ;;  %v4101_v48 = vpack.c.bf16 %v1464_v13, %v1463_v2 }
 0x1f3   : > { %v908_v15 = vmul.f32 %v900_v11, %v884_v56  ;;  %3763 = vmatprep.mubr.f32.mxu1 %v914_v12  ;;  %4100 = vmatpush3.bf16.msra.mxu0 %v4097_v0 }
 0x1f4   : > { %3764 = vmatmul.mubr.f32.gmra.mrb[20].mxu1 %v915_v39  ;;  %v917_v17 = vsub.f32 %v4734_v16, %v909_v14  ;;  %4102 = vmatprep.subr.bf16.mxu0 %v4101_v48  ;;  %v1923_v16 = vld [vmem:[#allocation4 + $0x180] sm:$0xff] }
 0x1f5   : > { %v916_v23 = vsub.f32 %v4737_v21, %v908_v15  ;;  %v1924_v21 = vld [vmem:[#allocation4 + $0x188] sm:$0xff] }
 0x1f7   : > { %3766 = vmatprep.mubr.f32.mxu1 %v916_v23  ;;  %4104 = vmatpush3.bf16.msra.mxu0 %v4101_v48 }
 0x1f8   : > { %3767 = vmatmul.mubr.f32.gmra.mrb[22].mxu1 %v917_v17 }
 0x1f9   : > { %3769 = vmatprep.mubr.f32.mxu1 %v926_v28  ;;  %v1927_v28 = vld [vmem:[#allocation4 + $0x1a0] sm:$0xff] }
 0x1fa   : > { %v4113_v30 = vpack.c.bf16 %v1928_v19, %v1927_v28 }
 0x1fc   : > { %3770 = vmatmul.mubr.f32.gmra.mrb[24].mxu1 %v927_v53  ;;  %v4105_v53 = vpack.c.bf16 %v1924_v21, %v1923_v16 }
 0x1fd   : > { %3772 = vmatprep.mubr.f32.mxu1 %v928_v45  ;;  %v4125_v45 = vpack.c.bf16 %v1934_v42, %v1933_v40 }
 0x1fe   : > { %4106 = vmatprep.subr.bf16.mxu1 %v4105_v53 }
 0x1ff   : > { %4108 = vmatpush3.bf16.msra.mxu1 %v4105_v53 }
 0x200   : > { %3773 = vmatmul.mubr.f32.gmra.mrb[26].mxu1 %v929_v38  ;;  %4110 = vmatprep.subr.bf16.mxu1 %v4109_v27  ;;  %v4121_v38 = vpack.c.bf16 %v1932_v37, %v1931_v35 }
 0x201   : > { %3775 = vmatprep.mubr.f32.mxu1 %v930_v63 }
 0x203   : > { %4112 = vmatpush3.bf16.msra.mxu1 %v4109_v27 }
 0x204   : > { %3776 = vmatmul.mubr.f32.gmra.mrb[28].mxu1 %v931_v58  ;;  %4114 = vmatprep.subr.bf16.mxu1 %v4113_v30 }
 0x205   : > { %3778 = vmatprep.mubr.f32.mxu1 %v932_v36 }
 0x207   : > { %4116 = vmatpush3.bf16.msra.mxu1 %v4113_v30 }
 0x208   : > { %3779 = vmatmul.mubr.f32.gmra.mrb[30].mxu1 %v933_v7  ;;  %4118 = vmatprep.subr.bf16.mxu1 %v4117_v33 }
 0x20b   : > { %4120 = vmatpush3.bf16.msra.mxu1 %v4117_v33 }
 0x20c   : > { %4122 = vmatprep.subr.bf16.mxu1 %v4121_v38 }
 0x20f   : > { %4124 = vmatpush3.bf16.msra.mxu1 %v4121_v38 }
 0x210   : > { %4126 = vmatprep.subr.bf16.mxu1 %v4125_v45 }
 0x213   : > { %4128 = vmatpush3.bf16.msra.mxu1 %v4125_v45 }
 0x289   : > { %v3735_v46 = vpop.f32.mrb[0].mxu1 }
 0x28a   : > { %v1265_v20 = vadd.f32 %v3735_v46, %v3378_v43  ;;  %v1057_v50 = vpop.f32.mrb[1].mxu1 }
 0x28b   : > { %v1264_v29 = vadd.f32 %v3378_v43, %v1057_v50 }
 0x28d   : > { %4280 = vtanh.f32 %v1264_v29 }
 0x28e   : > { %4282 = vtanh.f32 %v1265_v20 }
 0x290   : > { %v3738_v18 = vpop.f32.mrb[2].mxu1 }
 0x291   : > { %v1267_v34 = vadd.f32 %v3738_v18, %v3378_v43  ;;  %v1067_v51 = vpop.f32.mrb[3].mxu1 }
 0x292   : > { %v1266_v55 = vadd.f32 %v3378_v43, %v1067_v51 }
 0x294   : > { %4284 = vtanh.f32 %v1266_v55 }
 0x295   : > { %4286 = vtanh.f32 %v1267_v34 }
 0x297   : > { %v4771_v52 = vpop.eup %4280 }
 0x298   : > { %v4773_v58 = vpop.eup %4282  ;;  %3813 = vmatprep.mubr.f32.mxu0 %v4771_v52  ;;  %v3741_v60 = vpop.f32.mrb[4].mxu1  ;;  %v1304_v1 = vmul.f32 %v4771_v52, %v4771_v52 }
 0x299   : > { %v1269_v61 = vadd.f32 %v3741_v60, %v3378_v43  ;;  %3814 = vmatmul.mubr.f32.vlgmr.msra.gmra.mrb[32].mxu0 %v4773_v58  ;;  %v1077_v62 = vpop.f32.mrb[5].mxu1  ;;  %v1305_v24 = vmul.f32 %v4773_v58, %v4773_v58 }
 0x29a   : > { %v1268_v63 = vadd.f32 %v3378_v43, %v1077_v62  ;;  %v4791_v9 = vsub.f32 1.0, %v1304_v1 }
 0x29b   : > { %4288 = vtanh.f32 %v1269_v61  ;;  %v4787_v6 = vsub.f32 1.0, %v1305_v24 }
 0x29c   : > { %4290 = vtanh.f32 %v1268_v63 }
 0x29e   : > { %v4777_v25 = vpop.eup %4284 }
 0x29f   : > { %v4779_v41 = vpop.eup %4286  ;;  %3816 = vmatprep.mubr.f32.mxu0 %v4777_v25  ;;  %v1306_v49 = vmul.f32 %v4777_v25, %v4777_v25 }
 0x2a0   : > { %v3744_v44 = vpop.f32.mrb[6].mxu1  ;;  %3817 = vmatmul.mubr.f32.gmra.mrb[34].mxu0 %v4779_v41  ;;  %v1307_v7 = vmul.f32 %v4779_v41, %v4779_v41 }
 0x2a1   : > { %v1271_v3 = vadd.f32 %v3744_v44, %v3378_v43  ;;  %v1087_v4 = vpop.f32.mrb[7].mxu1  ;;  %v4807_v15 = vsub.f32 1.0, %v1306_v49 }
 0x2a2   : > { %v1270_v5 = vadd.f32 %v3378_v43, %v1087_v4  ;;  %v4802_v11 = vsub.f32 1.0, %v1307_v7 }
 0x2a3   : > { %4292 = vtanh.f32 %v1271_v3  ;;  %v1353_v3 = vmul.f32 2.0, %v4773_v58 }
 0x2a4   : > { %4294 = vtanh.f32 %v1270_v5  ;;  %v3747_v8 = vpop.f32.mrb[8].mxu1  ;;  %v1352_v5 = vmul.f32 2.0, %v4771_v52 }
 0x2a5   : > { %v4795_v36 = vpop.eup %4288  ;;  %v1329_v54 = vmul.f32 %v3747_v8, %v4787_v6  ;;  %v1097_v10 = vpop.f32.mrb[9].mxu1 }
 0x2a6   : > { %v4798_v39 = vpop.eup %4290  ;;  %v1328_v56 = vmul.f32 %v4791_v9, %v1097_v10  ;;  %v1309_v12 = vmul.f32 %v4795_v36, %v4795_v36 }
 0x2a7   : > { %3819 = vmatprep.mubr.f32.mxu0 %v4798_v39  ;;  %v1308_v17 = vmul.f32 %v4798_v39, %v4798_v39 }
 0x2a8   : > { %v3750_v14 = vpop.f32.mrb[10].mxu1  ;;  %3820 = vmatmul.mubr.f32.gmra.mrb[36].mxu0 %v4795_v36  ;;  %v4813_v0 = vsub.f32 1.0, %v1309_v12 }
 0x2a9   : > { %v1331_v23 = vmul.f32 %v3750_v14, %v4802_v11  ;;  %v1107_v57 = vpop.f32.mrb[11].mxu1  ;;  %v4815_v13 = vsub.f32 1.0, %v1308_v17 }
 0x2aa   : > { %v1330_v59 = vmul.f32 %v4807_v15, %v1107_v57 }
 0x2ac   : > { %v3753_v2 = vpop.f32.mrb[12].mxu1 }
 0x2ad   : > { %v4817_v48 = vpop.eup %4292  ;;  %v1333_v16 = vmul.f32 %v3753_v2, %v4813_v0  ;;  %v1117_v21 = vpop.f32.mrb[13].mxu1 }
 0x2ae   : > { %v4820_v22 = vpop.eup %4294  ;;  %v1332_v53 = vmul.f32 %v4815_v13, %v1117_v21  ;;  %v1311_v26 = vmul.f32 %v4817_v48, %v4817_v48 }
 0x2af   : > { %3822 = vmatprep.mubr.f32.mxu0 %v4820_v22  ;;  %v1310_v27 = vmul.f32 %v4820_v22, %v4820_v22 }
 0x2b0   : > { %v3756_v28 = vpop.f32.mrb[14].mxu1  ;;  %v4828_v19 = vsub.f32 1.0, %v1311_v26  ;;  %3823 = vmatmul.mubr.f32.gmra.mrb[38].mxu0 %v4817_v48 }
 0x2b1   : > { %v1127_v30 = vpop.f32.mrb[15].mxu1  ;;  %v4831_v31 = vsub.f32 1.0, %v1310_v27  ;;  %3825 = vmatprep.mubr.f32.mxu0 %v1328_v56 }
 0x2b2   : > { %v1335_v32 = vmul.f32 %v3756_v28, %v4828_v19 }
 0x2b3   : > { %v1334_v33 = vmul.f32 %v4831_v31, %v1127_v30 }
 0x2b4   : > { %3826 = vmatmul.mubr.f32.gmra.mrb[40].mxu0 %v1329_v54 }
 0x2b5   : > { %3828 = vmatprep.mubr.f32.mxu0 %v1330_v59 }
 0x2b8   : > { %3829 = vmatmul.mubr.f32.gmra.mrb[42].mxu0 %v1331_v23  ;;  %v1355_v23 = vmul.f32 2.0, %v4779_v41  ;;  %v1357_v41 = vmul.f32 2.0, %v4795_v36  ;;  %v1359_v36 = vmul.f32 2.0, %v4817_v48  ;;  %v1935_v48 = vld [vmem:[#allocation4 + $0x1e0] sm:$0xff] }
 0x2b9   : > { %3831 = vmatprep.mubr.f32.mxu0 %v1332_v53 }
 0x2bc   : > { %3832 = vmatmul.mubr.f32.gmra.mrb[44].mxu0 %v1333_v16 }
 0x2bd   : > { %3834 = vmatprep.mubr.f32.mxu0 %v1334_v33 }
 0x2bf   : > { %v3759_v35 = vpop.f32.mrb[16].mxu1 }
 0x2c0   : > { %v1345_v37 = vmul.f32 %v3759_v35, %v4787_v6  ;;  %v1137_v38 = vpop.f32.mrb[17].mxu1  ;;  %3835 = vmatmul.mubr.f32.gmra.mrb[46].mxu0 %v1335_v32 }
 0x2c1   : > { %v1344_v40 = vmul.f32 %v4791_v9, %v1137_v38 }
 0x2c3   : > { %v3762_v42 = vpop.f32.mrb[18].mxu1 }
 0x2c4   : > { %v1347_v43 = vmul.f32 %v3762_v42, %v4802_v11  ;;  %v1147_v45 = vpop.f32.mrb[19].mxu1 }
 0x2c5   : > { %v1346_v46 = vmul.f32 %v4807_v15, %v1147_v45 }
 0x2c7   : > { %v3765_v20 = vpop.f32.mrb[20].mxu1 }
 0x2c8   : > { %v4840_v50 = vmul.f32 %v3765_v20, %v4813_v0  ;;  %v1157_v29 = vpop.f32.mrb[21].mxu1 }
 0x2c9   : > { %v4843_v18 = vmul.f32 %v4815_v13, %v1157_v29 }
 0x2cb   : > { %v3768_v34 = vpop.f32.mrb[22].mxu1 }
 0x2cc   : > { %v4846_v51 = vmul.f32 %v3768_v34, %v4828_v19  ;;  %v1167_v55 = vpop.f32.mrb[23].mxu1 }
 0x2cd   : > { %v4849_v60 = vmul.f32 %v4831_v31, %v1167_v55 }
 0x2cf   : > { %v3771_v61 = vpop.f32.mrb[24].mxu1 }
 0x2d0   : > { %v1361_v62 = vmul.f32 %v3771_v61, %v3771_v61  ;;  %v1401_v63 = vmul.f32 %v3771_v61, %v4787_v6  ;;  %v1177_v24 = vpop.f32.mrb[25].mxu1 }
 0x2d1   : > { %v1360_v44 = vmul.f32 %v1177_v24, %v1177_v24  ;;  %v1400_v1 = vmul.f32 %v4791_v9, %v1177_v24  ;;  %v2392_v24 = vld [vmem:[#allocation4 + $0x218] sm:$0xff] }
 0x2d2   : > { %v1369_v4 = vmul.f32 %v1361_v62, %v4787_v6  ;;  %v1354_v6 = vmul.f32 2.0, %v4777_v25  ;;  %v2391_v62 = vld [vmem:[#allocation4 + $0x210] sm:$0xff] }
 0x2d3   : > { %v1368_v7 = vmul.f32 %v1360_v44, %v4791_v9  ;;  %v3774_v8 = vpop.f32.mrb[26].mxu1  ;;  %v4141_v44 = vpack.c.bf16 %v2392_v24, %v2391_v62 }
 0x2d4   : > { %v1377_v49 = vmul.f32 %v1369_v4, %v1353_v3  ;;  %v1363_v54 = vmul.f32 %v3774_v8, %v3774_v8  ;;  %v1403_v10 = vmul.f32 %v3774_v8, %v4802_v11  ;;  %v1187_v56 = vpop.f32.mrb[27].mxu1  ;;  %v2394_v3 = vld [vmem:[#allocation4 + $0x228] sm:$0xff]  ;;  %v2396_v8 = vld [vmem:[#allocation4 + $0x238] sm:$0xff] }
 0x2d5   : > { %v1376_v12 = vmul.f32 %v1368_v7, %v1352_v5  ;;  %v1362_v14 = vmul.f32 %v1187_v56, %v1187_v56  ;;  %v1402_v17 = vmul.f32 %v4807_v15, %v1187_v56  ;;  %v3380_v5 = vld [vmem:[%s5600_s3 + $0x3] ss:$0 sm:$0xff]  ;;  %v2395_v7 = vld [vmem:[#allocation4 + $0x230] sm:$0xff] }
 0x2d6   : > { %v1371_v58 = vmul.f32 %v1363_v54, %v4802_v11  ;;  %v1385_v57 = vsub.f32 %v1345_v37, %v1377_v49  ;;  %v4149_v56 = vpack.c.bf16 %v2396_v8, %v2395_v7 }
 0x2d7   : > { %v1370_v52 = vmul.f32 %v1362_v14, %v4807_v15  ;;  %v3777_v9 = vpop.f32.mrb[28].mxu1  ;;  %v1384_v59 = vsub.f32 %v1344_v40, %v1376_v12  ;;  %v1356_v15 = vmul.f32 2.0, %v4798_v39  ;;  %v2397_v14 = vld [vmem:[#allocation4 + $0x240] sm:$0xff] }
 0x2d8   : > { %v1379_v2 = vmul.f32 %v1371_v58, %v1355_v23  ;;  %v1365_v16 = vmul.f32 %v3777_v9, %v3777_v9  ;;  %v1405_v21 = vmul.f32 %v3777_v9, %v4813_v0  ;;  %v1197_v53 = vpop.f32.mrb[29].mxu1  ;;  %v2399_v58 = vld [vmem:[#allocation4 + $0x250] sm:$0xff] }
 0x2d9   : > { %v1378_v26 = vmul.f32 %v1370_v52, %v1354_v6  ;;  %v1364_v27 = vmul.f32 %v1197_v53, %v1197_v53  ;;  %v1404_v28 = vmul.f32 %v4815_v13, %v1197_v53  ;;  %3837 = vmatprep.mubr.f32.mxu0 %v1384_v59 }
 0x2da   : > { %v1373_v11 = vmul.f32 %v1365_v16, %v4813_v0  ;;  %3838 = vmatmul.mubr.f32.gmra.mrb[48].mxu0 %v1385_v57  ;;  %v1387_v25 = vsub.f32 %v1347_v43, %v1379_v2  ;;  %v2400_v57 = vld [vmem:[#allocation4 + $0x258] sm:$0xff] }
 0x2db   : > { %v1372_v30 = vmul.f32 %v1364_v27, %v4815_v13  ;;  %v3780_v32 = vpop.f32.mrb[30].mxu1  ;;  %v1386_v33 = vsub.f32 %v1346_v46, %v1378_v26  ;;  %v1358_v13 = vmul.f32 2.0, %v4820_v22  ;;  %v1936_v22 = vld [vmem:[#allocation4 + $0x1e8] sm:$0xff]  ;;  %v4885_v2 = vpack.c.bf16 %v2400_v57, %v2399_v58 }
 0x2dc   : > { %v1381_v35 = vmul.f32 %v1373_v11, %v1357_v41  ;;  %v1367_v37 = vmul.f32 %v3780_v32, %v3780_v32  ;;  %v1407_v38 = vmul.f32 %v3780_v32, %v4828_v19  ;;  %v1207_v40 = vpop.f32.mrb[31].mxu1 }
 0x2dd   : > { %v1380_v42 = vmul.f32 %v1372_v30, %v1356_v15  ;;  %v1366_v45 = vmul.f32 %v1207_v40, %v1207_v40  ;;  %v1406_v20 = vmul.f32 %v4831_v31, %v1207_v40  ;;  %3840 = vmatprep.mubr.f32.mxu0 %v1386_v33 }
 0x2de   : > { %v1375_v0 = vmul.f32 %v1367_v37, %v4828_v19  ;;  %3841 = vmatmul.mubr.f32.gmra.mrb[50].mxu0 %v1387_v25  ;;  %v1389_v39 = vsub.f32 %v4840_v50, %v1381_v35  ;;  %v4129_v19 = vpack.c.bf16 %v1936_v22, %v1935_v48  ;;  %v1938_v50 = vld [vmem:[#allocation4 + $0x1f8] sm:$0xff] }
 0x2df   : > { %v1374_v43 = vmul.f32 %v1366_v45, %v4831_v31  ;;  %v1388_v46 = vsub.f32 %v4843_v18, %v1380_v42  ;;  %v1937_v31 = vld [vmem:[#allocation4 + $0x1f0] sm:$0xff] }
 0x2e0   : > { %v1383_v29 = vmul.f32 %v1375_v0, %v1359_v36  ;;  %4130 = vmatprep.subr.bf16.mxu1 %v4129_v19  ;;  %v4133_v18 = vpack.c.bf16 %v1938_v50, %v1937_v31 }
 0x2e1   : > { %v1382_v34 = vmul.f32 %v1374_v43, %v1358_v13  ;;  %3843 = vmatprep.mubr.f32.mxu0 %v1388_v46  ;;  %4132 = vmatpush3.bf16.msra.mxu1 %v4129_v19 }
 0x2e2   : > { %3844 = vmatmul.mubr.f32.gmra.mrb[52].mxu0 %v1389_v39  ;;  %v1391_v55 = vsub.f32 %v4846_v51, %v1383_v29  ;;  %4134 = vmatprep.subr.bf16.mxu1 %v4133_v18  ;;  %v2389_v51 = vld [vmem:[#allocation4 + $0x200] sm:$0xff] }
 0x2e3   : > { %v1390_v61 = vsub.f32 %v4849_v60, %v1382_v34  ;;  %v2390_v60 = vld [vmem:[#allocation4 + $0x208] sm:$0xff] }
 0x2e5   : > { %3846 = vmatprep.mubr.f32.mxu0 %v1390_v61  ;;  %4136 = vmatpush3.bf16.msra.mxu1 %v4133_v18 }
 0x2e6   : > { %3847 = vmatmul.mubr.f32.gmra.mrb[54].mxu0 %v1391_v55 }
 0x2e7   : > { %3849 = vmatprep.mubr.f32.mxu0 %v1400_v1  ;;  %v2393_v1 = vld [vmem:[#allocation4 + $0x220] sm:$0xff] }
 0x2e8   : > { %v4145_v4 = vpack.c.bf16 %v2394_v3, %v2393_v1 }
 0x2ea   : > { %3850 = vmatmul.mubr.f32.gmra.mrb[56].mxu0 %v1401_v63  ;;  %v4137_v63 = vpack.c.bf16 %v2390_v60, %v2389_v51 }
 0x2eb   : > { %3852 = vmatprep.mubr.f32.mxu0 %v1402_v17  ;;  %v2398_v17 = vld [vmem:[#allocation4 + $0x248] sm:$0xff] }
 0x2ec   : > { %4138 = vmatprep.subr.bf16.mxu0 %v4137_v63  ;;  %4169 = vmatprep.subr.bf16.mxu1 %v4137_v63  ;;  %v4882_v23 = vpack.c.bf16 %v2398_v17, %v2397_v14 }
 0x2ed   : > { %4140 = vmatpush3.bf16.msra.mxu0 %v4137_v63 }
 0x2ee   : > { %3853 = vmatmul.mubr.f32.gmra.mrb[58].mxu0 %v1403_v10  ;;  %4142 = vmatprep.subr.bf16.mxu0 %v4141_v44 }
 0x2ef   : > { %3855 = vmatprep.mubr.f32.mxu0 %v1404_v28 }
 0x2f1   : > { %4144 = vmatpush3.bf16.msra.mxu0 %v4141_v44 }
 0x2f2   : > { %3856 = vmatmul.mubr.f32.gmra.mrb[60].mxu0 %v1405_v21  ;;  %4146 = vmatprep.subr.bf16.mxu0 %v4145_v4 }
 0x2f3   : > { %3858 = vmatprep.mubr.f32.mxu0 %v1406_v20 }
 0x2f5   : > { %4148 = vmatpush3.bf16.msra.mxu0 %v4145_v4 }
 0x2f6   : > { %3859 = vmatmul.mubr.f32.gmra.mrb[62].mxu0 %v1407_v38  ;;  %4150 = vmatprep.subr.bf16.mxu0 %v4149_v56 }
 0x2f9   : > { %4152 = vmatpush3.bf16.msra.mxu0 %v4149_v56 }
 0x2fa   : > { %4154 = vmatprep.subr.bf16.mxu0 %v4882_v23 }
 0x2fd   : > { %4156 = vmatpush3.bf16.msra.mxu0 %v4882_v23 }
 0x2fe   : > { %4158 = vmatprep.subr.bf16.mxu0 %v4885_v2 }
 0x301   : > { %4160 = vmatpush3.bf16.msra.mxu0 %v4885_v2 }
 0x36c   : > { %v3815_v49 = vpop.f32.mrb[32].mxu0 }
 0x36d   : > { %v1739_v54 = vadd.f32 %v3815_v49, %v3380_v5  ;;  %v1531_v10 = vpop.f32.mrb[33].mxu0 }
 0x36e   : > { %v1738_v12 = vadd.f32 %v3380_v5, %v1531_v10 }
 0x370   : > { %4296 = vtanh.f32 %v1738_v12 }
 0x371   : > { %4298 = vtanh.f32 %v1739_v54 }
 0x373   : > { %v3818_v6 = vpop.f32.mrb[34].mxu0 }
 0x374   : > { %v1741_v52 = vadd.f32 %v3818_v6, %v3380_v5  ;;  %v1541_v9 = vpop.f32.mrb[35].mxu0 }
 0x375   : > { %v1740_v59 = vadd.f32 %v3380_v5, %v1541_v9 }
 0x377   : > { %4300 = vtanh.f32 %v1740_v59 }
 0x378   : > { %4302 = vtanh.f32 %v1741_v52 }
 0x37a   : > { %v4889_v16 = vpop.eup %4296 }
 0x37b   : > { %v4891_v21 = vpop.eup %4298  ;;  %3893 = vmatprep.mubr.f32.mxu1 %v4889_v16  ;;  %v3821_v53 = vpop.f32.mrb[36].mxu0  ;;  %v1778_v30 = vmul.f32 %v4889_v16, %v4889_v16 }
 0x37c   : > { %v1743_v26 = vadd.f32 %v3821_v53, %v3380_v5  ;;  %3894 = vmatmul.mubr.f32.vlgmr.msra.gmra.mrb[32].mxu1 %v4891_v21  ;;  %v1551_v27 = vpop.f32.mrb[37].mxu0  ;;  %v1779_v25 = vmul.f32 %v4891_v21, %v4891_v21 }
 0x37d   : > { %v1742_v28 = vadd.f32 %v3380_v5, %v1551_v27  ;;  %4177 = vmatpush3.bf16.msra.mxu1 %v4137_v63  ;;  %v4910_v42 = vsub.f32 1.0, %v1778_v30 }
 0x37e   : > { %4304 = vtanh.f32 %v1743_v26  ;;  %4170 = vmatprep.subr.bf16.mxu1 %v4141_v44  ;;  %v4906_v37 = vsub.f32 1.0, %v1779_v25 }
 0x37f   : > { %4306 = vtanh.f32 %v1742_v28 }
 0x381   : > { %v4896_v41 = vpop.eup %4300  ;;  %4178 = vmatpush3.bf16.msra.mxu1 %v4141_v44 }
 0x382   : > { %v4898_v11 = vpop.eup %4302  ;;  %3896 = vmatprep.mubr.f32.mxu1 %v4896_v41  ;;  %4171 = vmatprep.subr.bf16.mxu1 %v4145_v4  ;;  %v1780_v45 = vmul.f32 %v4896_v41, %v4896_v41 }
 0x383   : > { %v3824_v15 = vpop.f32.mrb[38].mxu0  ;;  %3897 = vmatmul.mubr.f32.gmra.mrb[34].mxu1 %v4898_v11  ;;  %v1781_v38 = vmul.f32 %v4898_v11, %v4898_v11 }
 0x384   : > { %v1745_v32 = vadd.f32 %v3824_v15, %v3380_v5  ;;  %v1561_v33 = vpop.f32.mrb[39].mxu0  ;;  %v4927_v34 = vsub.f32 1.0, %v1780_v45 }
 0x385   : > { %v1744_v35 = vadd.f32 %v3380_v5, %v1561_v33  ;;  %4179 = vmatpush3.bf16.msra.mxu1 %v4145_v4  ;;  %v4921_v43 = vsub.f32 1.0, %v1781_v38 }
 0x386   : > { %4308 = vtanh.f32 %v1745_v32  ;;  %4172 = vmatprep.subr.bf16.mxu1 %v4149_v56  ;;  %v1827_v32 = vmul.f32 2.0, %v4891_v21 }
 0x387   : > { %4310 = vtanh.f32 %v1744_v35  ;;  %v3827_v40 = vpop.f32.mrb[40].mxu0  ;;  %v1826_v35 = vmul.f32 2.0, %v4889_v16  ;;  %v1828_v16 = vmul.f32 2.0, %v4896_v41 }
 0x388   : > { %v4914_v20 = vpop.eup %4304  ;;  %v1803_v36 = vmul.f32 %v3827_v40, %v4906_v37  ;;  %v1571_v0 = vpop.f32.mrb[41].mxu0 }
 0x389   : > { %v4917_v39 = vpop.eup %4306  ;;  %v1802_v13 = vmul.f32 %v4910_v42, %v1571_v0  ;;  %4180 = vmatpush3.bf16.msra.mxu1 %v4149_v56  ;;  %v1783_v46 = vmul.f32 %v4914_v20, %v4914_v20 }
 0x38a   : > { %3899 = vmatprep.mubr.f32.mxu1 %v4917_v39  ;;  %4173 = vmatprep.subr.bf16.mxu1 %v4882_v23  ;;  %v1782_v55 = vmul.f32 %v4917_v39, %v4917_v39 }
 0x38b   : > { %v3830_v29 = vpop.f32.mrb[42].mxu0  ;;  %3900 = vmatmul.mubr.f32.gmra.mrb[36].mxu1 %v4914_v20  ;;  %v4934_v19 = vsub.f32 1.0, %v1783_v46 }
 0x38c   : > { %v1805_v61 = vmul.f32 %v3830_v29, %v4921_v43  ;;  %v1581_v48 = vpop.f32.mrb[43].mxu0  ;;  %v4937_v50 = vsub.f32 1.0, %v1782_v55 }
 0x38d   : > { %v1804_v22 = vmul.f32 %v4927_v34, %v1581_v48  ;;  %4181 = vmatpush3.bf16.msra.mxu1 %v4882_v23 }
 0x38e   : > { %4174 = vmatprep.subr.bf16.mxu1 %v4885_v2 }
 0x38f   : > { %v3833_v31 = vpop.f32.mrb[44].mxu0 }
 0x390   : > { %v4939_v18 = vpop.eup %4308  ;;  %v1807_v51 = vmul.f32 %v3833_v31, %v4934_v19  ;;  %v1591_v60 = vpop.f32.mrb[45].mxu0 }
 0x391   : > { %v4942_v62 = vpop.eup %4310  ;;  %v1806_v63 = vmul.f32 %v4937_v50, %v1591_v60  ;;  %v1785_v24 = vmul.f32 %v4939_v18, %v4939_v18  ;;  %4182 = vmatpush3.bf16.msra.mxu1 %v4885_v2 }
 0x392   : > { %3902 = vmatprep.mubr.f32.mxu1 %v4942_v62  ;;  %v1784_v44 = vmul.f32 %v4942_v62, %v4942_v62 }
 0x393   : > { %v3836_v1 = vpop.f32.mrb[46].mxu0  ;;  %v4951_v3 = vsub.f32 1.0, %v1785_v24  ;;  %3903 = vmatmul.mubr.f32.gmra.mrb[38].mxu1 %v4939_v18 }
 0x394   : > { %v1601_v4 = vpop.f32.mrb[47].mxu0  ;;  %v4954_v5 = vsub.f32 1.0, %v1784_v44  ;;  %3905 = vmatprep.mubr.f32.mxu1 %v1802_v13 }
 0x395   : > { %v1809_v7 = vmul.f32 %v3836_v1, %v4951_v3 }
 0x396   : > { %v1808_v8 = vmul.f32 %v4954_v5, %v1601_v4 }
 0x397   : > { %3906 = vmatmul.mubr.f32.gmra.mrb[40].mxu1 %v1803_v36 }
 0x398   : > { %3908 = vmatprep.mubr.f32.mxu1 %v1804_v22 }
 0x39b   : > { %3909 = vmatmul.mubr.f32.gmra.mrb[42].mxu1 %v1805_v61  ;;  %v1829_v61 = vmul.f32 2.0, %v4898_v11  ;;  %v1831_v11 = vmul.f32 2.0, %v4914_v20  ;;  %v1833_v20 = vmul.f32 2.0, %v4939_v18  ;;  %v2401_v18 = vld [vmem:[#allocation4 + $0x260] sm:$0xff] }
 0x39c   : > { %3911 = vmatprep.mubr.f32.mxu1 %v1806_v63 }
 0x39f   : > { %3912 = vmatmul.mubr.f32.gmra.mrb[44].mxu1 %v1807_v51 }
 0x3a0   : > { %3914 = vmatprep.mubr.f32.mxu1 %v1808_v8 }
 0x3a3   : > { %3915 = vmatmul.mubr.f32.gmra.mrb[46].mxu1 %v1809_v7 }
 0x3ad   : > { %v3839_v49 = vpop.f32.mrb[48].mxu0 }
 0x3ae   : > { %v1819_v54 = vmul.f32 %v3839_v49, %v4906_v37  ;;  %v1611_v10 = vpop.f32.mrb[49].mxu0 }
 0x3af   : > { %v1818_v56 = vmul.f32 %v4910_v42, %v1611_v10 }
 0x3b1   : > { %v3842_v12 = vpop.f32.mrb[50].mxu0 }
 0x3b2   : > { %v1821_v14 = vmul.f32 %v3842_v12, %v4921_v43  ;;  %v1621_v17 = vpop.f32.mrb[51].mxu0 }
 0x3b3   : > { %v1820_v23 = vmul.f32 %v4927_v34, %v1621_v17 }
 0x3b5   : > { %v3845_v58 = vpop.f32.mrb[52].mxu0 }
 0x3b6   : > { %v4963_v57 = vmul.f32 %v3845_v58, %v4934_v19  ;;  %v1631_v6 = vpop.f32.mrb[53].mxu0 }
 0x3b7   : > { %v4966_v52 = vmul.f32 %v4937_v50, %v1631_v6 }
 0x3b9   : > { %v3848_v9 = vpop.f32.mrb[54].mxu0 }
 0x3ba   : > { %v4969_v59 = vmul.f32 %v3848_v9, %v4951_v3  ;;  %v1641_v2 = vpop.f32.mrb[55].mxu0 }
 0x3bb   : > { %v4972_v53 = vmul.f32 %v4954_v5, %v1641_v2 }
 0x3bd   : > { %v3851_v26 = vpop.f32.mrb[56].mxu0 }
 0x3be   : > { %v1835_v27 = vmul.f32 %v3851_v26, %v3851_v26  ;;  %v4975_v28 = vmul.f32 %v3851_v26, %v4906_v37  ;;  %v1651_v25 = vpop.f32.mrb[57].mxu0 }
 0x3bf   : > { %v1834_v15 = vmul.f32 %v1651_v25, %v1651_v25  ;;  %v1874_v30 = vmul.f32 %v4910_v42, %v1651_v25 }
 0x3c0   : > { %v1843_v33 = vmul.f32 %v1835_v27, %v4906_v37 }
 0x3c1   : > { %v1842_v38 = vmul.f32 %v1834_v15, %v4910_v42  ;;  %v3854_v40 = vpop.f32.mrb[58].mxu0 }
 0x3c2   : > { %v1851_v45 = vmul.f32 %v1843_v33, %v1827_v32  ;;  %v1837_v36 = vmul.f32 %v3854_v40, %v3854_v40  ;;  %v4983_v0 = vmul.f32 %v3854_v40, %v4921_v43  ;;  %v1661_v13 = vpop.f32.mrb[59].mxu0 }
 0x3c3   : > { %v1850_v46 = vmul.f32 %v1842_v38, %v1826_v35  ;;  %v1836_v29 = vmul.f32 %v1661_v13, %v1661_v13  ;;  %v1876_v55 = vmul.f32 %v4927_v34, %v1661_v13 }
 0x3c4   : > { %v1845_v21 = vmul.f32 %v1837_v36, %v4921_v43  ;;  %v1859_v37 = vsub.f32 %v1819_v54, %v1851_v45 }
 0x3c5   : > { %v1844_v42 = vmul.f32 %v1836_v29, %v4927_v34  ;;  %v3857_v48 = vpop.f32.mrb[60].mxu0  ;;  %v1858_v22 = vsub.f32 %v1818_v56, %v1850_v46  ;;  %v1830_v34 = vmul.f32 2.0, %v4917_v39 }
 0x3c6   : > { %v1853_v31 = vmul.f32 %v1845_v21, %v1829_v61  ;;  %v1839_v51 = vmul.f32 %v3857_v48, %v3857_v48  ;;  %v1879_v60 = vmul.f32 %v3857_v48, %v4934_v19  ;;  %v1671_v63 = vpop.f32.mrb[61].mxu0 }
 0x3c7   : > { %v1852_v24 = vmul.f32 %v1844_v42, %v1828_v16  ;;  %v1838_v44 = vmul.f32 %v1671_v63, %v1671_v63  ;;  %v1878_v1 = vmul.f32 %v4937_v50, %v1671_v63  ;;  %3917 = vmatprep.mubr.f32.mxu1 %v1858_v22 }
 0x3c8   : > { %v1847_v43 = vmul.f32 %v1839_v51, %v4934_v19  ;;  %3918 = vmatmul.mubr.f32.gmra.mrb[48].mxu1 %v1859_v37  ;;  %v1861_v41 = vsub.f32 %v1821_v14, %v1853_v31 }
 0x3c9   : > { %v1846_v4 = vmul.f32 %v1838_v44, %v4937_v50  ;;  %v3860_v7 = vpop.f32.mrb[62].mxu0  ;;  %v1860_v8 = vsub.f32 %v1820_v23, %v1852_v24  ;;  %v1832_v50 = vmul.f32 2.0, %v4942_v62  ;;  %v2403_v62 = vld [vmem:[#allocation4 + $0x270] sm:$0xff] }
 0x3ca   : > { %v1855_v49 = vmul.f32 %v1847_v43, %v1831_v11  ;;  %v1841_v54 = vmul.f32 %v3860_v7, %v3860_v7  ;;  %v1881_v10 = vmul.f32 %v3860_v7, %v4951_v3  ;;  %v1681_v56 = vpop.f32.mrb[63].mxu0 }
 0x3cb   : > { %v1854_v12 = vmul.f32 %v1846_v4, %v1830_v34  ;;  %v1840_v17 = vmul.f32 %v1681_v56, %v1681_v56  ;;  %v1880_v58 = vmul.f32 %v4954_v5, %v1681_v56  ;;  %3920 = vmatprep.mubr.f32.mxu1 %v1860_v8 }
 0x3cc   : > { %v1849_v19 = vmul.f32 %v1841_v54, %v4951_v3  ;;  %3921 = vmatmul.mubr.f32.gmra.mrb[50].mxu1 %v1861_v41  ;;  %v1863_v39 = vsub.f32 %v4963_v57, %v1855_v49  ;;  %v2402_v3 = vld [vmem:[#allocation4 + $0x268] sm:$0xff] }
 0x3cd   : > { %v1848_v14 = vmul.f32 %v1840_v17, %v4954_v5  ;;  %v1862_v23 = vsub.f32 %v4966_v52, %v1854_v12  ;;  %v4161_v27 = vpack.c.bf16 %v2402_v3, %v2401_v18  ;;  %v2404_v5 = vld [vmem:[#allocation4 + $0x278] sm:$0xff]  ;;  %v3382_v52 = vld [vmem:[%s5600_s3 + $0x4] ss:$0 sm:$0xff] }
 0x3ce   : > { %v1857_v6 = vmul.f32 %v1849_v19, %v1833_v20  ;;  %v4165_v57 = vpack.c.bf16 %v2404_v5, %v2403_v62 }
 0x3cf   : > { %v1856_v9 = vmul.f32 %v1848_v14, %v1832_v50  ;;  %3923 = vmatprep.mubr.f32.mxu1 %v1862_v23  ;;  %4162 = vmatprep.subr.bf16.mxu0 %v4161_v27 }
 0x3d0   : > { %3924 = vmatmul.mubr.f32.gmra.mrb[52].mxu1 %v1863_v39  ;;  %v1865_v2 = vsub.f32 %v4969_v59, %v1857_v6  ;;  %4175 = vmatprep.subr.bf16.mxu1 %v4161_v27 }
 0x3d1   : > { %v1864_v26 = vsub.f32 %v4972_v53, %v1856_v9  ;;  %4164 = vmatpush3.bf16.msra.mxu0 %v4161_v27  ;;  %4183 = vmatpush3.bf16.msra.mxu1 %v4161_v27 }
 0x3d2   : > { %4166 = vmatprep.subr.bf16.mxu0 %v4165_v57  ;;  %4176 = vmatprep.subr.bf16.mxu1 %v4165_v57 }
 0x3d3   : > { %3926 = vmatprep.mubr.f32.mxu1 %v1864_v26 }
 0x3d4   : > { %3927 = vmatmul.mubr.f32.gmra.mrb[54].mxu1 %v1865_v2 }
 0x3d5   : > { %3929 = vmatprep.mubr.f32.mxu1 %v1874_v30  ;;  %4168 = vmatpush3.bf16.msra.mxu0 %v4165_v57 }
 0x3d6   : > { %4184 = vmatpush3.bf16.msra.mxu1 %v4165_v57 }
 0x3d8   : > { %3930 = vmatmul.mubr.f32.gmra.mrb[56].mxu1 %v4975_v28 }
 0x3d9   : > { %3932 = vmatprep.mubr.f32.mxu1 %v1876_v55 }
 0x3dc   : > { %3933 = vmatmul.mubr.f32.gmra.mrb[58].mxu1 %v4983_v0 }
 0x3dd   : > { %3935 = vmatprep.mubr.f32.mxu1 %v1878_v1 }
 0x3e0   : > { %3936 = vmatmul.mubr.f32.gmra.mrb[60].mxu1 %v1879_v60 }
 0x3e1   : > { %3938 = vmatprep.mubr.f32.mxu1 %v1880_v58 }
 0x3e4   : > { %3939 = vmatmul.mubr.f32.gmra.mrb[62].mxu1 %v1881_v10 }
 0x44f   : > { %v3895_v59 = vpop.f32.mrb[32].mxu1 }
 0x450   : > { %v2213_v53 = vadd.f32 %v3895_v59, %v3382_v52  ;;  %v2005_v28 = vpop.f32.mrb[33].mxu1 }
 0x451   : > { %v2212_v25 = vadd.f32 %v3382_v52, %v2005_v28 }
 0x453   : > { %4312 = vtanh.f32 %v2212_v25 }
 0x454   : > { %4314 = vtanh.f32 %v2213_v53 }
 0x456   : > { %v3898_v15 = vpop.f32.mrb[34].mxu1 }
 0x457   : > { %v2215_v30 = vadd.f32 %v3898_v15, %v3382_v52  ;;  %v2015_v32 = vpop.f32.mrb[35].mxu1 }
 0x458   : > { %v2214_v33 = vadd.f32 %v3382_v52, %v2015_v32 }
 0x45a   : > { %4316 = vtanh.f32 %v2214_v33 }
 0x45b   : > { %4318 = vtanh.f32 %v2215_v30 }
 0x45d   : > { %v5011_v35 = vpop.eup %4312 }
 0x45e   : > { %v5013_v38 = vpop.eup %4314  ;;  %3973 = vmatprep.mubr.f32.mxu0 %v5011_v35  ;;  %v3901_v40 = vpop.f32.mrb[36].mxu1  ;;  %v2252_v61 = vmul.f32 %v5011_v35, %v5011_v35 }
 0x45f   : > { %v2217_v45 = vadd.f32 %v3901_v40, %v3382_v52  ;;  %3974 = vmatmul.mubr.f32.vlgmr.msra.gmra.mrb[64].mxu0 %v5013_v38  ;;  %v2025_v36 = vpop.f32.mrb[37].mxu1  ;;  %v2253_v29 = vmul.f32 %v5013_v38, %v5013_v38 }
 0x460   : > { %v2216_v0 = vadd.f32 %v3382_v52, %v2025_v36  ;;  %v2260_v31 = vsub.f32 1.0, %v2252_v61 }
 0x461   : > { %4320 = vtanh.f32 %v2217_v45  ;;  %v5027_v42 = vsub.f32 1.0, %v2253_v29  ;;  %v2301_v45 = vmul.f32 2.0, %v5013_v38 }
 0x462   : > { %4322 = vtanh.f32 %v2216_v0  ;;  %v2300_v0 = vmul.f32 2.0, %v5011_v35 }
 0x464   : > { %v5017_v13 = vpop.eup %4316 }
 0x465   : > { %v5019_v46 = vpop.eup %4318  ;;  %3976 = vmatprep.mubr.f32.mxu0 %v5017_v13  ;;  %v2254_v51 = vmul.f32 %v5017_v13, %v5017_v13 }
 0x466   : > { %v3904_v55 = vpop.f32.mrb[38].mxu1  ;;  %3977 = vmatmul.mubr.f32.gmra.mrb[66].mxu0 %v5019_v46  ;;  %v2255_v48 = vmul.f32 %v5019_v46, %v5019_v46 }
 0x467   : > { %v2219_v21 = vadd.f32 %v3904_v55, %v3382_v52  ;;  %v2035_v37 = vpop.f32.mrb[39].mxu1  ;;  %v2262_v41 = vsub.f32 1.0, %v2254_v51 }
 0x468   : > { %v2218_v16 = vadd.f32 %v3382_v52, %v2035_v37  ;;  %v2263_v11 = vsub.f32 1.0, %v2255_v48 }
 0x469   : > { %4324 = vtanh.f32 %v2219_v21 }
 0x46a   : > { %4326 = vtanh.f32 %v2218_v16  ;;  %v3907_v22 = vpop.f32.mrb[40].mxu1 }
 0x46b   : > { %v5033_v60 = vpop.eup %4320  ;;  %v2277_v63 = vmul.f32 %v3907_v22, %v5027_v42  ;;  %v2045_v24 = vpop.f32.mrb[41].mxu1  ;;  %v2303_v22 = vmul.f32 2.0, %v5019_v46 }
 0x46c   : > { %v5036_v44 = vpop.eup %4322  ;;  %v2276_v1 = vmul.f32 %v2260_v31, %v2045_v24  ;;  %v2257_v8 = vmul.f32 %v5033_v60, %v5033_v60  ;;  %v2302_v24 = vmul.f32 2.0, %v5017_v13 }
 0x46d   : > { %3979 = vmatprep.mubr.f32.mxu0 %v5036_v44  ;;  %v2256_v34 = vmul.f32 %v5036_v44, %v5036_v44  ;;  %v2304_v46 = vmul.f32 2.0, %v5036_v44 }
 0x46e   : > { %v3910_v43 = vpop.f32.mrb[42].mxu1  ;;  %3980 = vmatmul.mubr.f32.gmra.mrb[68].mxu0 %v5033_v60  ;;  %v5048_v12 = vsub.f32 1.0, %v2257_v8 }
 0x46f   : > { %v2279_v4 = vmul.f32 %v3910_v43, %v2263_v11  ;;  %v2055_v7 = vpop.f32.mrb[43].mxu1  ;;  %v5044_v10 = vsub.f32 1.0, %v2256_v34 }
 0x470   : > { %v2278_v49 = vmul.f32 %v2262_v41, %v2055_v7  ;;  %v2305_v7 = vmul.f32 2.0, %v5033_v60 }
 0x472   : > { %v3913_v54 = vpop.f32.mrb[44].mxu1 }
 0x473   : > { %v5046_v56 = vpop.eup %4324  ;;  %v2065_v17 = vpop.f32.mrb[45].mxu1  ;;  %v2281_v39 = vmul.f32 %v3913_v54, %v5048_v12 }
 0x474   : > { %v5050_v58 = vpop.eup %4326  ;;  %v2280_v20 = vmul.f32 %v5044_v10, %v2065_v17  ;;  %v2259_v19 = vmul.f32 %v5046_v56, %v5046_v56  ;;  %v2307_v60 = vmul.f32 2.0, %v5046_v56 }
 0x475   : > { %3982 = vmatprep.mubr.f32.mxu0 %v5050_v58  ;;  %v2258_v50 = vmul.f32 %v5050_v58, %v5050_v58 }
 0x476   : > { %v3916_v14 = vpop.f32.mrb[46].mxu1  ;;  %v5059_v23 = vsub.f32 1.0, %v2259_v19  ;;  %3983 = vmatmul.mubr.f32.gmra.mrb[70].mxu0 %v5046_v56  ;;  %3991 = vmatprep.mubr.f32.mxu1 %v2280_v20  ;;  %v3384_v56 = vld [vmem:[%s5600_s3 + $0x5] ss:$0 sm:$0xff] }
 0x477   : > { %v2075_v6 = vpop.f32.mrb[47].mxu1  ;;  %v5062_v9 = vsub.f32 1.0, %v2258_v50  ;;  %3985 = vmatprep.mubr.f32.mxu0 %v2276_v1  ;;  %3992 = vmatmul.mubr.f32.vlgmr.msra.gmra.mrb[64].mxu1 %v2281_v39 }
 0x478   : > { %v2283_v26 = vmul.f32 %v3916_v14, %v5059_v23 }
 0x479   : > { %v2282_v2 = vmul.f32 %v5062_v9, %v2075_v6 }
 0x47a   : > { %3986 = vmatmul.mubr.f32.gmra.mrb[72].mxu0 %v2277_v63 }
 0x47b   : > { %3988 = vmatprep.mubr.f32.mxu0 %v2278_v49  ;;  %3994 = vmatprep.mubr.f32.mxu1 %v2282_v2  ;;  %v2306_v2 = vmul.f32 2.0, %v5050_v58 }
 0x47c   : > { %3995 = vmatmul.mubr.f32.gmra.mrb[66].mxu1 %v2283_v26 }
 0x47e   : > { %3989 = vmatmul.mubr.f32.gmra.mrb[74].mxu0 %v2279_v4 }
 0x49b   : > { %v3919_v18 = vpop.f32.mrb[48].mxu1 }
 0x49c   : > { %v2293_v3 = vmul.f32 %v3919_v18, %v5027_v42  ;;  %v2085_v27 = vpop.f32.mrb[49].mxu1 }
 0x49d   : > { %v2292_v62 = vmul.f32 %v2260_v31, %v2085_v27 }
 0x49f   : > { %v3922_v5 = vpop.f32.mrb[50].mxu1 }
 0x4a0   : > { %v2295_v57 = vmul.f32 %v3922_v5, %v2263_v11  ;;  %v2095_v52 = vpop.f32.mrb[51].mxu1 }
 0x4a1   : > { %v2294_v59 = vmul.f32 %v2262_v41, %v2095_v52 }
 0x4a3   : > { %v3925_v53 = vpop.f32.mrb[52].mxu1 }
 0x4a4   : > { %v2105_v28 = vpop.f32.mrb[53].mxu1  ;;  %v2297_v54 = vmul.f32 %v3925_v53, %v5048_v12 }
 0x4a5   : > { %v2296_v39 = vmul.f32 %v5044_v10, %v2105_v28 }
 0x4a7   : > { %v3928_v25 = vpop.f32.mrb[54].mxu1 }
 0x4a8   : > { %v2115_v15 = vpop.f32.mrb[55].mxu1 }
 0x4a9   : > { %v2298_v27 = vmul.f32 %v5062_v9, %v2115_v15 }
 0x4ab   : > { %v3931_v30 = vpop.f32.mrb[56].mxu1 }
 0x4ac   : > { %v2309_v32 = vmul.f32 %v3931_v30, %v3931_v30  ;;  %v2125_v33 = vpop.f32.mrb[57].mxu1 }
 0x4ad   : > { %v2308_v40 = vmul.f32 %v2125_v33, %v2125_v33 }
 0x4ae   : > { %v2317_v36 = vmul.f32 %v2309_v32, %v5027_v42 }
 0x4af   : > { %v2316_v29 = vmul.f32 %v2308_v40, %v2260_v31  ;;  %v3934_v55 = vpop.f32.mrb[58].mxu1 }
 0x4b0   : > { %v2325_v61 = vmul.f32 %v2317_v36, %v2301_v45  ;;  %v2311_v21 = vmul.f32 %v3934_v55, %v3934_v55  ;;  %v2135_v37 = vpop.f32.mrb[59].mxu1  ;;  %v2752_v36 = vadd.s32 8, %v4564_v47 }
 0x4b1   : > { %v2324_v16 = vmul.f32 %v2316_v29, %v2300_v0  ;;  %v2310_v48 = vmul.f32 %v2135_v37, %v2135_v37 }
 0x4b2   : > { %v2319_v51 = vmul.f32 %v2311_v21, %v2263_v11  ;;  %v2333_v63 = vsub.f32 %v2293_v3, %v2325_v61  ;;  %v2760_v61 = vstv %s3385_s11 }
 0x4b3   : > { %v2318_v1 = vmul.f32 %v2310_v48, %v2262_v41  ;;  %v3937_v43 = vpop.f32.mrb[60].mxu1  ;;  %v2332_v38 = vsub.f32 %v2292_v62, %v2324_v16  ;;  %v2762_v21 = vadd.s32 %v2760_v61, %v2752_v36  ;;  %v2761_v37 = vadd.s32 %v2760_v61, %v4564_v47 }
 0x4b4   : > { %v2327_v34 = vmul.f32 %v2319_v51, %v2303_v22  ;;  %v2313_v42 = vmul.f32 %v3937_v43, %v3937_v43  ;;  %v2145_v4 = vpop.f32.mrb[61].mxu1  ;;  %v2754_v16 = vadd.s32 24, %v4564_v47  ;;  %v2753_v48 = vadd.s32 16, %v4564_v47 }
 0x4b5   : > { %v2326_v35 = vmul.f32 %v2318_v1, %v2302_v24  ;;  %v2312_v31 = vmul.f32 %v2145_v4, %v2145_v4  ;;  %3997 = vmatprep.mubr.f32.mxu1 %v2332_v38  ;;  %v2756_v22 = vadd.s32 40, %v4564_v47  ;;  %vm2770_vm0 = vcmp.lt.s32.totalorder %v2762_v21, 128 }
 0x4b6   : > { %v2321_v8 = vmul.f32 %v2313_v42, %v5048_v12  ;;  %3998 = vmatmul.mubr.f32.gmra.mrb[68].mxu1 %v2333_v63  ;;  %v2335_v49 = vsub.f32 %v2295_v57, %v2327_v34  ;;  %v2299_v12 = vmul.f32 %v3928_v25, %v5059_v23  ;;  %v2755_v63 = vadd.s32 32, %v4564_v47 }
 0x4b7   : > { %v2320_v11 = vmul.f32 %v2312_v31, %v5044_v10  ;;  %v3940_v13 = vpop.f32.mrb[62].mxu1  ;;  %v2334_v41 = vsub.f32 %v2294_v59, %v2326_v35  ;;  %vm2769_vm1 = vcmp.lt.s32.totalorder %v2761_v37, 128  ;;  %v2764_v42 = vadd.s32 %v2760_v61, %v2754_v16 }
 0x4b8   : > { %v2329_v17 = vmul.f32 %v2321_v8, %v2305_v7  ;;  %v2315_v20 = vmul.f32 %v3940_v13, %v3940_v13  ;;  %v2155_v19 = vpop.f32.mrb[63].mxu1  ;;  %v2763_v4 = vadd.s32 %v2760_v61, %v2753_v48  ;;  %v2766_v31 = vadd.s32 %v2760_v61, %v2756_v22 }
 0x4b9   : > { %v2328_v50 = vmul.f32 %v2320_v11, %v2304_v46  ;;  %v2314_v14 = vmul.f32 %v2155_v19, %v2155_v19  ;;  %4000 = vmatprep.mubr.f32.mxu1 %v2334_v41  ;;  %v2765_v8 = vadd.s32 %v2760_v61, %v2755_v63  ;;  %v4430_v46 = vmov 0.0  }
 0x4ba   : > { %v2323_v6 = vmul.f32 %v2315_v20, %v5059_v23  ;;  %4001 = vmatmul.mubr.f32.gmra.mrb[70].mxu1 %v2335_v49  ;;  %v2337_v44 = vsub.f32 %v2297_v54, %v2329_v17  ;;  %v5160_v11 = vsel %vm2770_vm0, 0.0078125, %v4430_v46  ;;  %v2757_v13 = vadd.s32 48, %v4564_v47 }
 0x4bb   : > { %v2322_v26 = vmul.f32 %v2314_v14, %v5062_v9  ;;  %v2336_v18 = vsub.f32 %v2296_v39, %v2328_v50  ;;  %v5169_v17 = vsel %vm2769_vm1, 0.0078125, %v4430_v46  ;;  %v2758_v39 = vadd.s32 56, %v4564_v47 }
 0x4bc   : > { %v2331_v3 = vmul.f32 %v2323_v6, %v2307_v60  ;;  %vm2772_vm2 = vcmp.lt.s32.totalorder %v2764_v42, 128  ;;  %vm2771_vm3 = vcmp.lt.s32.totalorder %v2763_v4, 128  ;;  %vm2774_vm5 = vcmp.lt.s32.totalorder %v2766_v31, 128 }
 0x4bd   : > { %v2330_v10 = vmul.f32 %v2322_v26, %v2306_v2  ;;  %4003 = vmatprep.mubr.f32.mxu1 %v2336_v18  ;;  %vm2773_vm6 = vcmp.lt.s32.totalorder %v2765_v8, 128  ;;  %v2767_v6 = vadd.s32 %v2760_v61, %v2757_v13  ;;  %v5185_v26 = vsel %vm2772_vm2, 0.0078125, %v4430_v46 }
 0x4be   : > { %4004 = vmatmul.mubr.f32.gmra.mrb[72].mxu1 %v2337_v44  ;;  %v2339_v62 = vsub.f32 %v2299_v12, %v2331_v3  ;;  %v5191_v12 = vsel %vm2771_vm3, 0.0078125, %v4430_v46 }
 0x4bf   : > { %v2338_v5 = vsub.f32 %v2298_v27, %v2330_v10  ;;  %v2768_v10 = vadd.s32 %v2760_v61, %v2758_v39  ;;  %vm2775_vm7 = vcmp.lt.s32.totalorder %v2767_v6, 128 }
 0x4c0   : > { %v5211_v61 = vsel %vm2775_vm7, 0.0078125, %v4430_v46 }
 0x4c1   : > { %4006 = vmatprep.mubr.f32.mxu1 %v2338_v5  ;;  %v5198_v5 = vsel %vm2773_vm6, 0.0078125, %v4430_v46  ;;  %vm2776_vm8 = vcmp.lt.s32.totalorder %v2768_v10, 128 }
 0x4c2   : > { %4007 = vmatmul.mubr.f32.gmra.mrb[74].mxu1 %v2339_v62  ;;  %v5217_v22 = vsel %vm2776_vm8, 0.0078125, %v4430_v46 }
 0x532   : > { %v3975_v58 = vpop.f32.mrb[64].mxu0 }
 0x533   : > { %v5087_v57 = vadd.f32 %v3975_v58, %v3384_v56  ;;  %v2471_v52 = vpop.f32.mrb[65].mxu0 }
 0x534   : > { %v5089_v59 = vadd.f32 %v3384_v56, %v2471_v52 }
 0x535   : > { %v5093_v23 = vmul.f32 %v5087_v57, %v5087_v57 }
 0x536   : > { %v5097_v9 = vmul.f32 %v5089_v59, %v5089_v59 }
 0x537   : > { %2672 = vrot.lane.b32.xlu0 %v5093_v23, %s4429_s10 }
 0x538   : > { %2670 = vrot.lane.b32.xlu1 %v5097_v9, %s4429_s10 }
 0x539   : > { %v3978_v53 = vpop.f32.mrb[66].mxu0 }
 0x53a   : > { %v5103_v28 = vadd.f32 %v3978_v53, %v3384_v56  ;;  %v2481_v25 = vpop.f32.mrb[67].mxu0 }
 0x53b   : > { %v5105_v15 = vadd.f32 %v3384_v56, %v2481_v25  ;;  %v5205_v25 = vsel %vm2774_vm5, 0.0078125, %v4430_v46 }
 0x53c   : > { %v5109_v30 = vmul.f32 %v5103_v28, %v5103_v28 }
 0x53d   : > { %v5113_v32 = vmul.f32 %v5105_v15, %v5105_v15 }
 0x53e   : > { %2676 = vrot.lane.b32.xlu0 %v5109_v30, %s4429_s10 }
 0x53f   : > { %2674 = vrot.lane.b32.xlu1 %v5113_v32, %s4429_s10 }
 0x541   : > { %v3981_v33 = vpop.f32.mrb[68].mxu0 }
 0x542   : > { %v5119_v40 = vadd.f32 %v3981_v33, %v3384_v56  ;;  %v2491_v45 = vpop.f32.mrb[69].mxu0 }
 0x543   : > { %v5123_v0 = vadd.f32 %v3384_v56, %v2491_v45 }
 0x544   : > { %v5127_v29 = vmul.f32 %v5119_v40, %v5119_v40 }
 0x545   : > { %v5131_v55 = vmul.f32 %v5123_v0, %v5123_v0 }
 0x546   : > { %2680 = vrot.lane.b32.xlu0 %v5127_v29, %s4429_s10 }
 0x547   : > { %2678 = vrot.lane.b32.xlu1 %v5131_v55, %s4429_s10 }
 0x549   : > { %v3984_v51 = vpop.f32.mrb[70].mxu0 }
 0x54a   : > { %v5142_v24 = vadd.f32 %v3984_v51, %v3384_v56  ;;  %v2501_v1 = vpop.f32.mrb[71].mxu0  ;;  %v5144_v43 = vpop.f32.mrb[64].mxu1 }
 0x54b   : > { %v5146_v38 = vadd.f32 %v3384_v56, %v2501_v1  ;;  %v5148_v34 = vpop.f32.mrb[65].mxu1  ;;  %v2790_v58 = vmul.f32 %v5144_v43, %v5144_v43 }
 0x54c   : > { %v5152_v35 = vmul.f32 %v5142_v24, %v5142_v24  ;;  %v2789_v3 = vmul.f32 %v5148_v34, %v5148_v34 }
 0x54d   : > { %v5156_v7 = vmul.f32 %v5146_v38, %v5146_v38  ;;  %v5158_v49 = vpop.f32.mrb[72].mxu0  ;;  %v2798_v37 = vmul.f32 %v2790_v58, %v5205_v25 }
 0x54e   : > { %v2786_v41 = vmul.f32 %v5158_v49, %v5158_v49  ;;  %2684 = vrot.lane.b32.xlu0 %v5152_v35, %s4429_s10  ;;  %v5167_v54 = vpop.f32.mrb[73].mxu0  ;;  %v2797_v33 = vmul.f32 %v2789_v3, %v5198_v5 }
 0x54f   : > { %v2785_v20 = vmul.f32 %v5167_v54, %v5167_v54  ;;  %2682 = vrot.lane.b32.xlu1 %v5156_v7, %s4429_s10  ;;  %v5175_v19 = vpop.f32.mrb[66].mxu1  ;;  %v2811_v4 = vsel %vm2801_vm4, %v2798_v37, 0.0 }
 0x550   : > { %v2794_v50 = vmul.f32 %v2786_v41, %v5160_v11  ;;  %v5179_v14 = vpop.f32.mrb[67].mxu1  ;;  %v2792_v16 = vmul.f32 %v5175_v19, %v5175_v19  ;;  %v2809_v63 = vsel %vm2801_vm4, %v2797_v33, 0.0 }
 0x551   : > { %v2793_v60 = vmul.f32 %v2785_v20, %v5169_v17  ;;  %v5182_v44 = vpop.f32.mrb[74].mxu0  ;;  %v2791_v45 = vmul.f32 %v5179_v14, %v5179_v14 }
 0x552   : > { %v2803_v2 = vsel %vm2801_vm4, %v2794_v50, 0.0  ;;  %v2788_v47 = vmul.f32 %v5182_v44, %v5182_v44  ;;  %v5189_v18 = vpop.f32.mrb[75].mxu0  ;;  %v2800_v31 = vmul.f32 %v2792_v16, %v5217_v22 }
 0x553   : > { %v2802_v27 = vsel %vm2801_vm4, %v2793_v60, 0.0  ;;  %v2787_v62 = vmul.f32 %v5189_v18, %v5189_v18  ;;  %v2799_v1 = vmul.f32 %v2791_v45, %v5211_v61 }
 0x554   : > { %v2804_v56 = vadd.f32 %v2803_v2, %v2802_v27  ;;  %v2796_v52 = vmul.f32 %v2788_v47, %v5185_v26  ;;  %v2815_v20 = vsel %vm2801_vm4, %v2800_v31, 0.0 }
 0x555   : > { %v2795_v53 = vmul.f32 %v2787_v62, %v5191_v12  ;;  %v2813_v13 = vsel %vm2801_vm4, %v2799_v1, 0.0 }
 0x556   : > { %v2807_v48 = vsel %vm2801_vm4, %v2796_v52, 0.0 }
 0x557   : > { %v2805_v36 = vsel %vm2801_vm4, %v2795_v53, 0.0 }
 0x558   : > { %v2806_v21 = vadd.f32 %v2805_v36, %v2804_v56 }
 0x55a   : > { %v2808_v51 = vadd.f32 %v2807_v48, %v2806_v21 }
 0x55c   : > { %v2810_v42 = vadd.f32 %v2809_v63, %v2808_v51 }
 0x55e   : > { %v2812_v8 = vadd.f32 %v2811_v4, %v2810_v42 }
 0x560   : > { %v2814_v41 = vadd.f32 %v2813_v13, %v2812_v8 }
 0x562   : > { %v5225_v39 = vadd.f32 %v2815_v20, %v2814_v41 }
 0x589   : > { %v5227_v46 = vpop.f32.mrb[68].mxu1 }
 0x58a   : > { %v2829_v50 = vmul.f32 %v5227_v46, %v5227_v46  ;;  %v5231_v60 = vpop.f32.mrb[69].mxu1 }
 0x58b   : > { %v2828_v6 = vmul.f32 %v5231_v60, %v5231_v60 }
 0x58c   : > { %v2837_v2 = vmul.f32 %v2829_v50, %v5160_v11 }
 0x58d   : > { %v2836_v47 = vmul.f32 %v2828_v6, %v5169_v17  ;;  %v5237_v3 = vpop.f32.mrb[70].mxu1 }
 0x58e   : > { %v2845_v27 = vsel %vm2801_vm4, %v2837_v2, 0.0  ;;  %v2831_v10 = vmul.f32 %v5237_v3, %v5237_v3  ;;  %v5242_v62 = vpop.f32.mrb[71].mxu1 }
 0x58f   : > { %v2844_v56 = vsel %vm2801_vm4, %v2836_v47, 0.0  ;;  %v2830_v58 = vmul.f32 %v5242_v62, %v5242_v62 }
 0x590   : > { %v2846_v52 = vadd.f32 %v2845_v27, %v2844_v56  ;;  %v2839_v53 = vmul.f32 %v2831_v10, %v5185_v26 }
 0x591   : > { %v2838_v33 = vmul.f32 %v2830_v58, %v5191_v12  ;;  %v5249_v45 = vpop.f32.mrb[72].mxu1 }
 0x592   : > { %v2833_v36 = vmul.f32 %v5249_v45, %v5249_v45  ;;  %v5253_v21 = vpop.f32.mrb[73].mxu1  ;;  %v2849_v51 = vsel %vm2801_vm4, %v2839_v53, 0.0 }
 0x593   : > { %v2847_v37 = vsel %vm2801_vm4, %v2838_v33, 0.0  ;;  %v2832_v16 = vmul.f32 %v5253_v21, %v5253_v21 }
 0x594   : > { %v2848_v48 = vadd.f32 %v2847_v37, %v2846_v52  ;;  %v2841_v63 = vmul.f32 %v2833_v36, %v5205_v25 }
 0x595   : > { %v2840_v1 = vmul.f32 %v2832_v16, %v5198_v5  ;;  %v5261_v42 = vpop.f32.mrb[74].mxu1 }
 0x596   : > { %v2850_v4 = vadd.f32 %v2849_v51, %v2848_v48  ;;  %v2835_v31 = vmul.f32 %v5261_v42, %v5261_v42  ;;  %v5265_v8 = vpop.f32.mrb[75].mxu1  ;;  %v2853_v50 = vsel %vm2801_vm4, %v2841_v63, 0.0 }
 0x597   : > { %v2851_v13 = vsel %vm2801_vm4, %v2840_v1, 0.0  ;;  %v2834_v41 = vmul.f32 %v5265_v8, %v5265_v8 }
 0x598   : > { %v2852_v20 = vadd.f32 %v2851_v13, %v2850_v4  ;;  %v2843_v6 = vmul.f32 %v2835_v31, %v5217_v22 }
 0x599   : > { %v2842_v2 = vmul.f32 %v2834_v41, %v5211_v61 }
 0x59a   : > { %v2854_v47 = vadd.f32 %v2853_v50, %v2852_v20  ;;  %v2857_v56 = vsel %vm2801_vm4, %v2843_v6, 0.0 }
 0x59b   : > { %v2855_v27 = vsel %vm2801_vm4, %v2842_v2, 0.0 }
 0x59c   : > { %v2856_v10 = vadd.f32 %v2855_v27, %v2854_v47 }
 0x59e   : > { %v5275_v58 = vadd.f32 %v2857_v56, %v2856_v10 }
 0x5a9   : > { %v2673_v52 = vpop.permute.xlu0 %2672 }
 0x5aa   : > { %v2695_v53 = vadd.f32 %v2673_v52, %v5093_v23  ;;  %v2671_v33 = vpop.permute.xlu1 %2670 }
 0x5ab   : > { %v2694_v36 = vadd.f32 %v2671_v33, %v5097_v9 }
 0x5ac   : > { %2709 = vperm.xlu0 %4247, %v2695_v53  }
 0x5ad   : > { %2704 = vperm.xlu1 %4246, %v2694_v36  }
 0x5b0   : > { %v2677_v48 = vpop.permute.xlu0 %2676 }
 0x5b1   : > { %v2675_v37 = vpop.permute.xlu1 %2674  ;;  %v2697_v51 = vadd.f32 %v2677_v48, %v5109_v30 }
 0x5b2   : > { %v2696_v16 = vadd.f32 %v2675_v37, %v5113_v32 }
 0x5b4   : > { %2714 = vperm.xlu1 %4246, %v2696_v16  }
 0x5b8   : > { %v2681_v63 = vpop.permute.xlu0 %2680  ;;  %2719 = vperm.xlu1 %4246, %v2697_v51  }
 0x5b9   : > { %v2699_v1 = vadd.f32 %v2681_v63, %v5127_v29  ;;  %v2679_v4 = vpop.permute.xlu1 %2678 }
 0x5ba   : > { %v2698_v31 = vadd.f32 %v2679_v4, %v5131_v55 }
 0x5bc   : > { %2724 = vperm.xlu0 %4247, %v2698_v31   ;;  %2729 = vperm.xlu1 %4246, %v2699_v1  }
 0x5c0   : > { %v2685_v23 = vpop.permute.xlu0 %2684 }
 0x5c1   : > { %v2701_v9 = vadd.f32 %v2685_v23, %v5152_v35  ;;  %v2683_v13 = vpop.permute.xlu1 %2682 }
 0x5c2   : > { %v2700_v41 = vadd.f32 %v2683_v13, %v5156_v7 }
 0x5c3   : > { %2739 = vperm.xlu1 %4246, %v2701_v9  }
 0x5c4   : > { %2734 = vperm.xlu0 %4247, %v2700_v41  }
 0x5c7   : > { %2996 = vrot.lane.b32.xlu1 %v5227_v46, %s4431_s12 }
 0x5c8   : > { %2994 = vrot.lane.b32.xlu0 %v5231_v60, %s4431_s12 }
 0x5cb   : > { %3000 = vrot.lane.b32.xlu1 %v5237_v3, %s4431_s12 }
 0x5cc   : > { %2998 = vrot.lane.b32.xlu0 %v5242_v62, %s4431_s12 }
 0x5cf   : > { %3002 = vrot.lane.b32.xlu1 %v5253_v21, %s4431_s12 }
 0x5d3   : > { %3004 = vrot.lane.b32.xlu1 %v5249_v45, %s4431_s12 }
 0x5d7   : > { %3006 = vrot.lane.b32.xlu1 %v5265_v8, %s4431_s12 }
 0x62b   : > { %v2710_v30 = vpop.permute.xlu0 %2709 }
 0x62c   : > { %v5300_v32 = vmul.f32 %v2710_v30, %v5087_v57  ;;  %v2705_v29 = vpop.permute.xlu1 %2704 }
 0x62d   : > { %v5303_v55 = vmul.f32 %v2705_v29, %v5089_v59 }
 0x62e   : > { %v2871_v35 = vmul.f32 %v5300_v32, %v5300_v32  ;;  %v2913_v7 = vmul.f32 %v5227_v46, %v5300_v32  ;;  %3138 = vrot.lane.b32.xlu0 %v5300_v32, %s4431_s12 }
 0x62f   : > { %v2870_v20 = vmul.f32 %v5303_v55, %v5303_v55  ;;  %v2912_v57 = vmul.f32 %v5303_v55, %v5231_v60  ;;  %3136 = vrot.lane.b32.xlu1 %v5303_v55, %s4431_s12 }
 0x630   : > { %v2879_v59 = vmul.f32 %v2871_v35, %v5160_v11  ;;  %v2921_v50 = vmul.f32 %v2913_v7, %v5160_v11 }
 0x631   : > { %v2878_v6 = vmul.f32 %v2870_v20, %v5169_v17  ;;  %v2920_v2 = vmul.f32 %v2912_v57, %v5169_v17 }
 0x632   : > { %v2887_v47 = vsel %vm2801_vm4, %v2879_v59, 0.0  ;;  %v2929_v27 = vsel %vm2801_vm4, %v2921_v50, 0.0  ;;  %2962 = vrot.lane.b32.xlu0 %v5231_v60, %s4429_s10 }
 0x633   : > { %v2886_v10 = vsel %vm2801_vm4, %v2878_v6, 0.0  ;;  %v2928_v56 = vsel %vm2801_vm4, %v2920_v2, 0.0  ;;  %3008 = vrot.lane.b32.xlu1 %v5261_v42, %s4431_s12  ;;  %v2715_v52 = vpop.permute.xlu1 %2714 }
 0x634   : > { %v2888_v53 = vadd.f32 %v2887_v47, %v2886_v10  ;;  %v2930_v33 = vadd.f32 %v2929_v27, %v2928_v56  ;;  %v5330_v36 = vmul.f32 %v2715_v52, %v5105_v15 }
 0x636   : > { %v2872_v37 = vmul.f32 %v5330_v36, %v5330_v36  ;;  %v2914_v16 = vmul.f32 %v5330_v36, %v5242_v62 }
 0x637   : > { %2964 = vrot.lane.b32.xlu1 %v5227_v46, %s4429_s10  ;;  %v2720_v60 = vpop.permute.xlu1 %2719 }
 0x638   : > { %v2880_v48 = vmul.f32 %v2872_v37, %v5191_v12  ;;  %v2922_v51 = vmul.f32 %v2914_v16, %v5191_v12  ;;  %v5341_v63 = vmul.f32 %v2720_v60, %v5103_v28 }
 0x63a   : > { %v2889_v15 = vsel %vm2801_vm4, %v2880_v48, 0.0  ;;  %v2931_v1 = vsel %vm2801_vm4, %v2922_v51, 0.0  ;;  %v2873_v4 = vmul.f32 %v5341_v63, %v5341_v63  ;;  %v2915_v31 = vmul.f32 %v5237_v3, %v5341_v63  ;;  %3142 = vrot.lane.b32.xlu0 %v5341_v63, %s4431_s12 }
 0x63b   : > { %v2890_v46 = vadd.f32 %v2889_v15, %v2888_v53  ;;  %v2932_v23 = vadd.f32 %v2931_v1, %v2930_v33  ;;  %v2725_v9 = vpop.permute.xlu0 %2724  ;;  %v2730_v13 = vpop.permute.xlu1 %2729 }
 0x63c   : > { %v2881_v28 = vmul.f32 %v2873_v4, %v5185_v26  ;;  %v2923_v41 = vmul.f32 %v2915_v31, %v5185_v26  ;;  %v5354_v30 = vmul.f32 %v2725_v9, %v5123_v0  ;;  %v5357_v29 = vmul.f32 %v2730_v13, %v5119_v40 }
 0x63e   : > { %v2891_v35 = vsel %vm2801_vm4, %v2881_v28, 0.0  ;;  %v2933_v7 = vsel %vm2801_vm4, %v2923_v41, 0.0  ;;  %v2874_v20 = vmul.f32 %v5354_v30, %v5354_v30  ;;  %v2916_v57 = vmul.f32 %v5354_v30, %v5253_v21  ;;  %3140 = vrot.lane.b32.xlu0 %v5330_v36, %s4431_s12 }
 0x63f   : > { %v2892_v59 = vadd.f32 %v2891_v35, %v2890_v46  ;;  %v2934_v50 = vadd.f32 %v2933_v7, %v2932_v23  ;;  %v2875_v0 = vmul.f32 %v5357_v29, %v5357_v29  ;;  %v2917_v40 = vmul.f32 %v5249_v45, %v5357_v29 }
 0x640   : > { %v2882_v6 = vmul.f32 %v2874_v20, %v5198_v5  ;;  %v2924_v2 = vmul.f32 %v2916_v57, %v5198_v5 }
 0x641   : > { %v2883_v47 = vmul.f32 %v2875_v0, %v5205_v25  ;;  %v2925_v27 = vmul.f32 %v2917_v40, %v5205_v25 }
 0x642   : > { %v2893_v10 = vsel %vm2801_vm4, %v2882_v6, 0.0  ;;  %v2935_v56 = vsel %vm2801_vm4, %v2924_v2, 0.0  ;;  %v2740_v52 = vpop.permute.xlu1 %2739  ;;  %3146 = vrot.lane.b32.xlu0 %v5357_v29, %s4431_s12 }
 0x643   : > { %v2894_v53 = vadd.f32 %v2893_v10, %v2892_v59  ;;  %v2936_v33 = vadd.f32 %v2935_v56, %v2934_v50  ;;  %v2735_v37 = vpop.permute.xlu0 %2734  ;;  %v2895_v16 = vsel %vm2801_vm4, %v2883_v47, 0.0  ;;  %v2937_v60 = vsel %vm2801_vm4, %v2925_v27, 0.0 }
 0x644   : > { %v5382_v48 = vmul.f32 %v2740_v52, %v5142_v24  ;;  %v2748_v51 = vmul.f32 %v2735_v37, %v5146_v38 }
 0x645   : > { %v5385_v15 = vadd.f32 %v2895_v16, %v2894_v53  ;;  %v2938_v1 = vadd.f32 %v2937_v60, %v2936_v33  ;;  %v2859_v16 = vrot.slane %v5275_v58, 4 }
 0x646   : > { %v2919_v4 = vmul.f32 %v5261_v42, %v5382_v48  ;;  %v2918_v31 = vmul.f32 %v2748_v51, %v5265_v8  ;;  %3150 = vrot.lane.b32.xlu1 %v5382_v48, %s4431_s12  ;;  %3144 = vrot.lane.b32.xlu0 %v5354_v30, %s4431_s12  ;;  %v2997_v13 = vpop.permute.xlu1 %2996 }
 0x647   : > { %v2995_v46 = vpop.permute.xlu0 %2994  ;;  %v3019_v20 = vmul.f32 %v5158_v49, %v2997_v13 }
 0x648   : > { %v2927_v24 = vmul.f32 %v2919_v4, %v5217_v22  ;;  %v2926_v23 = vmul.f32 %v2918_v31, %v5211_v61  ;;  %v3018_v38 = vmul.f32 %v2995_v46, %v5167_v54  ;;  %v2860_v31 = vadd.f32 %v2859_v16, %v5275_v58 }
 0x649   : > { %v2817_v46 = vrot.slane %v5225_v39, 4 }
 0x64a   : > { %v2939_v9 = vsel %vm2801_vm4, %v2926_v23, 0.0  ;;  %3148 = vrot.lane.b32.xlu0 %v2748_v51, %s4431_s12  ;;  %3034 = vrot.lane.b32.xlu1 %v3018_v38, %s4429_s10  ;;  %v2941_v41 = vsel %vm2801_vm4, %v2927_v24, 0.0  ;;  %v3001_v7 = vpop.permute.xlu1 %3000  ;;  %v2861_v38 = vrot.slane %v2860_v31, 2 }
 0x64b   : > { %v2940_v28 = vadd.f32 %v2939_v9, %v2938_v1  ;;  %v2999_v57 = vpop.permute.xlu0 %2998  ;;  %v2818_v9 = vadd.f32 %v2817_v46, %v5225_v39 }
 0x64d   : > { %v5401_v35 = vadd.f32 %v2941_v41, %v2940_v28  ;;  %v2819_v58 = vrot.slane %v2818_v9, 2 }
 0x64e   : > { %2966 = vrot.lane.b32.xlu0 %v5242_v62, %s4429_s10  ;;  %3104 = vrot.lane.b32.xlu1 %v5303_v55, %s4429_s10  ;;  %v3003_v59 = vpop.permute.xlu1 %3002  ;;  %v3021_v62 = vmul.f32 %v5182_v44, %v3001_v7  ;;  %v3020_v55 = vmul.f32 %v2999_v57, %v5189_v18 }
 0x64f   : > { %v3022_v0 = vmul.f32 %v3003_v59, %v5148_v34  ;;  %v2943_v28 = vrot.slane %v5401_v35, 4  ;;  %v2820_v39 = vadd.f32 %v2819_v58, %v2818_v9 }
 0x652   : > { %3036 = vrot.lane.b32.xlu0 %v3019_v20, %s4429_s10  ;;  %2968 = vrot.lane.b32.xlu1 %v5237_v3, %s4429_s10  ;;  %v3005_v50 = vpop.permute.xlu1 %3004  ;;  %v2862_v20 = vadd.f32 %v2861_v38, %v2860_v31 }
 0x653   : > { %v3023_v3 = vmul.f32 %v5144_v43, %v3005_v50 }
 0x656   : > { %3106 = vrot.lane.b32.xlu0 %v5300_v32, %s4429_s10  ;;  %3108 = vrot.lane.b32.xlu1 %v5330_v36, %s4429_s10  ;;  %v3007_v32 = vpop.permute.xlu1 %3006 }
 0x657   : > { %v3024_v36 = vmul.f32 %v3007_v32, %v5179_v14 }
 0x65a   : > { %3038 = vrot.lane.b32.xlu0 %v3020_v55, %s4429_s10  ;;  %3040 = vrot.lane.b32.xlu1 %v3021_v62, %s4429_s10  ;;  %v2944_v62 = vadd.f32 %v2943_v28, %v5401_v35  ;;  %v2821_v35 = vrot.slane %v2820_v39, 1 }
 0x65e   : > { %2970 = vrot.lane.b32.xlu0 %v5253_v21, %s4429_s10  ;;  %3042 = vrot.lane.b32.xlu1 %v3022_v0, %s4429_s10  ;;  %v2876_v21 = vmul.f32 %v2748_v51, %v2748_v51  ;;  %v2863_v0 = vrot.slane %v2862_v20, 1 }
 0x660   : > { %v2884_v2 = vmul.f32 %v2876_v21, %v5211_v61 }
 0x662   : > { %3110 = vrot.lane.b32.xlu0 %v5341_v63, %s4429_s10  ;;  %3044 = vrot.lane.b32.xlu1 %v3023_v3, %s4429_s10  ;;  %v2897_v47 = vsel %vm2801_vm4, %v2884_v2, 0.0 }
 0x663   : > { %v2898_v53 = vadd.f32 %v2897_v47, %v5385_v15 }
 0x666   : > { %2972 = vrot.lane.b32.xlu0 %v5249_v45, %s4429_s10  ;;  %3046 = vrot.lane.b32.xlu1 %v3024_v36, %s4429_s10  ;;  %v2945_v36 = vrot.slane %v2944_v62, 2 }
 0x66a   : > { %3112 = vrot.lane.b32.xlu0 %v5354_v30, %s4429_s10 }
 0x66e   : > { %2974 = vrot.lane.b32.xlu0 %v5265_v8, %s4429_s10  ;;  %v2877_v8 = vmul.f32 %v5382_v48, %v5382_v48 }
 0x670   : > { %v2885_v27 = vmul.f32 %v2877_v8, %v5217_v22 }
 0x672   : > { %3114 = vrot.lane.b32.xlu0 %v5357_v29, %s4429_s10  ;;  %v2899_v60 = vsel %vm2801_vm4, %v2885_v27, 0.0 }
 0x673   : > { %v2900_v1 = vadd.f32 %v2899_v60, %v2898_v53 }
 0x675   : > { %v2901_v15 = vrot.slane %v2900_v1, 4 }
 0x676   : > { %2976 = vrot.lane.b32.xlu0 %v5261_v42, %s4429_s10 }
 0x677   : > { %v2902_v13 = vadd.f32 %v2901_v15, %v2900_v1 }
 0x679   : > { %v2903_v59 = vrot.slane %v2902_v13, 2 }
 0x67b   : > { %v2904_v32 = vadd.f32 %v2903_v59, %v2902_v13 }
 0x67d   : > { %v2905_v2 = vrot.slane %v2904_v32, 1 }
 0x6a0   : > { %v3139_v63 = vpop.permute.xlu0 %3138 }
 0x6a1   : > { %v3161_v40 = vmul.f32 %v5158_v49, %v3139_v63  ;;  %v3137_v6 = vpop.permute.xlu1 %3136 }
 0x6a2   : > { %v3160_v45 = vmul.f32 %v3137_v6, %v5167_v54 }
 0x6a3   : > { %3178 = vrot.lane.b32.xlu1 %v3161_v40, %s4429_s10  ;;  %v5475_v40 = vadd.f32 %v2863_v0, %v2862_v20 }
 0x6a4   : > { %v2963_v30 = vpop.permute.xlu0 %2962  ;;  %3176 = vrot.lane.b32.xlu0 %v3160_v45, %s4429_s10 }
 0x6a5   : > { %v2986_v29 = vmul.f32 %v2963_v30, %v5167_v54  ;;  %v3009_v42 = vpop.permute.xlu1 %3008  ;;  %v2946_v30 = vadd.f32 %v2945_v36, %v2944_v62 }
 0x6a6   : > { %v3025_v56 = vmul.f32 %v5175_v19, %v3009_v42  ;;  %v5481_v42 = vadd.f32 %v2821_v35, %v2820_v39 }
 0x6a8   : > { %3116 = vrot.lane.b32.xlu0 %v2748_v51, %s4429_s10 }
 0x6a9   : > { %v2965_v10 = vpop.permute.xlu1 %2964 }
 0x6aa   : > { %v2987_v52 = vmul.f32 %v5158_v49, %v2965_v10  ;;  %v5484_v10 = vadd.f32 %v2905_v2, %v2904_v32 }
 0x6ac   : > { %3048 = vrot.lane.b32.xlu0 %v3025_v56, %s4429_s10  ;;  %v3143_v33 = vpop.permute.xlu0 %3142  ;;  %v2947_v56 = vrot.slane %v2946_v30, 1 }
 0x6ad   : > { %v3163_v37 = vmul.f32 %v5182_v44, %v3143_v33 }
 0x6ae   : > { %v5493_v60 = vadd.f32 %v2947_v56, %v2946_v30 }
 0x6af   : > { %3182 = vrot.lane.b32.xlu1 %v3163_v37, %s4429_s10 }
 0x6b0   : > { %v3141_v51 = vpop.permute.xlu0 %3140 }
 0x6b1   : > { %v3162_v4 = vmul.f32 %v3141_v51, %v5189_v18 }
 0x6b3   : > { %3180 = vrot.lane.b32.xlu1 %v3162_v4, %s4429_s10 }
 0x6b4   : > { %v3147_v24 = vpop.permute.xlu0 %3146 }
 0x6b5   : > { %v3165_v23 = vmul.f32 %v5144_v43, %v3147_v24 }
 0x6b7   : > { %3186 = vrot.lane.b32.xlu1 %v3165_v23, %s4429_s10 }
 0x6b8   : > { %v3151_v41 = vpop.permute.xlu1 %3150  ;;  %v3145_v7 = vpop.permute.xlu0 %3144 }
 0x6b9   : > { %v3164_v57 = vmul.f32 %v3145_v7, %v5148_v34  ;;  %v3167_v6 = vmul.f32 %v5175_v19, %v3151_v41 }
 0x6bb   : > { %3184 = vrot.lane.b32.xlu1 %v3164_v57, %s4429_s10 }
 0x6bc   : > { %v3149_v55 = vpop.permute.xlu0 %3148  ;;  %v3035_v50 = vpop.permute.xlu1 %3034 }
 0x6bd   : > { %v3166_v3 = vmul.f32 %v3149_v55, %v5179_v14  ;;  %v3058_v45 = vsub.f32 %v2986_v29, %v3035_v50 }
 0x6bf   : > { %3118 = vrot.lane.b32.xlu1 %v5382_v48, %s4429_s10  ;;  %3188 = vrot.lane.b32.xlu0 %v3166_v3, %s4429_s10  ;;  %v3066_v47 = vmul.f32 %v3058_v45, %v5169_v17 }
 0x6c0   : > { %v2967_v21 = vpop.permute.xlu0 %2966  ;;  %v5473_v63 = vpop.permute.xlu1 %3104 }
 0x6c1   : > { %v3075_v37 = vsel %vm3074_vm9, %v3066_v47, 0.0  ;;  %v2988_v1 = vmul.f32 %v2967_v21, %v5189_v18 }
 0x6c3   : > { %3190 = vrot.lane.b32.xlu1 %v3167_v6, %s4429_s10  ;;  %2866 = vrot.lane.b32.xlu0 %v5475_v40, %s4429_s10 }
 0x6c4   : > { %v3037_v8 = vpop.permute.xlu0 %3036  ;;  %v2969_v48 = vpop.permute.xlu1 %2968 }
 0x6c5   : > { %v3059_v27 = vsub.f32 %v2987_v52, %v3037_v8  ;;  %v2989_v51 = vmul.f32 %v5182_v44, %v2969_v48 }
 0x6c7   : > { %v3067_v29 = vmul.f32 %v3059_v27, %v5160_v11  ;;  %2824 = vrot.lane.b32.xlu1 %v5481_v42, %s4429_s10  ;;  %2908 = vrot.lane.b32.xlu0 %v5484_v10, %s4429_s10 }
 0x6c8   : > { %v3107_v53 = vpop.permute.xlu0 %3106  ;;  %v3109_v33 = vpop.permute.xlu1 %3108 }
 0x6c9   : > { %v3076_v16 = vsel %vm3074_vm9, %v3067_v29, 0.0  ;;  %v3129_v29 = vmul.f32 %v5158_v49, %v3107_v53 }
 0x6ca   : > { %v3077_v52 = vadd.f32 %v3076_v16, %v3075_v37  ;;  %v3128_v37 = vmul.f32 %v5473_v63, %v5167_v54 }
 0x6cb   : > { %2950 = vrot.lane.b32.xlu1 %v5493_v60, %s4429_s10  ;;  %s4360_s10 = sshll.u32 %s4432_s22, 4  ;;  %s4361_s10 = int_to_ptr.vmem [resolvable:$false] %s4360_s10 }
 0x6cc   : > { %v3039_v4 = vpop.permute.xlu0 %3038  ;;  %v3041_v31 = vpop.permute.xlu1 %3040  ;;  %s4362_s11 = scalar_lea.vmem %s4361_s10, 32  ;;  %p4363_p2 = scmp.lt.s32.totalorder %s5557_s26, %s4361_s10 }
 0x6cd   : > { %v3060_v46 = vsub.f32 %v2988_v1, %v3039_v4  ;;  %v3061_v15 = vsub.f32 %v2989_v51, %v3041_v31  ;;  %p4364_p3 = scmp.lt.s32.totalorder %s4362_s11, %s4356_s30 }
 0x6cf   : > { %v3068_v24 = vmul.f32 %v3060_v46, %v5191_v12  ;;  %v3069_v23 = vmul.f32 %v3061_v15, %v5185_v26  ;;  %p4365_p4 = por %p4364_p3, %p4363_p2 }
 0x6d0   : > { %v2971_v38 = vpop.permute.xlu0 %2970  ;;  %v3043_v41 = vpop.permute.xlu1 %3042 }
 0x6d1   : > { %v3078_v9 = vsel %vm3074_vm9, %v3068_v24, 0.0  ;;  %v2990_v13 = vmul.f32 %v2971_v38, %v5148_v34  ;;  %v3080_v7 = vsel %vm3074_vm9, %v3069_v23, 0.0  ;;  %p4366_p7 = pnand %p4365_p4, %p4359_p12 }
 0x6d2   : > { %v3079_v28 = vadd.f32 %v3078_v9, %v3077_v52 }
 0x6d3   : > { %v3062_v20 = vsub.f32 %v2990_v13, %v3043_v41 }
 0x6d4   : > { %v3081_v58 = vadd.f32 %v3080_v7, %v3079_v28  ;;  %v3111_v57 = vpop.permute.xlu0 %3110  ;;  %v3045_v39 = vpop.permute.xlu1 %3044 }
 0x6d5   : > { %v3070_v59 = vmul.f32 %v3062_v20, %v5198_v5  ;;  %v3131_v9 = vmul.f32 %v5182_v44, %v3111_v57 }
 0x6d7   : > { %v3082_v62 = vsel %vm3074_vm9, %v3070_v59, 0.0 }
 0x6d8   : > { %v3083_v55 = vadd.f32 %v3082_v62, %v3081_v58  ;;  %v2973_v50 = vpop.permute.xlu0 %2972  ;;  %v3047_v2 = vpop.permute.xlu1 %3046 }
 0x6d9   : > { %v2991_v0 = vmul.f32 %v5144_v43, %v2973_v50 }
 0x6db   : > { %v3063_v3 = vsub.f32 %v2991_v0, %v3045_v39 }
 0x6dc   : > { %v3113_v32 = vpop.permute.xlu0 %3112 }
 0x6dd   : > { %v3071_v36 = vmul.f32 %v3063_v3, %v5205_v25  ;;  %v3132_v57 = vmul.f32 %v3113_v32, %v5148_v34 }
 0x6df   : > { %v3084_v21 = vsel %vm3074_vm9, %v3071_v36, 0.0 }
 0x6e0   : > { %v3085_v35 = vadd.f32 %v3084_v21, %v3083_v55  ;;  %v2975_v6 = vpop.permute.xlu0 %2974 }
 0x6e1   : > { %v2992_v45 = vmul.f32 %v2975_v6, %v5179_v14 }
 0x6e3   : > { %v3064_v30 = vsub.f32 %v2992_v45, %v3047_v2 }
 0x6e4   : > { %v3115_v27 = vpop.permute.xlu0 %3114 }
 0x6e5   : > { %v3072_v8 = vmul.f32 %v3064_v30, %v5211_v61  ;;  %v3133_v55 = vmul.f32 %v5144_v43, %v3115_v27 }
 0x6e7   : > { %v3086_v48 = vsel %vm3074_vm9, %v3072_v8, 0.0 }
 0x6e8   : > { %v3087_v47 = vadd.f32 %v3086_v48, %v3085_v35  ;;  %v2977_v56 = vpop.permute.xlu0 %2976 }
 0x6e9   : > { %v2993_v38 = vmul.f32 %v5175_v19, %v2977_v56 }
 0x715   : > { %v3179_v16 = vpop.permute.xlu1 %3178 }
 0x716   : > { %v3201_v52 = vsub.f32 %v3129_v29, %v3179_v16  ;;  %v3177_v1 = vpop.permute.xlu0 %3176 }
 0x717   : > { %v3200_v51 = vsub.f32 %v3128_v37, %v3177_v1 }
 0x718   : > { %v3209_v4 = vmul.f32 %v3201_v52, %v5160_v11  ;;  %v3130_v11 = vmul.f32 %v3109_v33, %v5189_v18 }
 0x719   : > { %v3208_v31 = vmul.f32 %v3200_v51, %v5169_v17 }
 0x71a   : > { %v3217_v46 = vsel %vm3074_vm9, %v3209_v4, 0.0  ;;  %v3117_v15 = vpop.permute.xlu0 %3116 }
 0x71b   : > { %v3216_v24 = vsel %vm3074_vm9, %v3208_v31, 0.0 }
 0x71c   : > { %v3218_v23 = vadd.f32 %v3217_v46, %v3216_v24 }
 0x71e   : > { %v3049_v49 = vpop.permute.xlu0 %3048 }
 0x71f   : > { %v3065_v53 = vsub.f32 %v2993_v38, %v3049_v49 }
 0x721   : > { %v3073_v54 = vmul.f32 %v3065_v53, %v5217_v22  ;;  %v3183_v63 = vpop.permute.xlu1 %3182 }
 0x722   : > { %v3203_v28 = vsub.f32 %v3131_v9, %v3183_v63 }
 0x723   : > { %v3088_v13 = vsel %vm3074_vm9, %v3073_v54, 0.0  ;;  %v3237_v54 = vld [vmem:[%s5601_s4] sm:$0x1] }
 0x724   : > { %v3089_v17 = vadd.f32 %v3088_v13, %v3087_v47  ;;  %v3211_v20 = vmul.f32 %v3203_v28, %v5185_v26  ;;  %v3134_v26 = vmul.f32 %v3117_v15, %v5179_v14  ;;  %v3252_v9 = vmul.f32 %v3237_v54, %v3237_v54 }
 0x725   : > { %v3181_v41 = vpop.permute.xlu1 %3180 }
 0x726   : > { %v3202_v7 = vsub.f32 %v3130_v11, %v3181_v41  ;;  %v3090_v50 = vrot.slane %v3089_v17, 4  ;;  %v3221_v44 = vsel %vm3074_vm9, %v3211_v20, 0.0 }
 0x728   : > { %v3210_v58 = vmul.f32 %v3202_v7, %v5191_v12  ;;  %v3091_v3 = vadd.f32 %v3090_v50, %v3089_v17  ;;  %v3268_v7 = vmul.f32 2.0, %v3237_v54 }
 0x729   : > { %v3187_v59 = vpop.permute.xlu1 %3186 }
 0x72a   : > { %v3219_v62 = vsel %vm3074_vm9, %v3210_v58, 0.0  ;;  %v3205_v18 = vsub.f32 %v3133_v55, %v3187_v59  ;;  %v3092_v2 = vrot.slane %v3091_v3, 2 }
 0x72b   : > { %v3220_v0 = vadd.f32 %v3219_v62, %v3218_v23 }
 0x72c   : > { %v3213_v12 = vmul.f32 %v3205_v18, %v5205_v25  ;;  %v3093_v56 = vadd.f32 %v3092_v2, %v3091_v3 }
 0x72d   : > { %v3222_v33 = vadd.f32 %v3221_v44, %v3220_v0  ;;  %v3185_v39 = vpop.permute.xlu1 %3184 }
 0x72e   : > { %v3204_v36 = vsub.f32 %v3132_v57, %v3185_v39  ;;  %v3225_v34 = vsel %vm3074_vm9, %v3213_v12, 0.0  ;;  %v3094_v51 = vrot.slane %v3093_v56, 1 }
 0x730   : > { %v3212_v21 = vmul.f32 %v3204_v36, %v5198_v5  ;;  %v3095_v46 = vadd.f32 %v3094_v51, %v3093_v56 }
 0x731   : > { %v3189_v35 = vpop.permute.xlu0 %3188  ;;  %v3119_v6 = vpop.permute.xlu1 %3118 }
 0x732   : > { %v3223_v43 = vsel %vm3074_vm9, %v3212_v21, 0.0  ;;  %v3206_v45 = vsub.f32 %v3134_v26, %v3189_v35  ;;  %v3135_v8 = vmul.f32 %v5175_v19, %v3119_v6 }
 0x733   : > { %v3224_v30 = vadd.f32 %v3223_v43, %v3222_v33 }
 0x734   : > { %v3214_v32 = vmul.f32 %v3206_v45, %v5211_v61 }
 0x735   : > { %v3226_v48 = vadd.f32 %v3225_v34, %v3224_v30  ;;  %v3191_v47 = vpop.permute.xlu1 %3190  ;;  %v2867_v14 = vpop.permute.xlu0 %2866 }
 0x736   : > { %v3227_v25 = vsel %vm3074_vm9, %v3214_v32, 0.0  ;;  %v3207_v27 = vsub.f32 %v3135_v8, %v3191_v47  ;;  %v2869_v5 = vadd.f32 %v2867_v14, %v5475_v40 }
 0x737   : > { %v3228_v29 = vadd.f32 %v3227_v25, %v3226_v48 }
 0x738   : > { %v3215_v37 = vmul.f32 %v3207_v27, %v5217_v22  ;;  %3242 = vperm.xlu0 %4247, %v2869_v5  }
 0x739   : > { %v2825_v16 = vpop.permute.xlu1 %2824  ;;  %v2909_v52 = vpop.permute.xlu0 %2908 }
 0x73a   : > { %v3229_v1 = vsel %vm3074_vm9, %v3215_v37, 0.0  ;;  %v2827_v61 = vadd.f32 %v2825_v16, %v5481_v42  ;;  %v2911_v19 = vadd.f32 %v2909_v52, %v5484_v10  ;;  %v3238_v42 = vld [vmem:[%s5601_s4 + $0x1] sm:$0x1] }
 0x73b   : > { %v3230_v4 = vadd.f32 %v3229_v1, %v3228_v29  ;;  %v3239_v63 = vmul.f32 %v3238_v42, %v3238_v42  ;;  %v3260_v11 = vmul.f32 2.0, %v3238_v42  ;;  %v3276_v59 = vmul.f32 %v3268_v7, %v3238_v42 }
 0x73c   : > { %3248 = vperm.xlu1 %4246, %v2827_v61   ;;  %3255 = vperm.xlu0 %4247, %v2911_v19  }
 0x73d   : > { %v3231_v31 = vrot.slane %v3230_v4, 4  ;;  %v2951_v15 = vpop.permute.xlu1 %2950 }
 0x73e   : > { %v2953_v22 = vadd.f32 %v2951_v15, %v5493_v60 }
 0x73f   : > { %v3232_v40 = vadd.f32 %v3231_v31, %v3230_v4 }
 0x740   : > { %3263 = vperm.xlu1 %4246, %v3095_v46  }
 0x741   : > { %v3233_v24 = vrot.slane %v3232_v40, 2 }
 0x743   : > { %v3234_v23 = vadd.f32 %v3233_v24, %v3232_v40 }
 0x744   : > { %3279 = vperm.xlu1 %4246, %v2953_v22  }
 0x745   : > { %v3235_v38 = vrot.slane %v3234_v23, 1 }
 0x747   : > { %v3236_v49 = vadd.f32 %v3235_v38, %v3234_v23 }
 0x749   : > { %3271 = vperm.xlu0 %4247, %v3236_v49  }
 0x7b7   : > { %v3243_v10 = vpop.permute.xlu0 %3242 }
 0x7b8   : > { %v3245_v13 = vmul.f32 %v3243_v10, %v3239_v63 }
 0x7bb   : > { %v3249_v53 = vpop.permute.xlu1 %3248  ;;  %v3256_v60 = vpop.permute.xlu0 %3255 }
 0x7bc   : > { %v3251_v28 = vadd.f32 %v3249_v53, %v3245_v13  ;;  %v3258_v41 = vmul.f32 %v3256_v60, %v3252_v9 }
 0x7be   : > { %v3259_v58 = vadd.f32 %v3258_v41, %v3251_v28 }
 0x7bf   : > { %v3264_v17 = vpop.permute.xlu1 %3263 }
 0x7c0   : > { %v3266_v20 = vmul.f32 %v3264_v17, %v3260_v11 }
 0x7c2   : > { %v3267_v50 = vadd.f32 %v3266_v20, %v3259_v58 }
 0x7c3   : > { %v3280_v62 = vpop.permute.xlu1 %3279 }
 0x7c4   : > { %v3282_v44 = vmul.f32 %v3280_v62, %v3276_v59 }
 0x7c8   : > { %v3272_v55 = vpop.permute.xlu0 %3271 }
 0x7c9   : > { %v3274_v0 = vmul.f32 %v3272_v55, %v3268_v7 }
 0x7cb   : > { %v3275_v57 = vadd.f32 %v3274_v0, %v3267_v50 }
 0x7cd   : > { %v3283_v18 = vadd.f32 %v3282_v44, %v3275_v57 }
 0x7cf   : > { %3284 = vst [vmem:[%s232_s25] sm:$0x1] %v3283_v18 }
 0x7d0   : > { %4369 = shalt.err (!%p4366_p7)
}
 0x7d1   : > { %s4370_s12 = scalar_lea.hbm %s5555_s7, 16  ;;  %s4374_s15 = scalar_lea.hbm %s5602_s5, 32 }
 0x7d2   : > { %p4371_p8 = scmp.ne.s32.totalorder %s5555_s7, %s4370_s12  ;;  %p4375_p1 = scmp.lt.u32.totalorder %s5555_s7, %s5602_s5 }
 0x7d3   : > { %p4376_p0 = scmp.lt.u32.totalorder %s4374_s15, %s4370_s12  ;;  %p4378_p6 = scmp.lt.u32.totalorder %s4370_s12, %s5555_s7 }
 0x7d4   : > { %p4372_p11 = pnand %p4371_p8, %p5613_p9 }
 0x7d5   : > { %p4377_p5 = por %p4376_p0, %p4375_p1 }
 0x7d6   : > { %p4373_p13 = pneg %p4372_p11 }
 0x7d7   : > { %p4379_p10 = por %p4378_p6, %p4377_p5 }
 0x7d9   : > { %p4380_p12 = pnand %p4379_p10, %p4373_p13 }
 0x7db   : > { %4383 = shalt.err (!%p4380_p12)
}
 0x7dc   : > { %4189 = dma.vmem_to_hbm [thread:$0]  (%p5613_p9), %s5557_s26, 16, %s5555_s7, %s3286_s9  }
 0x7dd PF: > { %p4201_p2 = scmp.ge.s32.totalorder %s4422_s21, 2  ;;  %s3310_s23 = sand.u32 1, %s4410_s18  }
 0x7de   : > { %p5614_p3 = scmp.ne.s32.totalorder %s5607_s29, 0  ;;  %s3311_s25 = scalar_lea.sflag [#allocation6], %s3310_s23 }
 0x7e0   : > { %p4196_p4 = pnand %p4201_p2, %p5614_p3 }
 0x7e2   : > { %4405 = dma.done.wait (!%p4196_p4), %s3311_s25, 16  }
 0x7e3   : > { %4407 = vsyncadd (!%p4196_p4), %s3311_s25, 4294967280  ;;  %p16_p7 = scmp.ge.s32.totalorder %s4488_s24, 4   ;;  %s5615_s18 = smov %s4414_s19 }
 0x7e4   : > { %s5616_s19 = smov %s4418_s20  ;;  %s5617_s20 = smov %s4499_s27 }
 0x7e5   : > { %s5618_s21 = smov %s4488_s24  ;;  %18 = sbr.rel (!%p16_p7) target bundleno = 4 (0x4), region = 89 }
 0x7ec   :  { %3315 = vsyncpa [#allocation5], 1 }
 0x7ed   :  { %3317 = vsyncpa [#allocation5 + $0x1], 1 }
 0x7ee   :  { %3318 = vsyncpa [#allocation6], 1 }
 0x7ef   :  { %3320 = vsyncpa [#allocation6 + $0x1], 1 }

</bundles_post_ra>
